<compile_context>
chip_gen: v7x
topology: tpu7x:2x2x1
jax: 0.10.0
libtpu: 0.0.40
codegen_flags: <defaults>
</compile_context>

<pallas_src>
import functools

import numpy as np
import jax
import jax.numpy as jnp
from jax import lax
from jax.experimental import pallas as pl
from jax.experimental.pallas import tpu as pltpu


# ----------------------------- configuration --------------------------------
NUM_VERTICAL = 10      # env.num_vertical
NUM_HORIZONTAL = 6     # env.num_horizontal
NUM_KIND = 4           # env.num_kind
NUM_DEPTH = 4          # "reading depth" loop in generate_linear_input
N_SQUARE = 100         # hidden width of the MLP
N_PAD = 128            # N_SQUARE zero-padded to a full lane group

HD = NUM_VERTICAL - 2              # conv image height (rows 0:-2 kept)
WD = NUM_HORIZONTAL                # conv image width
HW = HD * WD                       # flattened image / linear_input_size = 48

_fks = max(NUM_VERTICAL - 2, NUM_HORIZONTAL)
KSIZE = int(_fks / 2) * 2 + 1      # full_kernel_size (made odd) = 9
PAD = KSIZE // 2

TILE_B = 64            # boards per grid step  -> NUM_KIND * TILE_B = 256 rows
BATCH = 128            # driver batch -> 2 parallel grid steps
MXU_DTYPE = jnp.bfloat16


# ------------------------- glue: conv -> dense matrix ------------------------
def conv2d_same_as_matrix(w_np: np.ndarray, hd: int, wd: int) -> jnp.ndarray:
    """Return M^T of shape (HW, HW) such that out_flat = in_flat @ M^T
    reproduces nn.Conv2d(1, 1, K, padding=K//2, bias=False) exactly
    (cross-correlation with zero padding)."""
    k = w_np.shape[0]
    p = k // 2
    mat = np.zeros((hd * wd, hd * wd), dtype=np.float32)
    for y in range(hd):
        for x in range(wd):
            o = y * wd + x
            for ky in range(k):
                iy = y + ky - p
                if iy < 0 or iy >= hd:
                    continue
                for kx in range(k):
                    ix = x + kx - p
                    if ix < 0 or ix >= wd:
                        continue
                    mat[o, iy * wd + ix] += w_np[ky, kx]
    return jnp.asarray(mat.T)  # (in, out)


# ------------------------------- Pallas kernel -------------------------------
def _nn_kernel(x_ref, mcne_ref, mn2_ref, consts_ref, w1_ref, w2_ref, out_ref,
               *, num_kind: int, num_depth: int, tile_b: int, hw: int, mxu_dtype):
    f32 = jnp.float32
    x = x_ref[...]                                   # (TILE_B, HW) board values

    # Color indicators stacked color-major along sublanes: row = c*TILE_B + b.
    ecm = jnp.concatenate(
        [(x == float(c + 1)).astype(f32) for c in range(num_kind)], axis=0)
    ecm_mask = ecm != 0.0                            # hoisted predicate
    empty = (x == 0.0).astype(f32)                   # (TILE_B, HW)

    # ---- stage 1: the whole color loop's convs as ONE fused MXU dot --------
    #   [ecm ; empty] @ [Mc | Mn | Me]
    stacked = jnp.concatenate([ecm, empty], axis=0)  # (NK*TB + TB, HW)
    res = jnp.dot(stacked.astype(mxu_dtype), mcne_ref[...],
                  preferred_element_type=f32)        # (NK*TB + TB, 3*HW)
    nkb = num_kind * tile_b
    ecm_mc = res[:nkb, 0:hw]                         # conv_each_color(ecm)
    ecm_mn = res[:nkb, hw:2 * hw]                    # conv_not(ecm)
    empty_mn = res[nkb:, hw:2 * hw]                  # conv_not(empty)
    empty_value = res[nkb:, 2 * hw:3 * hw]           # conv_empty(empty)

    empty_value_rep = jnp.concatenate([empty_value] * num_kind, axis=0)
    empty_mn_rep = jnp.concatenate([empty_mn] * num_kind, axis=0)

    # not_each_color_mat = 1 - ecm - empty (disjoint indicators); the conv is
    # linear, so conv_not(ncm) = conv_not(ones) - conv_not(ecm) - conv_not(empty).
    ones_mn = consts_ref[0:1, 0:hw]                  # conv_not(all-ones), f32
    ncm_conv = ones_mn - ecm_mn - empty_mn_rep       # (NK*TB, HW)

    ecv = ecm_mc + empty_value_rep - ncm_conv        # each_color_value, all colors
    ecv = jnp.where(ecm_mask, ecv, 0.0)              # value[~each_color_mat] = 0

    def color_sum(v):                                # sum color groups -> (TB, HW)
        s = v[0:tile_b]
        for c in range(1, num_kind):
            s = s + v[c * tile_b:(c + 1) * tile_b]
        return s

    # sigmoid via EUP exp + approx reciprocal (no exact f32 divide)
    acv2 = pl.reciprocal(1.0 + jnp.exp(-color_sum(ecv)), approx=True)

    # ---- stage 2: depth refinement, one fused MXU dot per depth step -------
    mn2 = mn2_ref[...]
    for _ in range(num_depth):
        before_rep = jnp.concatenate([acv2] * num_kind, axis=0)  # (NK*TB, HW)
        nc2 = jnp.dot((ncm_conv * before_rep).astype(mxu_dtype), mn2,
                      preferred_element_type=f32)
        # Reference mutates each_color_value_log in place: empty_value and the
        # 2nd conv keep accumulating into ecv across depth steps, re-masked.
        ecv = ecv + empty_value_rep + nc2
        ecv = jnp.where(ecm_mask, ecv, 0.0)
        acv2 = pl.reciprocal(1.0 + jnp.exp(-color_sum(ecv)), approx=True)

    # ---- MLP head: Linear -> lrelu(0.2) -> Linear -> lrelu(0.2) -> Linear --
    # Hidden width padded 100 -> 128 (zero pad => exact), full lane slabs.
    h = jnp.dot(acv2.astype(mxu_dtype), w1_ref[...], preferred_element_type=f32)
    h = jnp.where(h >= 0.0, h, 0.2 * h)
    h = jnp.dot(h.astype(mxu_dtype), w2_ref[...], preferred_element_type=f32)
    h = jnp.where(h >= 0.0, h, 0.2 * h)
    # layer3 (128 -> 1) via transposed-RHS dot against the consts slab:
    # row 1 of consts holds w3, result row is lane-dense (1, TILE_B).
    out8 = lax.dot_general(consts_ref[...].astype(mxu_dtype), h.astype(mxu_dtype),
                           dimension_numbers=(((1,), (1,)), ((), ())),
                           preferred_element_type=f32)           # (8, TILE_B)
    out_ref[...] = out8[1:2, :].reshape(1, 1, tile_b)


def nn_each_ln_exp_forward(x_flat, mcne, mn2, consts, w1_p, w2_p):
    b, hw = x_flat.shape
    tile_b = TILE_B if b % TILE_B == 0 else b
    # TODO(synk): pad ragged batches up to a tile multiple instead of falling
    # back to a single big tile.
    nt = b // tile_b

    kernel = functools.partial(
        _nn_kernel, num_kind=NUM_KIND, num_depth=NUM_DEPTH,
        tile_b=tile_b, hw=hw, mxu_dtype=mcne.dtype)

    # Per-tile live state is ~1 MB, far below the default scoped-VMEM limit on
    # every generation (v7x included), so no vmem_limit override is needed.
    out = pl.pallas_call(
        kernel,
        out_shape=jax.ShapeDtypeStruct((nt, 1, tile_b), jnp.float32),
        grid=(nt,),
        in_specs=[
            pl.BlockSpec((tile_b, hw), lambda i: (i, 0)),      # x: per-tile
            pl.BlockSpec(mcne.shape, lambda i: (0, 0)),        # weights stay
            pl.BlockSpec(mn2.shape, lambda i: (0, 0)),         # VMEM-resident
            pl.BlockSpec(consts.shape, lambda i: (0, 0)),      # across tiles
            pl.BlockSpec(w1_p.shape, lambda i: (0, 0)),
            pl.BlockSpec(w2_p.shape, lambda i: (0, 0)),
        ],
        out_specs=pl.BlockSpec((1, 1, tile_b), lambda i: (i, 0, 0)),
        compiler_params=pltpu.CompilerParams(
            dimension_semantics=("parallel",)),                # both TCs on v7x
    )(x_flat, mcne, mn2, consts, w1_p, w2_p)
    return out.reshape(b, 1)


# --------------------------- pure-JAX f32 reference ---------------------------
def _reference_forward(board_vhb, w_each, w_not, w_not2, w_empty, w1, w2, w3):
    """Faithful float32 re-implementation of the PyTorch module."""
    hi = lax.Precision.HIGHEST
    x = board_vhb[0:-2, :, :]
    x = jnp.transpose(x, (2, 0, 1))[:, None, :, :].astype(jnp.float32)
    dn = ("NCHW", "OIHW", "NCHW")

    def conv(img, w):
        return lax.conv_general_dilated(
            img, w[None, None, :, :], window_strides=(1, 1),
            padding=[(PAD, PAD), (PAD, PAD)], dimension_numbers=dn, precision=hi)

    empty = (x == 0).astype(jnp.float32)
    empty_value = conv(empty, w_empty)
    all_color_value = jnp.zeros_like(x)
    ecm_log, ecv_log, ncm_log = [], [], []
    for ii in range(NUM_KIND):
        ecm = (x == ii + 1).astype(jnp.float32)
        ncm = ((ecm + empty) == 0).astype(jnp.float32)
        ecv = conv(ecm, w_each) + empty_value
        ecv = ecv - conv(ncm, w_not)
        ecv = jnp.where(ecm != 0, ecv, 0.0)
        all_color_value = all_color_value + ecv
        ecm_log.append(ecm); ecv_log.append(ecv); ncm_log.append(conv(ncm, w_not))
    acv2 = 1.0 / (1.0 + jnp.exp(-all_color_value))
    for _ in range(NUM_DEPTH):
        before = acv2
        acv2 = jnp.zeros_like(x)
        for ii in range(NUM_KIND):
            ecv = ecv_log[ii] + empty_value
            ecv = ecv + conv(ncm_log[ii] * before, w_not2)
            ecv = jnp.where(ecm_log[ii] != 0, ecv, 0.0)
            ecv_log[ii] = ecv            # PyTorch mutates the log view in place
            acv2 = acv2 + ecv
        acv2 = 1.0 / (1.0 + jnp.exp(-acv2))
    flat = acv2.reshape(acv2.shape[0], -1)
    h = jnp.dot(flat, w1.T, precision=hi)
    h = jnp.where(h >= 0, h, 0.2 * h)
    h = jnp.dot(h, w2.T, precision=hi)
    h = jnp.where(h >= 0, h, 0.2 * h)
    return jnp.dot(h, w3.T, precision=hi)


# ---------------------------------- driver -----------------------------------
if __name__ == "__main__":
    root = jax.random.PRNGKey(0)
    keys = jax.random.split(root, 8)

    # Conv weights (1,1,K,K) -> (K,K), init N(0, 0.3).
    w_each = 0.3 * jax.random.normal(keys[0], (KSIZE, KSIZE), jnp.float32)
    w_not = 0.3 * jax.random.normal(keys[1], (KSIZE, KSIZE), jnp.float32)
    w_not2 = 0.3 * jax.random.normal(keys[2], (KSIZE, KSIZE), jnp.float32)
    w_empty = 0.3 * jax.random.normal(keys[3], (KSIZE, KSIZE), jnp.float32)

    # Linear weights: PyTorch Linear(in, out) stores (out, in); y = x @ W.T.
    w1 = 0.3 * jax.random.normal(keys[4], (N_SQUARE, HW), jnp.float32)
    w2 = 0.3 * jax.random.normal(keys[5], (N_SQUARE, N_SQUARE), jnp.float32)
    w3 = 0.3 * jax.random.normal(keys[6], (1, N_SQUARE), jnp.float32)

    # ---- host-side one-time weight prep -------------------------------------
    mc = conv2d_same_as_matrix(np.asarray(w_each), HD, WD)     # (HW, HW)
    mn = conv2d_same_as_matrix(np.asarray(w_not), HD, WD)
    mn2m = conv2d_same_as_matrix(np.asarray(w_not2), HD, WD)
    me = conv2d_same_as_matrix(np.asarray(w_empty), HD, WD)

    # Fused stage-1 conv weight [Mc | Mn | Me] -> one MXU dot for the color loop.
    mcne = jnp.concatenate([mc, mn, me], axis=1).astype(MXU_DTYPE)   # (48, 144)
    mn2 = mn2m.astype(MXU_DTYPE)                                     # (48, 48)

    # conv_not(all-ones) against the bf16-rounded Mn so the linearity
    # reconstruction cancels against the same rounding as the in-kernel dots.
    mn_b = mn.astype(MXU_DTYPE).astype(jnp.float32)
    ones_mn = jnp.ones((1, HW), jnp.float32) @ mn_b                  # (1, 48)

    # One (8, 128) constants slab: row 0 = conv_not(ones), row 1 = w3 (padded).
    consts = jnp.zeros((8, N_PAD), jnp.float32)
    consts = consts.at[0, :HW].set(ones_mn[0])
    consts = consts.at[1, :N_SQUARE].set(w3[0])

    # MLP weights transposed to (in, out), zero-padded 100 -> 128 lanes (exact).
    w1_p = jnp.zeros((HW, N_PAD), jnp.float32).at[:, :N_SQUARE].set(w1.T)
    w2_p = jnp.zeros((N_PAD, N_PAD), jnp.float32).at[:N_SQUARE, :N_SQUARE].set(w2.T)
    w1_p = w1_p.astype(MXU_DTYPE)
    w2_p = w2_p.astype(MXU_DTYPE)

    # Input board, PyTorch calling convention: (V, H, B) integer dot kinds.
    board = jax.random.randint(
        keys[7], (NUM_VERTICAL, NUM_HORIZONTAL, BATCH), 0, NUM_KIND + 1)

    # Glue equivalent of the tensor plumbing in generate_linear_input:
    # drop the last two rows, move batch first, flatten each (HD, WD) image.
    x = jnp.transpose(board[0:-2, :, :], (2, 0, 1))          # (B, HD, WD)
    x_flat = x.reshape(BATCH, HW).astype(jnp.float32)        # (B, HW)

    out = nn_each_ln_exp_forward(x_flat, mcne, mn2, consts, w1_p, w2_p)
    out = jax.block_until_ready(out)
    assert out.shape == (BATCH, 1)

    # Loose-tolerance correctness check against the pure-JAX f32 reference
    # (bf16 MXU operands + approx reciprocal drift, structural bugs would be O(1+)).
    ref = jax.block_until_ready(
        _reference_forward(board, w_each, w_not, w_not2, w_empty, w1, w2, w3))
    np.testing.assert_allclose(np.asarray(out), np.asarray(ref), rtol=0.3, atol=0.5)

    print("KERNEL_OK")
</pallas_src>

<mosaic_0001>
module attributes {stable_mosaic.version = 11 : i64} {
  func.func @_nn_kernel(%arg0: i32, %arg1: memref<64x48xf32, #tpu.memory_space<vmem>>, %arg2: memref<48x144xbf16, #tpu.memory_space<vmem>>, %arg3: memref<48x48xbf16, #tpu.memory_space<vmem>>, %arg4: memref<8x128xf32, #tpu.memory_space<vmem>>, %arg5: memref<48x128xbf16, #tpu.memory_space<vmem>>, %arg6: memref<128x128xbf16, #tpu.memory_space<vmem>>, %arg7: memref<1x1x64xf32, #tpu.memory_space<vmem>>) attributes {dimension_semantics = [#tpu.dimension_semantics<parallel>], iteration_bounds = array<i64: 2>, scalar_prefetch = 0 : i64, scratch_operands = 0 : i64, tpu.core_type = #tpu.core_type<tc>, window_params = [{transform_indices = @transform_0, window_bounds = array<i64: 64, 48>}, {pipeline_mode = #tpu.pipeline_mode<synchronous>, transform_indices = @transform_1, window_bounds = array<i64: 48, 144>}, {pipeline_mode = #tpu.pipeline_mode<synchronous>, transform_indices = @transform_2, window_bounds = array<i64: 48, 48>}, {pipeline_mode = #tpu.pipeline_mode<synchronous>, transform_indices = @transform_3, window_bounds = array<i64: 8, 128>}, {pipeline_mode = #tpu.pipeline_mode<synchronous>, transform_indices = @transform_4, window_bounds = array<i64: 48, 128>}, {pipeline_mode = #tpu.pipeline_mode<synchronous>, transform_indices = @transform_5, window_bounds = array<i64: 128, 128>}, {transform_indices = @transform_6, window_bounds = array<i64: 1, 1, 64>}]} {
    %c0 = arith.constant 0 : index
    %c0_0 = arith.constant 0 : index
    %0 = vector.load %arg1[%c0, %c0_0] : memref<64x48xf32, #tpu.memory_space<vmem>>, vector<64x48xf32>
    %cst = arith.constant 1.000000e+00 : f32
    %1 = vector.broadcast %cst : f32 to vector<64x48xf32>
    %2 = arith.cmpf oeq, %0, %1 : vector<64x48xf32>
    %3 = arith.extui %2 : vector<64x48xi1> to vector<64x48xi32>
    %4 = arith.sitofp %3 : vector<64x48xi32> to vector<64x48xf32>
    %cst_1 = arith.constant 2.000000e+00 : f32
    %5 = vector.broadcast %cst_1 : f32 to vector<64x48xf32>
    %6 = arith.cmpf oeq, %0, %5 : vector<64x48xf32>
    %7 = arith.extui %6 : vector<64x48xi1> to vector<64x48xi32>
    %8 = arith.sitofp %7 : vector<64x48xi32> to vector<64x48xf32>
    %cst_2 = arith.constant 3.000000e+00 : f32
    %9 = vector.broadcast %cst_2 : f32 to vector<64x48xf32>
    %10 = arith.cmpf oeq, %0, %9 : vector<64x48xf32>
    %11 = arith.extui %10 : vector<64x48xi1> to vector<64x48xi32>
    %12 = arith.sitofp %11 : vector<64x48xi32> to vector<64x48xf32>
    %cst_3 = arith.constant 4.000000e+00 : f32
    %13 = vector.broadcast %cst_3 : f32 to vector<64x48xf32>
    %14 = arith.cmpf oeq, %0, %13 : vector<64x48xf32>
    %15 = arith.extui %14 : vector<64x48xi1> to vector<64x48xi32>
    %16 = arith.sitofp %15 : vector<64x48xi32> to vector<64x48xf32>
    %17 = tpu.concatenate %4, %8, %12, %16 in 0 : vector<64x48xf32>, vector<64x48xf32>, vector<64x48xf32>, vector<64x48xf32> -> vector<256x48xf32>
    %cst_4 = arith.constant 0.000000e+00 : f32
    %18 = vector.broadcast %cst_4 : f32 to vector<256x48xf32>
    %19 = arith.cmpf one, %17, %18 : vector<256x48xf32>
    %cst_5 = arith.constant 0.000000e+00 : f32
    %20 = vector.broadcast %cst_5 : f32 to vector<64x48xf32>
    %21 = arith.cmpf oeq, %0, %20 : vector<64x48xf32>
    %22 = arith.extui %21 : vector<64x48xi1> to vector<64x48xi32>
    %23 = arith.sitofp %22 : vector<64x48xi32> to vector<64x48xf32>
    %24 = tpu.concatenate %17, %23 in 0 : vector<256x48xf32>, vector<64x48xf32> -> vector<320x48xf32>
    %25 = arith.truncf %24 : vector<320x48xf32> to vector<320x48xbf16>
    %c0_6 = arith.constant 0 : index
    %c0_7 = arith.constant 0 : index
    %26 = vector.load %arg2[%c0_6, %c0_7] : memref<48x144xbf16, #tpu.memory_space<vmem>>, vector<48x144xbf16>
    %cst_8 = arith.constant dense<0.000000e+00> : vector<320x144xf32>
    %27 = tpu.matmul %25, %26, %cst_8 {dimension_numbers = #tpu.dot_dimension_numbers<[1], [0], [0], [1], [0, 0, 1, 1], [], []>} : vector<320x48xbf16>, vector<48x144xbf16>, vector<320x144xf32> -> vector<320x144xf32>
    %28 = vector.extract_strided_slice %27 {offsets = [0, 0], sizes = [256, 48], strides = [1, 1]} : vector<320x144xf32> to vector<256x48xf32>
    %29 = vector.extract_strided_slice %27 {offsets = [0, 48], sizes = [256, 48], strides = [1, 1]} : vector<320x144xf32> to vector<256x48xf32>
    %30 = vector.extract_strided_slice %27 {offsets = [256, 48], sizes = [64, 48], strides = [1, 1]} : vector<320x144xf32> to vector<64x48xf32>
    %31 = vector.extract_strided_slice %27 {offsets = [256, 96], sizes = [64, 48], strides = [1, 1]} : vector<320x144xf32> to vector<64x48xf32>
    %32 = tpu.concatenate %31, %31, %31, %31 in 0 : vector<64x48xf32>, vector<64x48xf32>, vector<64x48xf32>, vector<64x48xf32> -> vector<256x48xf32>
    %33 = tpu.concatenate %30, %30, %30, %30 in 0 : vector<64x48xf32>, vector<64x48xf32>, vector<64x48xf32>, vector<64x48xf32> -> vector<256x48xf32>
    %c0_9 = arith.constant 0 : index
    %c0_10 = arith.constant 0 : index
    %34 = vector.load %arg4[%c0_9, %c0_10] : memref<8x128xf32, #tpu.memory_space<vmem>>, vector<1x48xf32>
    %35 = vector.broadcast %34 : vector<1x48xf32> to vector<256x48xf32>
    %36 = arith.subf %35, %29 : vector<256x48xf32>
    %37 = arith.subf %36, %33 : vector<256x48xf32>
    %38 = arith.addf %28, %32 : vector<256x48xf32>
    %39 = arith.subf %38, %37 : vector<256x48xf32>
    %cst_11 = arith.constant 0.000000e+00 : f32
    %40 = vector.broadcast %cst_11 : f32 to vector<256x48xf32>
    %41 = arith.select %19, %39, %40 : vector<256x48xi1>, vector<256x48xf32>
    %42 = vector.extract_strided_slice %41 {offsets = [0, 0], sizes = [64, 48], strides = [1, 1]} : vector<256x48xf32> to vector<64x48xf32>
    %43 = vector.extract_strided_slice %41 {offsets = [64, 0], sizes = [64, 48], strides = [1, 1]} : vector<256x48xf32> to vector<64x48xf32>
    %44 = arith.addf %42, %43 : vector<64x48xf32>
    %45 = vector.extract_strided_slice %41 {offsets = [128, 0], sizes = [64, 48], strides = [1, 1]} : vector<256x48xf32> to vector<64x48xf32>
    %46 = arith.addf %44, %45 : vector<64x48xf32>
    %47 = vector.extract_strided_slice %41 {offsets = [192, 0], sizes = [64, 48], strides = [1, 1]} : vector<256x48xf32> to vector<64x48xf32>
    %48 = arith.addf %46, %47 : vector<64x48xf32>
    %cst_12 = arith.constant 0.000000e+00 : f32
    %49 = vector.broadcast %cst_12 : f32 to vector<64x48xf32>
    %50 = arith.subf %49, %48 : vector<64x48xf32>
    %51 = math.exp %50 : vector<64x48xf32>
    %cst_13 = arith.constant 1.000000e+00 : f32
    %52 = vector.broadcast %cst_13 : f32 to vector<64x48xf32>
    %53 = arith.addf %52, %51 : vector<64x48xf32>
    %54 = tpu.reciprocal %53 {approx = true} : vector<64x48xf32> -> vector<64x48xf32>
    %c0_14 = arith.constant 0 : index
    %c0_15 = arith.constant 0 : index
    %55 = vector.load %arg3[%c0_14, %c0_15] : memref<48x48xbf16, #tpu.memory_space<vmem>>, vector<48x48xbf16>
    %56 = tpu.concatenate %54, %54, %54, %54 in 0 : vector<64x48xf32>, vector<64x48xf32>, vector<64x48xf32>, vector<64x48xf32> -> vector<256x48xf32>
    %57 = arith.mulf %37, %56 : vector<256x48xf32>
    %58 = arith.truncf %57 : vector<256x48xf32> to vector<256x48xbf16>
    %cst_16 = arith.constant dense<0.000000e+00> : vector<256x48xf32>
    %59 = tpu.matmul %58, %55, %cst_16 {dimension_numbers = #tpu.dot_dimension_numbers<[1], [0], [0], [1], [0, 0, 1, 1], [], []>} : vector<256x48xbf16>, vector<48x48xbf16>, vector<256x48xf32> -> vector<256x48xf32>
    %60 = arith.addf %41, %32 : vector<256x48xf32>
    %61 = arith.addf %60, %59 : vector<256x48xf32>
    %cst_17 = arith.constant 0.000000e+00 : f32
    %62 = vector.broadcast %cst_17 : f32 to vector<256x48xf32>
    %63 = arith.select %19, %61, %62 : vector<256x48xi1>, vector<256x48xf32>
    %64 = vector.extract_strided_slice %63 {offsets = [0, 0], sizes = [64, 48], strides = [1, 1]} : vector<256x48xf32> to vector<64x48xf32>
    %65 = vector.extract_strided_slice %63 {offsets = [64, 0], sizes = [64, 48], strides = [1, 1]} : vector<256x48xf32> to vector<64x48xf32>
    %66 = arith.addf %64, %65 : vector<64x48xf32>
    %67 = vector.extract_strided_slice %63 {offsets = [128, 0], sizes = [64, 48], strides = [1, 1]} : vector<256x48xf32> to vector<64x48xf32>
    %68 = arith.addf %66, %67 : vector<64x48xf32>
    %69 = vector.extract_strided_slice %63 {offsets = [192, 0], sizes = [64, 48], strides = [1, 1]} : vector<256x48xf32> to vector<64x48xf32>
    %70 = arith.addf %68, %69 : vector<64x48xf32>
    %cst_18 = arith.constant 0.000000e+00 : f32
    %71 = vector.broadcast %cst_18 : f32 to vector<64x48xf32>
    %72 = arith.subf %71, %70 : vector<64x48xf32>
    %73 = math.exp %72 : vector<64x48xf32>
    %cst_19 = arith.constant 1.000000e+00 : f32
    %74 = vector.broadcast %cst_19 : f32 to vector<64x48xf32>
    %75 = arith.addf %74, %73 : vector<64x48xf32>
    %76 = tpu.reciprocal %75 {approx = true} : vector<64x48xf32> -> vector<64x48xf32>
    %77 = tpu.concatenate %76, %76, %76, %76 in 0 : vector<64x48xf32>, vector<64x48xf32>, vector<64x48xf32>, vector<64x48xf32> -> vector<256x48xf32>
    %78 = arith.mulf %37, %77 : vector<256x48xf32>
    %79 = arith.truncf %78 : vector<256x48xf32> to vector<256x48xbf16>
    %cst_20 = arith.constant dense<0.000000e+00> : vector<256x48xf32>
    %80 = tpu.matmul %79, %55, %cst_20 {dimension_numbers = #tpu.dot_dimension_numbers<[1], [0], [0], [1], [0, 0, 1, 1], [], []>} : vector<256x48xbf16>, vector<48x48xbf16>, vector<256x48xf32> -> vector<256x48xf32>
    %81 = arith.addf %63, %32 : vector<256x48xf32>
    %82 = arith.addf %81, %80 : vector<256x48xf32>
    %cst_21 = arith.constant 0.000000e+00 : f32
    %83 = vector.broadcast %cst_21 : f32 to vector<256x48xf32>
    %84 = arith.select %19, %82, %83 : vector<256x48xi1>, vector<256x48xf32>
    %85 = vector.extract_strided_slice %84 {offsets = [0, 0], sizes = [64, 48], strides = [1, 1]} : vector<256x48xf32> to vector<64x48xf32>
    %86 = vector.extract_strided_slice %84 {offsets = [64, 0], sizes = [64, 48], strides = [1, 1]} : vector<256x48xf32> to vector<64x48xf32>
    %87 = arith.addf %85, %86 : vector<64x48xf32>
    %88 = vector.extract_strided_slice %84 {offsets = [128, 0], sizes = [64, 48], strides = [1, 1]} : vector<256x48xf32> to vector<64x48xf32>
    %89 = arith.addf %87, %88 : vector<64x48xf32>
    %90 = vector.extract_strided_slice %84 {offsets = [192, 0], sizes = [64, 48], strides = [1, 1]} : vector<256x48xf32> to vector<64x48xf32>
    %91 = arith.addf %89, %90 : vector<64x48xf32>
    %cst_22 = arith.constant 0.000000e+00 : f32
    %92 = vector.broadcast %cst_22 : f32 to vector<64x48xf32>
    %93 = arith.subf %92, %91 : vector<64x48xf32>
    %94 = math.exp %93 : vector<64x48xf32>
    %cst_23 = arith.constant 1.000000e+00 : f32
    %95 = vector.broadcast %cst_23 : f32 to vector<64x48xf32>
    %96 = arith.addf %95, %94 : vector<64x48xf32>
    %97 = tpu.reciprocal %96 {approx = true} : vector<64x48xf32> -> vector<64x48xf32>
    %98 = tpu.concatenate %97, %97, %97, %97 in 0 : vector<64x48xf32>, vector<64x48xf32>, vector<64x48xf32>, vector<64x48xf32> -> vector<256x48xf32>
    %99 = arith.mulf %37, %98 : vector<256x48xf32>
    %100 = arith.truncf %99 : vector<256x48xf32> to vector<256x48xbf16>
    %cst_24 = arith.constant dense<0.000000e+00> : vector<256x48xf32>
    %101 = tpu.matmul %100, %55, %cst_24 {dimension_numbers = #tpu.dot_dimension_numbers<[1], [0], [0], [1], [0, 0, 1, 1], [], []>} : vector<256x48xbf16>, vector<48x48xbf16>, vector<256x48xf32> -> vector<256x48xf32>
    %102 = arith.addf %84, %32 : vector<256x48xf32>
    %103 = arith.addf %102, %101 : vector<256x48xf32>
    %cst_25 = arith.constant 0.000000e+00 : f32
    %104 = vector.broadcast %cst_25 : f32 to vector<256x48xf32>
    %105 = arith.select %19, %103, %104 : vector<256x48xi1>, vector<256x48xf32>
    %106 = vector.extract_strided_slice %105 {offsets = [0, 0], sizes = [64, 48], strides = [1, 1]} : vector<256x48xf32> to vector<64x48xf32>
    %107 = vector.extract_strided_slice %105 {offsets = [64, 0], sizes = [64, 48], strides = [1, 1]} : vector<256x48xf32> to vector<64x48xf32>
    %108 = arith.addf %106, %107 : vector<64x48xf32>
    %109 = vector.extract_strided_slice %105 {offsets = [128, 0], sizes = [64, 48], strides = [1, 1]} : vector<256x48xf32> to vector<64x48xf32>
    %110 = arith.addf %108, %109 : vector<64x48xf32>
    %111 = vector.extract_strided_slice %105 {offsets = [192, 0], sizes = [64, 48], strides = [1, 1]} : vector<256x48xf32> to vector<64x48xf32>
    %112 = arith.addf %110, %111 : vector<64x48xf32>
    %cst_26 = arith.constant 0.000000e+00 : f32
    %113 = vector.broadcast %cst_26 : f32 to vector<64x48xf32>
    %114 = arith.subf %113, %112 : vector<64x48xf32>
    %115 = math.exp %114 : vector<64x48xf32>
    %cst_27 = arith.constant 1.000000e+00 : f32
    %116 = vector.broadcast %cst_27 : f32 to vector<64x48xf32>
    %117 = arith.addf %116, %115 : vector<64x48xf32>
    %118 = tpu.reciprocal %117 {approx = true} : vector<64x48xf32> -> vector<64x48xf32>
    %119 = tpu.concatenate %118, %118, %118, %118 in 0 : vector<64x48xf32>, vector<64x48xf32>, vector<64x48xf32>, vector<64x48xf32> -> vector<256x48xf32>
    %120 = arith.mulf %37, %119 : vector<256x48xf32>
    %121 = arith.truncf %120 : vector<256x48xf32> to vector<256x48xbf16>
    %cst_28 = arith.constant dense<0.000000e+00> : vector<256x48xf32>
    %122 = tpu.matmul %121, %55, %cst_28 {dimension_numbers = #tpu.dot_dimension_numbers<[1], [0], [0], [1], [0, 0, 1, 1], [], []>} : vector<256x48xbf16>, vector<48x48xbf16>, vector<256x48xf32> -> vector<256x48xf32>
    %123 = arith.addf %105, %32 : vector<256x48xf32>
    %124 = arith.addf %123, %122 : vector<256x48xf32>
    %cst_29 = arith.constant 0.000000e+00 : f32
    %125 = vector.broadcast %cst_29 : f32 to vector<256x48xf32>
    %126 = arith.select %19, %124, %125 : vector<256x48xi1>, vector<256x48xf32>
    %127 = vector.extract_strided_slice %126 {offsets = [0, 0], sizes = [64, 48], strides = [1, 1]} : vector<256x48xf32> to vector<64x48xf32>
    %128 = vector.extract_strided_slice %126 {offsets = [64, 0], sizes = [64, 48], strides = [1, 1]} : vector<256x48xf32> to vector<64x48xf32>
    %129 = arith.addf %127, %128 : vector<64x48xf32>
    %130 = vector.extract_strided_slice %126 {offsets = [128, 0], sizes = [64, 48], strides = [1, 1]} : vector<256x48xf32> to vector<64x48xf32>
    %131 = arith.addf %129, %130 : vector<64x48xf32>
    %132 = vector.extract_strided_slice %126 {offsets = [192, 0], sizes = [64, 48], strides = [1, 1]} : vector<256x48xf32> to vector<64x48xf32>
    %133 = arith.addf %131, %132 : vector<64x48xf32>
    %cst_30 = arith.constant 0.000000e+00 : f32
    %134 = vector.broadcast %cst_30 : f32 to vector<64x48xf32>
    %135 = arith.subf %134, %133 : vector<64x48xf32>
    %136 = math.exp %135 : vector<64x48xf32>
    %cst_31 = arith.constant 1.000000e+00 : f32
    %137 = vector.broadcast %cst_31 : f32 to vector<64x48xf32>
    %138 = arith.addf %137, %136 : vector<64x48xf32>
    %139 = tpu.reciprocal %138 {approx = true} : vector<64x48xf32> -> vector<64x48xf32>
    %140 = arith.truncf %139 : vector<64x48xf32> to vector<64x48xbf16>
    %c0_32 = arith.constant 0 : index
    %c0_33 = arith.constant 0 : index
    %141 = vector.load %arg5[%c0_32, %c0_33] : memref<48x128xbf16, #tpu.memory_space<vmem>>, vector<48x128xbf16>
    %cst_34 = arith.constant dense<0.000000e+00> : vector<64x128xf32>
    %142 = tpu.matmul %140, %141, %cst_34 {dimension_numbers = #tpu.dot_dimension_numbers<[1], [0], [0], [1], [0, 0, 1, 1], [], []>} : vector<64x48xbf16>, vector<48x128xbf16>, vector<64x128xf32> -> vector<64x128xf32>
    %cst_35 = arith.constant 0.000000e+00 : f32
    %143 = vector.broadcast %cst_35 : f32 to vector<64x128xf32>
    %144 = arith.cmpf oge, %142, %143 : vector<64x128xf32>
    %cst_36 = arith.constant 2.000000e-01 : f32
    %145 = vector.broadcast %cst_36 : f32 to vector<64x128xf32>
    %146 = arith.mulf %145, %142 : vector<64x128xf32>
    %147 = arith.select %144, %142, %146 : vector<64x128xi1>, vector<64x128xf32>
    %148 = arith.truncf %147 : vector<64x128xf32> to vector<64x128xbf16>
    %c0_37 = arith.constant 0 : index
    %c0_38 = arith.constant 0 : index
    %149 = vector.load %arg6[%c0_37, %c0_38] : memref<128x128xbf16, #tpu.memory_space<vmem>>, vector<128x128xbf16>
    %cst_39 = arith.constant dense<0.000000e+00> : vector<64x128xf32>
    %150 = tpu.matmul %148, %149, %cst_39 {dimension_numbers = #tpu.dot_dimension_numbers<[1], [0], [0], [1], [0, 0, 1, 1], [], []>} : vector<64x128xbf16>, vector<128x128xbf16>, vector<64x128xf32> -> vector<64x128xf32>
    %cst_40 = arith.constant 0.000000e+00 : f32
    %151 = vector.broadcast %cst_40 : f32 to vector<64x128xf32>
    %152 = arith.cmpf oge, %150, %151 : vector<64x128xf32>
    %cst_41 = arith.constant 2.000000e-01 : f32
    %153 = vector.broadcast %cst_41 : f32 to vector<64x128xf32>
    %154 = arith.mulf %153, %150 : vector<64x128xf32>
    %155 = arith.select %152, %150, %154 : vector<64x128xi1>, vector<64x128xf32>
    %c0_42 = arith.constant 0 : index
    %c0_43 = arith.constant 0 : index
    %156 = vector.load %arg4[%c0_42, %c0_43] : memref<8x128xf32, #tpu.memory_space<vmem>>, vector<8x128xf32>
    %157 = arith.truncf %156 : vector<8x128xf32> to vector<8x128xbf16>
    %158 = arith.truncf %155 : vector<64x128xf32> to vector<64x128xbf16>
    %cst_44 = arith.constant dense<0.000000e+00> : vector<8x64xf32>
    %159 = tpu.matmul %157, %158, %cst_44 {dimension_numbers = #tpu.dot_dimension_numbers<[1], [1], [0], [0], [0, 0, 1, 0], [], []>} : vector<8x128xbf16>, vector<64x128xbf16>, vector<8x64xf32> -> vector<8x64xf32>
    %160 = vector.extract_strided_slice %159 {offsets = [1, 0], sizes = [1, 64], strides = [1, 1]} : vector<8x64xf32> to vector<1x64xf32>
    %161 = vector.shape_cast %160 : vector<1x64xf32> to vector<1x1x64xf32>
    %c0_45 = arith.constant 0 : index
    %c0_46 = arith.constant 0 : index
    %c0_47 = arith.constant 0 : index
    %162 = vector.load %arg7[%c0_45, %c0_46, %c0_47] : memref<1x1x64xf32, #tpu.memory_space<vmem>>, vector<1x1x64xf32>
    tpu.vector_store %arg7[%c0_45, %c0_46, %c0_47], %161 {strides = array<i32>} : memref<1x1x64xf32, #tpu.memory_space<vmem>>, vector<1x1x64xf32>,
    return
  }
  func.func @transform_0(%arg0: i32) -> (i32, i32) {
    %c0_i32 = arith.constant 0 : i32
    %c0_i32_0 = arith.constant 0 : i32
    return %arg0, %c0_i32 : i32, i32
  }
  func.func @transform_1(%arg0: i32) -> (i32, i32) {
    %c0_i32 = arith.constant 0 : i32
    %c0_i32_0 = arith.constant 0 : i32
    %c0_i32_1 = arith.constant 0 : i32
    return %c0_i32, %c0_i32_0 : i32, i32
  }
  func.func @transform_2(%arg0: i32) -> (i32, i32) {
    %c0_i32 = arith.constant 0 : i32
    %c0_i32_0 = arith.constant 0 : i32
    %c0_i32_1 = arith.constant 0 : i32
    return %c0_i32, %c0_i32_0 : i32, i32
  }
  func.func @transform_3(%arg0: i32) -> (i32, i32) {
    %c0_i32 = arith.constant 0 : i32
    %c0_i32_0 = arith.constant 0 : i32
    %c0_i32_1 = arith.constant 0 : i32
    return %c0_i32, %c0_i32_0 : i32, i32
  }
  func.func @transform_4(%arg0: i32) -> (i32, i32) {
    %c0_i32 = arith.constant 0 : i32
    %c0_i32_0 = arith.constant 0 : i32
    %c0_i32_1 = arith.constant 0 : i32
    return %c0_i32, %c0_i32_0 : i32, i32
  }
  func.func @transform_5(%arg0: i32) -> (i32, i32) {
    %c0_i32 = arith.constant 0 : i32
    %c0_i32_0 = arith.constant 0 : i32
    %c0_i32_1 = arith.constant 0 : i32
    return %c0_i32, %c0_i32_0 : i32, i32
  }
  func.func @transform_6(%arg0: i32) -> (i32, i32, i32) {
    %c0_i32 = arith.constant 0 : i32
    %c0_i32_0 = arith.constant 0 : i32
    %c0_i32_1 = arith.constant 0 : i32
    return %arg0, %c0_i32, %c0_i32_0 : i32, i32, i32
  }
}

</mosaic_0001>

<bundles_post_ra>
// kernel: tpu_custom_call.1
= control target key start
LH: loop header
LB: loop body
LE: loop exit
PB: predicated region body
PF: predicated region fallthrough
CT: control target
= control target key end

     0   :  { %11 = vsyncpa [#allocation3], 0  ;;  %s6264_s0 = inlined_call_operand.vmem [shape: f32[128,48], index: 0, kind: input, shape index: {}]   ;;  %s6265_s1 = inlined_call_operand.vmem [shape: bf16[48,144], index: 1, kind: input, shape index: {}]   ;;  %s6266_s2 = inlined_call_operand.vmem [shape: bf16[48,48], index: 2, kind: input, shape index: {}]   ;;  %s6267_s3 = inlined_call_operand.vmem [shape: f32[8,128], index: 3, kind: input, shape index: {}]   ;;  %s6268_s4 = inlined_call_operand.vmem [shape: bf16[48,128], index: 4, kind: input, shape index: {}]   ;;  %s6269_s5 = inlined_call_operand.vmem [shape: bf16[128,128], index: 5, kind: input, shape index: {}]   ;;  %s6270_s6 = inlined_call_operand.hbm [shape: f32[2,1,64], index: 6, kind: output, shape index: {}]  }
   0x1   :  { %13 = vsyncpa [#allocation3 + $0x1], 0  ;;  %s4065_s21 = smov 0   ;;  %s4067_s22 = smov 0  }
   0x2   :  { %s4069_s23 = smov 0   ;;  %s4071_s24 = smov 0  }
   0x3 LB: > { %s4086_s25 = sadd.s32 4294967295, %s4022_s24   ;;  %s3270_s26 = sadd.s32 4294967294, %s4022_s24   ;;  %s4022_s24 = sphi %s4071_s24, %s7218_s24   ;;  %s4018_s23 = sphi %s4069_s23, %s7217_s23   ;;  %s4014_s22 = sphi %s4067_s22, %s7216_s22   ;;  %s4010_s21 = sphi %s4065_s21, %s7215_s21  }
   0x4   : > { %s4090_s27 = sadd.s32 1, %s4022_s24   ;;  %s157_s28 = sadd.s32 1, %s4018_s23 }
   0x5   : > { %s154_s29 = ssub.s32 %s4022_s24, %s4090_s27  ;;  %p167_p0 = scmp.ne.s32.totalorder %s4018_s23, %s4014_s22 }
   0x6   : > { %p155_p1 = scmp.eq.s32.totalorder %s154_s29, 0  ;;  %p168_p2 = scmp.eq.s32.totalorder %s4086_s25, 1 }
   0x7   : > { %p173_p3 = scmp.ne.s32.totalorder %s4014_s22, %s4010_s21  ;;  %p174_p4 = scmp.eq.s32.totalorder %s3270_s26, 1 }
   0x8   : > { %s4101_s30 = scalar_select %p155_p1, %s4018_s23, %s157_s28  }
   0x9   : > { %p4103_p5 = por %p168_p2, %p167_p0  ;;  %p4107_p6 = por %p174_p4, %p173_p3 }
   0xa   : > { %p3273_p7 = scmp.ge.s32.totalorder %s4022_s24, 1  ;;  %p216_p8 = scmp.lt.s32.totalorder %s4022_s24, 3 }
   0xc   : > { %p217_p9 = pnand %p3273_p7, %p216_p8 }
   0xe   : > { %220 = sbr.rel (%p217_p9) target bundleno = 2480 (0x9b0), region = 44 }
  0x15   : > { %v3774_v0 = vld [vmem:[%s6265_s1 + $0x4] ss:$8 sps:$4 sm:$0xff]   ;;  %s3274_s11 = sshll.u32 %s4086_s25, 3  ;;  %v3776_v1 = vld [vmem:[%s6265_s1] ss:$8 sps:$4 sm:$0xff]   ;;  %v4024_v2 = vmov 0  }
  0x16   : > { %561 = vmatprep.mubr.bf16.mxu0 %v4024_v2  ;;  %p246_p10 = scmp.lt.s32.totalorder %s3274_s11, 15  ;;  %529 = vmatprep.subr.bf16.mxu0 %v3774_v0  ;;  %v3777_v3 = vld [vmem:[%s6265_s1 + $0x14] ss:$8 sps:$4 sm:$0xff]   ;;  %v3779_v4 = vld [vmem:[%s6265_s1 + $0x10] ss:$8 sps:$4 sm:$0xff]   ;;  %v6271_v9 = vmov 0.0  }
  0x17   : > { %530 = vmatpush1.bf16.msra.mxu0 %v3776_v1  ;;  %v3780_v5 = vld [vmem:[%s6265_s1 + $0x24] ss:$8 sps:$4 sm:$0xff]   ;;  %v3782_v6 = vld [vmem:[%s6265_s1 + $0x20] ss:$8 sps:$4 sm:$0xff]   ;;  %vm6457_vm2 = vcmask 392192   ;;  %s4027_s12 = smov 32  }
  0x18   : > { %s7220_s11 = smov (!%p246_p10, %s3274_s11), 15  ;;  %531 = vmatprep.subr.bf16.mxu0 %v3777_v3  ;;  %s243_s26 = sand.u32 1, %s4014_s22  }
  0x19   : > { %s3275_s20 = sshll.u32 %s7220_s11, 3  ;;  %s4026_s11 = smov 80  }
  0x1a   : > { %s4133_s29 = scalar_lea.vmem %s6264_s0, %s3275_s20  ;;  %s3425_s28 = sshll.u32 %s4086_s25, 4 }
  0x1b   : > { %532 = vmatpush1.bf16.msra.mxu0 %v3779_v4  ;;  %v4139_v7 = vld [vmem:[%s4133_s29] sm:$0xff]  ;;  %v4142_v8 = vld [vmem:[%s4133_s29 + $0x8] sm:$0xff]  ;;  %v4153_v12 = vld [vmem:[%s4133_s29 + $0x10] sm:$0xff]  ;;  %s3203_s13 = scalar_lea.sflag [#allocation3], %s243_s26  ;;  %s4029_s25 = smov [#allocation2]  }
  0x1c   : > { %533 = vmatprep.subr.bf16.mxu0 %v3780_v5  ;;  %vm260_vm0 = vcmp.eq.f32.partialorder %v4139_v7, 1.0  ;;  %vm261_vm1 = vcmp.eq.f32.partialorder %v4142_v8, 1.0  ;;  %v4156_v13 = vld [vmem:[%s4133_s29 + $0x18] sm:$0xff]  ;;  %vm262_vm3 = vcmp.eq.f32.partialorder %v4153_v12, 1.0  ;;  %v4171_v17 = vld [vmem:[%s4133_s29 + $0x20] sm:$0xff]  ;;  %v4174_v18 = vld [vmem:[%s4133_s29 + $0x28] sm:$0xff] }
  0x1d   : > { %v4147_v10 = vsel %vm260_vm0, 1.0, %v6271_v9  ;;  %v4150_v11 = vsel %vm261_vm1, 1.0, %v6271_v9  ;;  %vm263_vm4 = vcmp.eq.f32.partialorder %v4156_v13, 1.0  ;;  %v4165_v15 = vsel %vm262_vm3, 1.0, %v6271_v9  ;;  %v4209_v28 = vld [vmem:[%s4133_s29 + $0x30] sm:$0xff]  ;;  %v4212_v29 = vld [vmem:[%s4133_s29 + $0x38] sm:$0xff] }
  0x1e   : > { %6562 = vst [vmem:[#allocation5_spill] sm:$0xff] %v4147_v10  ;;  %6563 = vst [vmem:[#allocation6_spill] sm:$0xff] %v4150_v11  ;;  %v412_v14 = vpack.c.bf16 %v4150_v11, %v4147_v10  ;;  %v4168_v16 = vsel %vm263_vm4, 1.0, %v6271_v9  ;;  %vm264_vm5 = vcmp.eq.f32.partialorder %v4171_v17, 1.0  ;;  %vm265_vm6 = vcmp.eq.f32.partialorder %v4174_v18, 1.0  ;;  %s244_s29 = scalar_lea.vmem [#allocation2], %s243_s26 }
  0x1f   : > { %534 = vmatpush1.bf16.msra.mxu0 %v3782_v6  ;;  %6564 = vst [vmem:[#allocation7_spill] sm:$0xff] %v4165_v15  ;;  %6565 = vst [vmem:[#allocation8_spill] sm:$0xff] %v4168_v16  ;;  %v413_v19 = vpack.c.bf16 %v4168_v16, %v4165_v15  ;;  %v4181_v20 = vsel %vm264_vm5, 1.0, %v6271_v9  ;;  %v4185_v21 = vsel %vm265_vm6, 1.0, %v6271_v9  ;;  %vm308_vm7 = vcmp.eq.f32.partialorder %v4139_v7, 3.0  ;;  %s3215_s9 = sshll.u32 %s244_s29, 4  ;;  %s6224_s9 = int_to_ptr.vmem [resolvable:$true] %s3215_s9 }
  0x20   : > { %6566 = vst [vmem:[#allocation9_spill] sm:$0xff] %v4181_v20  ;;  %6567 = vst [vmem:[#allocation10_spill] sm:$0xff] %v4185_v21  ;;  %vm309_vm8 = vcmp.eq.f32.partialorder %v4142_v8, 3.0  ;;  %vm310_vm9 = vcmp.eq.f32.partialorder %v4153_v12, 3.0  ;;  %v4192_v22 = vsel %vm308_vm7, 1.0, %v6271_v9  ;;  %vm311_vm10 = vcmp.eq.f32.partialorder %v4156_v13, 3.0 }
  0x21   : > { %6568 = vst [vmem:[#allocation11_spill] sm:$0xff] %v4192_v22  ;;  %v4195_v23 = vsel %vm309_vm8, 1.0, %v6271_v9  ;;  %v4199_v24 = vsel %vm310_vm9, 1.0, %v6271_v9  ;;  %v4204_v26 = vsel %vm311_vm10, 1.0, %v6271_v9  ;;  %v414_v27 = vpack.c.bf16 %v4185_v21, %v4181_v20  ;;  %s3960_s14 = scalar_lea.vmem %s6224_s9, 16  ;;  %s3964_s15 = sshll.u32 %s4029_s25, 4  ;;  %s3965_s15 = int_to_ptr.vmem [resolvable:$false] %s3964_s15 }
  0x22   : > { %3322 = vmatmul.mubr.msk.bf16.vlgmr.msra.gmra.mrb[0].mxu0 %vm6457_vm2, %v412_v14  ;;  %6569 = vst [vmem:[#allocation12_spill] sm:$0xff] %v4195_v23  ;;  %6570 = vst [vmem:[#allocation13_spill] sm:$0xff] %v4199_v24  ;;  %v420_v25 = vpack.c.bf16 %v4195_v23, %v4192_v22  ;;  %v421_v30 = vpack.c.bf16 %v4204_v26, %v4199_v24  ;;  %vm312_vm11 = vcmp.eq.f32.partialorder %v4171_v17, 3.0  ;;  %vm313_vm12 = vcmp.eq.f32.partialorder %v4174_v18, 3.0  ;;  %p3961_p11 = scmp.ne.s32.totalorder %s6224_s9, %s3960_s14  ;;  %s3966_s16 = scalar_lea.vmem %s3965_s15, 32 }
  0x23   : > { %569 = vmatprep.mubr.bf16.mxu0 %v4024_v2  ;;  %6571 = vst [vmem:[#allocation14_spill] sm:$0xff] %v4204_v26  ;;  %v4219_v31 = vsel %vm312_vm11, 1.0, %v6271_v9  ;;  %vm314_vm13 = vcmp.eq.f32.partialorder %v4209_v28, 3.0  ;;  %vm315_vm14 = vcmp.eq.f32.partialorder %v4212_v29, 3.0  ;;  %v4224_v32 = vsel %vm313_vm12, 1.0, %v6271_v9  ;;  %p3967_p0 = scmp.lt.s32.totalorder %s6224_s9, %s3965_s15  ;;  %p3968_p1 = scmp.lt.s32.totalorder %s3966_s16, %s3960_s14 }
  0x24   : > { %6572 = vst [vmem:[#allocation15_spill] sm:$0xff] %v4219_v31  ;;  %6573 = vst [vmem:[#allocation16_spill] sm:$0xff] %v4224_v32  ;;  %v4227_v33 = vsel %vm314_vm13, 1.0, %v6271_v9  ;;  %v4230_v34 = vsel %vm315_vm14, 1.0, %v6271_v9  ;;  %vm266_vm15 = vcmp.eq.f32.partialorder %v4209_v28, 1.0  ;;  %vm267_vm0 = vcmp.eq.f32.partialorder %v4212_v29, 1.0  ;;  %p3962_p12 = pnand %p3961_p11, %p4103_p5 }
  0x25   : > { %6574 = vst [vmem:[#allocation17_spill] sm:$0xff] %v4227_v33  ;;  %6575 = vst [vmem:[#allocation18_spill] sm:$0xff] %v4230_v34  ;;  %v422_v35 = vpack.c.bf16 %v4224_v32, %v4219_v31  ;;  %v423_v36 = vpack.c.bf16 %v4230_v34, %v4227_v33  ;;  %vm332_vm1 = vcmp.eq.f32.partialorder %v4139_v7, 4.0  ;;  %vm333_vm3 = vcmp.eq.f32.partialorder %v4142_v8, 4.0  ;;  %p3969_p2 = por %p3968_p1, %p3967_p0 }
  0x26   : > { %vm334_vm4 = vcmp.eq.f32.partialorder %v4153_v12, 4.0  ;;  %v4243_v37 = vsel %vm332_vm1, 1.0, %v6271_v9  ;;  %v4246_v38 = vsel %vm333_vm3, 1.0, %v6271_v9  ;;  %vm335_vm5 = vcmp.eq.f32.partialorder %v4156_v13, 4.0  ;;  %p3963_p13 = pneg %p3962_p12 }
  0x27   : > { %6576 = vst [vmem:[#allocation19_spill] sm:$0xff] %v4243_v37  ;;  %6577 = vst [vmem:[#allocation20_spill] sm:$0xff] %v4246_v38  ;;  %v4250_v39 = vsel %vm334_vm4, 1.0, %v6271_v9  ;;  %v4254_v40 = vsel %vm266_vm15, 1.0, %v6271_v9  ;;  %v4257_v41 = vsel %vm267_vm0, 1.0, %v6271_v9  ;;  %v424_v42 = vpack.c.bf16 %v4246_v38, %v4243_v37 }
  0x28   : > { %6578 = vst [vmem:[#allocation21_spill] sm:$0xff] %v4250_v39  ;;  %6579 = vst [vmem:[#allocation22_spill] sm:$0xff] %v4254_v40  ;;  %v4262_v43 = vsel %vm335_vm5, 1.0, %v6271_v9  ;;  %vm284_vm6 = vcmp.eq.f32.partialorder %v4139_v7, 2.0  ;;  %vm285_vm7 = vcmp.eq.f32.partialorder %v4142_v8, 2.0  ;;  %vm336_vm8 = vcmp.eq.f32.partialorder %v4171_v17, 4.0  ;;  %p3970_p3 = pnand %p3969_p2, %p3963_p13 }
  0x29   : > { %6580 = vst [vmem:[#allocation23_spill] sm:$0xff] %v4257_v41  ;;  %6581 = vst [vmem:[#allocation24_spill] sm:$0xff] %v4262_v43  ;;  %v425_v44 = vpack.c.bf16 %v4262_v43, %v4250_v39  ;;  %vm337_vm9 = vcmp.eq.f32.partialorder %v4174_v18, 4.0  ;;  %v4271_v45 = vsel %vm336_vm8, 1.0, %v6271_v9  ;;  %vm338_vm10 = vcmp.eq.f32.partialorder %v4209_v28, 4.0 }
  0x2a   : > { %3323 = vmatmul.mubr.msk.bf16.gmra.mrb[4].mxu0 %vm6457_vm2, %v413_v19  ;;  %6582 = vst [vmem:[#allocation25_spill] sm:$0xff] %v4271_v45  ;;  %vm339_vm11 = vcmp.eq.f32.partialorder %v4212_v29, 4.0  ;;  %v415_v46 = vpack.c.bf16 %v4257_v41, %v4254_v40  ;;  %v4278_v47 = vsel %vm337_vm9, 1.0, %v6271_v9  ;;  %v4281_v48 = vsel %vm338_vm10, 1.0, %v6271_v9 }
  0x2b   : > { %577 = vmatprep.mubr.bf16.mxu0 %v4024_v2  ;;  %6583 = vst [vmem:[#allocation26_spill] sm:$0xff] %v4278_v47  ;;  %6584 = vst [vmem:[#allocation27_spill] sm:$0xff] %v4281_v48  ;;  %v4284_v49 = vsel %vm339_vm11, 1.0, %v6271_v9  ;;  %v4287_v50 = vsel %vm284_vm6, 1.0, %v6271_v9  ;;  %v4290_v51 = vsel %vm285_vm7, 1.0, %v6271_v9  ;;  %v426_v52 = vpack.c.bf16 %v4278_v47, %v4271_v45 }
  0x2c   : > { %6585 = vst [vmem:[#allocation28_spill] sm:$0xff] %v4284_v49  ;;  %6586 = vst [vmem:[#allocation29_spill] sm:$0xff] %v4287_v50  ;;  %v427_v53 = vpack.c.bf16 %v4284_v49, %v4281_v48  ;;  %vm388_vm12 = vcmp.eq.f32.partialorder %v4139_v7, 0.0  ;;  %vm389_vm13 = vcmp.eq.f32.partialorder %v4142_v8, 0.0  ;;  %vm390_vm14 = vcmp.eq.f32.partialorder %v4153_v12, 0.0 }
  0x2d   : > { %6587 = vst [vmem:[#allocation30_spill] sm:$0xff] %v4290_v51  ;;  %v3308_v54 = vsel %vm388_vm12, 1.0, %v6271_v9  ;;  %v3309_v55 = vsel %vm389_vm13, 1.0, %v6271_v9  ;;  %vm391_vm15 = vcmp.eq.f32.partialorder %v4156_v13, 0.0  ;;  %v3310_v56 = vsel %vm390_vm14, 1.0, %v6271_v9 }
  0x2e   : > { %v428_v57 = vpack.c.bf16 %v3309_v55, %v3308_v54  ;;  %v3311_v58 = vsel %vm391_vm15, 1.0, %v6271_v9  ;;  %vm392_vm0 = vcmp.eq.f32.partialorder %v4171_v17, 0.0  ;;  %vm393_vm1 = vcmp.eq.f32.partialorder %v4174_v18, 0.0 }
  0x2f   : > { %v429_v59 = vpack.c.bf16 %v3311_v58, %v3310_v56  ;;  %v3312_v60 = vsel %vm392_vm0, 1.0, %v6271_v9  ;;  %v3313_v61 = vsel %vm393_vm1, 1.0, %v6271_v9  ;;  %vm394_vm3 = vcmp.eq.f32.partialorder %v4209_v28, 0.0 }
  0x30   : > { %v430_v62 = vpack.c.bf16 %v3313_v61, %v3312_v60  ;;  %vm395_vm4 = vcmp.eq.f32.partialorder %v4212_v29, 0.0  ;;  %v3314_v63 = vsel %vm394_vm3, 1.0, %v6271_v9  ;;  %v416_v1 = vpack.c.bf16 %v4290_v51, %v4287_v50 }
  0x31   : > { %v3315_v0 = vsel %vm395_vm4, 1.0, %v6271_v9  ;;  %vm286_vm5 = vcmp.eq.f32.partialorder %v4153_v12, 2.0  ;;  %vm287_vm6 = vcmp.eq.f32.partialorder %v4156_v13, 2.0  ;;  %vm288_vm7 = vcmp.eq.f32.partialorder %v4171_v17, 2.0 }
  0x32   : > { %3324 = vmatmul.mubr.msk.bf16.gmra.mrb[8].mxu0 %vm6457_vm2, %v414_v27  ;;  %v431_v3 = vpack.c.bf16 %v3315_v0, %v3314_v63  ;;  %v4321_v4 = vsel %vm286_vm5, 1.0, %v6271_v9  ;;  %v4324_v5 = vsel %vm287_vm6, 1.0, %v6271_v9  ;;  %vm289_vm8 = vcmp.eq.f32.partialorder %v4174_v18, 2.0 }
  0x33   : > { %585 = vmatprep.mubr.bf16.mxu0 %v4024_v2  ;;  %6588 = vst [vmem:[#allocation31_spill] sm:$0xff] %v4321_v4  ;;  %6589 = vst [vmem:[#allocation32_spill] sm:$0xff] %v4324_v5  ;;  %v417_v6 = vpack.c.bf16 %v4324_v5, %v4321_v4  ;;  %v4333_v7 = vsel %vm288_vm7, 1.0, %v6271_v9  ;;  %v4336_v8 = vsel %vm289_vm8, 1.0, %v6271_v9  ;;  %vm290_vm9 = vcmp.eq.f32.partialorder %v4209_v28, 2.0 }
  0x34   : > { %6590 = vst [vmem:[#allocation33_spill] sm:$0xff] %v4333_v7  ;;  %6591 = vst [vmem:[#allocation34_spill] sm:$0xff] %v4336_v8  ;;  %v418_v12 = vpack.c.bf16 %v4336_v8, %v4333_v7  ;;  %vm291_vm10 = vcmp.eq.f32.partialorder %v4212_v29, 2.0  ;;  %v4345_v13 = vsel %vm290_vm9, 1.0, %v6271_v9  ;;  %vm999_vm11 = vcmask 261120  }
  0x35   : > { %6592 = vst [vmem:[#allocation35_spill] sm:$0xff] %v4345_v13  ;;  %v4348_v14 = vsel %vm291_vm10, 1.0, %v6271_v9  ;;  %vm6460_vm12 = vcmp.ne.f32.partialorder %v4147_v10, 0.0  ;;  %vm6416_vm13 = vcmp.ne.f32.partialorder %v4287_v50, 0.0  ;;  %vm6343_vm14 = vcmp.ne.f32.partialorder %v4192_v22, 0.0  ;;  %v6654_v10 = vld [vmem:[#allocation15_spill] sm:$0xff] }
  0x36   : > { %6593 = vst [vmem:[#allocation36_spill] sm:$0xff] %v4348_v14  ;;  %v419_v17 = vpack.c.bf16 %v4348_v14, %v4345_v13  ;;  %vm6342_vm15 = vcmp.ne.f32.partialorder %v4243_v37, 0.0  ;;  %vm6383_vm0 = vcmp.ne.f32.partialorder %v4150_v11, 0.0  ;;  %vm6380_vm1 = vcmp.ne.f32.partialorder %v4290_v51, 0.0 }
  0x37   : > { %vm6458_vm3 = vcmp.ne.f32.partialorder %v4165_v15, 0.0  ;;  %vm6459_vm4 = vcmp.ne.f32.partialorder %v4321_v4, 0.0  ;;  %vm6353_vm5 = vcmp.ne.f32.partialorder %v4195_v23, 0.0  ;;  %vm6361_vm6 = vcmp.ne.f32.partialorder %v4199_v24, 0.0 }
  0x38   : > { %vm6358_vm7 = vcmp.ne.f32.partialorder %v4246_v38, 0.0  ;;  %vm6371_vm8 = vcmp.ne.f32.partialorder %v4250_v39, 0.0  ;;  %vm6384_vm9 = vcmp.ne.f32.partialorder %v4168_v16, 0.0  ;;  %vm6387_vm10 = vcmp.ne.f32.partialorder %v4324_v5, 0.0  ;;  %v6656_v38 = vld [vmem:[#allocation14_spill] sm:$0xff] }
  0x3a   : > { %3325 = vmatmul.mubr.msk.bf16.gmra.mrb[12].mxu0 %vm6457_vm2, %v415_v46 }
  0x3b   : > { %593 = vmatprep.mubr.bf16.mxu0 %v4024_v2 }
  0x3c   : > { %v6689_v5 = vld [vmem:[#allocation35_spill] sm:$0xff] }
  0x42   : > { %3326 = vmatmul.mubr.msk.bf16.gmra.mrb[16].mxu0 %vm6457_vm2, %v416_v1 }
  0x43   : > { %601 = vmatprep.mubr.bf16.mxu0 %v4024_v2 }
  0x4a   : > { %3327 = vmatmul.mubr.msk.bf16.gmra.mrb[20].mxu0 %vm6457_vm2, %v417_v6 }
  0x4b   : > { %609 = vmatprep.mubr.bf16.mxu0 %v4024_v2 }
  0x52   : > { %3328 = vmatmul.mubr.msk.bf16.gmra.mrb[24].mxu0 %vm6457_vm2, %v418_v12 }
  0x53   : > { %617 = vmatprep.mubr.bf16.mxu0 %v4024_v2 }
  0x5a   : > { %3329 = vmatmul.mubr.msk.bf16.gmra.mrb[28].mxu0 %vm6457_vm2, %v419_v17 }
  0x5b   : > { %625 = vmatprep.mubr.bf16.mxu0 %v4024_v2 }
  0x62   : > { %3330 = vmatmul.mubr.msk.bf16.gmra.mrb[32].mxu0 %vm6457_vm2, %v420_v25 }
  0x63   : > { %633 = vmatprep.mubr.bf16.mxu0 %v4024_v2 }
  0x6a   : > { %3331 = vmatmul.mubr.msk.bf16.gmra.mrb[36].mxu0 %vm6457_vm2, %v421_v30 }
  0x6b   : > { %641 = vmatprep.mubr.bf16.mxu0 %v4024_v2 }
  0x72   : > { %3332 = vmatmul.mubr.msk.bf16.gmra.mrb[40].mxu0 %vm6457_vm2, %v422_v35 }
  0x73   : > { %649 = vmatprep.mubr.bf16.mxu0 %v4024_v2 }
  0x7a   : > { %3333 = vmatmul.mubr.msk.bf16.gmra.mrb[44].mxu0 %vm6457_vm2, %v423_v36 }
  0x7b   : > { %657 = vmatprep.mubr.bf16.mxu0 %v4024_v2 }
  0x82   : > { %3334 = vmatmul.mubr.msk.bf16.gmra.mrb[48].mxu0 %vm6457_vm2, %v424_v42 }
  0x83   : > { %665 = vmatprep.mubr.bf16.mxu0 %v4024_v2 }
  0x8a   : > { %3335 = vmatmul.mubr.msk.bf16.gmra.mrb[52].mxu0 %vm6457_vm2, %v425_v44 }
  0x8b   : > { %673 = vmatprep.mubr.bf16.mxu0 %v4024_v2 }
  0x92   : > { %3336 = vmatmul.mubr.msk.bf16.gmra.mrb[56].mxu0 %vm6457_vm2, %v426_v52 }
  0x93   : > { %681 = vmatprep.mubr.bf16.mxu0 %v4024_v2 }
  0x9a   : > { %3337 = vmatmul.mubr.msk.bf16.gmra.mrb[60].mxu0 %vm6457_vm2, %v427_v53 }
  0x9b   : > { %689 = vmatprep.mubr.bf16.mxu0 %v4024_v2 }
  0xa2   : > { %3338 = vmatmul.mubr.msk.bf16.gmra.mrb[64].mxu0 %vm6457_vm2, %v428_v57 }
  0xa3   : > { %699 = vmatprep.mubr.bf16.mxu0 %v4024_v2 }
  0xaa   : > { %3339 = vmatmul.mubr.msk.bf16.gmra.mrb[68].mxu0 %vm6457_vm2, %v429_v59 }
  0xab   : > { %709 = vmatprep.mubr.bf16.mxu0 %v4024_v2 }
  0xb2   : > { %3340 = vmatmul.mubr.msk.bf16.gmra.mrb[72].mxu0 %vm6457_vm2, %v430_v62 }
  0xb3   : > { %719 = vmatprep.mubr.bf16.mxu0 %v4024_v2 }
  0xba   : > { %3341 = vmatmul.mubr.msk.bf16.gmra.mrb[76].mxu0 %vm6457_vm2, %v431_v3 }
  0xf5   : > { %v4395_v18 = vpop.f32.mrb[0].mxu0 }
  0xf6   : > { %767 = vrot.lane.b32.xlu0 %v4395_v18, %s4026_s11  ;;  %v565_v19 = vpop.f32.mrb[1].mxu0 }
  0xf7   : > { %v4399_v25 = vpop.f32.mrb[2].mxu0 }
  0xf8   : > { %v568_v27 = vpop.f32.mrb[3].mxu0 }
  0xfa   : > { %769 = vrot.lane.b32.xlu0 %v4399_v25, %s4026_s11 }
  0xfd   : > { %v4403_v28 = vpop.f32.mrb[4].mxu0 }
  0xfe   : > { %771 = vrot.lane.b32.xlu0 %v4403_v28, %s4026_s11  ;;  %v573_v2 = vpop.f32.mrb[5].mxu0 }
  0xff   : > { %v4407_v29 = vpop.f32.mrb[6].mxu0 }
 0x100   : > { %6594 = vst [vmem:[#allocation37_spill] sm:$0xff] %v4407_v29  ;;  %773 = vrot.lane.b32.xlu1 %v4407_v29, %s4026_s11  ;;  %v576_v30 = vpop.f32.mrb[7].mxu0 }
 0x105   : > { %v4411_v35 = vpop.f32.mrb[8].mxu0 }
 0x106   : > { %6595 = vst [vmem:[#allocation38_spill] sm:$0xff] %v4411_v35  ;;  %775 = vrot.lane.b32.xlu0 %v4411_v35, %s4026_s11  ;;  %v581_v36 = vpop.f32.mrb[9].mxu0 }
 0x107   : > { %v4415_v42 = vpop.f32.mrb[10].mxu0  ;;  %v6652_v23 = vld [vmem:[#allocation37_spill] sm:$0xff] }
 0x108   : > { %6596 = vst [vmem:[#allocation39_spill] sm:$0xff] %v4415_v42  ;;  %777 = vrot.lane.b32.xlu1 %v4415_v42, %s4026_s11  ;;  %v584_v44 = vpop.f32.mrb[11].mxu0 }
 0x10d   : > { %v4419_v46 = vpop.f32.mrb[12].mxu0 }
 0x10e   : > { %6597 = vst [vmem:[#allocation40_spill] sm:$0xff] %v4419_v46  ;;  %779 = vrot.lane.b32.xlu0 %v4419_v46, %s4026_s11  ;;  %v589_v52 = vpop.f32.mrb[13].mxu0 }
 0x10f   : > { %v4423_v53 = vpop.f32.mrb[14].mxu0 }
 0x110   : > { %6598 = vst [vmem:[#allocation41_spill] sm:$0xff] %v4423_v53  ;;  %781 = vrot.lane.b32.xlu1 %v4423_v53, %s4026_s11  ;;  %v592_v54 = vpop.f32.mrb[15].mxu0 }
 0x115   : > { %v4427_v55 = vpop.f32.mrb[16].mxu0 }
 0x116   : > { %783 = vrot.lane.b32.xlu1 %v4427_v55, %s4026_s11  ;;  %v597_v56 = vpop.f32.mrb[17].mxu0 }
 0x117   : > { %v4431_v57 = vpop.f32.mrb[18].mxu0 }
 0x118   : > { %v600_v58 = vpop.f32.mrb[19].mxu0 }
 0x11a   : > { %785 = vrot.lane.b32.xlu1 %v4431_v57, %s4026_s11 }
 0x11d   : > { %v4435_v59 = vpop.f32.mrb[20].mxu0 }
 0x11e   : > { %787 = vrot.lane.b32.xlu0 %v4435_v59, %s4026_s11  ;;  %v605_v60 = vpop.f32.mrb[21].mxu0 }
 0x11f   : > { %v4439_v61 = vpop.f32.mrb[22].mxu0 }
 0x120   : > { %6599 = vst [vmem:[#allocation42_spill] sm:$0xff] %v4439_v61  ;;  %789 = vrot.lane.b32.xlu1 %v4439_v61, %s4026_s11  ;;  %v608_v62 = vpop.f32.mrb[23].mxu0 }
 0x125   : > { %v4443_v63 = vpop.f32.mrb[24].mxu0 }
 0x126   : > { %6600 = vst [vmem:[#allocation43_spill] sm:$0xff] %v4443_v63  ;;  %791 = vrot.lane.b32.xlu0 %v4443_v63, %s4026_s11  ;;  %v613_v0 = vpop.f32.mrb[25].mxu0 }
 0x127   : > { %v4447_v1 = vpop.f32.mrb[26].mxu0 }
 0x128   : > { %6601 = vst [vmem:[#allocation44_spill] sm:$0xff] %v4447_v1  ;;  %793 = vrot.lane.b32.xlu1 %v4447_v1, %s4026_s11  ;;  %v616_v3 = vpop.f32.mrb[27].mxu0 }
 0x12d   : > { %v4451_v6 = vpop.f32.mrb[28].mxu0 }
 0x12e   : > { %6602 = vst [vmem:[#allocation45_spill] sm:$0xff] %v4451_v6  ;;  %795 = vrot.lane.b32.xlu0 %v4451_v6, %s4026_s11  ;;  %v621_v12 = vpop.f32.mrb[29].mxu0 }
 0x12f   : > { %v4455_v17 = vpop.f32.mrb[30].mxu0 }
 0x130   : > { %6603 = vst [vmem:[#allocation46_spill] sm:$0xff] %v4455_v17  ;;  %797 = vrot.lane.b32.xlu1 %v4455_v17, %s4026_s11  ;;  %v624_v19 = vpop.f32.mrb[31].mxu0 }
 0x135   : > { %v4459_v27 = vpop.f32.mrb[32].mxu0 }
 0x136   : > { %799 = vrot.lane.b32.xlu0 %v4459_v27, %s4026_s11  ;;  %v629_v2 = vpop.f32.mrb[33].mxu0 }
 0x137   : > { %v4463_v30 = vpop.f32.mrb[34].mxu0 }
 0x138   : > { %801 = vrot.lane.b32.xlu1 %v4463_v30, %s4026_s11  ;;  %v632_v36 = vpop.f32.mrb[35].mxu0 }
 0x13d   : > { %v4467_v44 = vpop.f32.mrb[36].mxu0 }
 0x13e   : > { %803 = vrot.lane.b32.xlu0 %v4467_v44, %s4026_s11  ;;  %v637_v52 = vpop.f32.mrb[37].mxu0 }
 0x13f   : > { %v4471_v54 = vpop.f32.mrb[38].mxu0 }
 0x140   : > { %6604 = vst [vmem:[#allocation47_spill] sm:$0xff] %v4471_v54  ;;  %805 = vrot.lane.b32.xlu1 %v4471_v54, %s4026_s11  ;;  %v640_v56 = vpop.f32.mrb[39].mxu0  ;;  %v4632_v54 = vld [vmem:[%s6267_s3] ss:$0 sm:$0xff] }
 0x145   : > { %v4475_v58 = vpop.f32.mrb[40].mxu0 }
 0x146   : > { %6605 = vst [vmem:[#allocation48_spill] sm:$0xff] %v4475_v58  ;;  %807 = vrot.lane.b32.xlu0 %v4475_v58, %s4026_s11  ;;  %v645_v60 = vpop.f32.mrb[41].mxu0 }
 0x147   : > { %v4479_v62 = vpop.f32.mrb[42].mxu0 }
 0x148   : > { %6606 = vst [vmem:[#allocation49_spill] sm:$0xff] %v4479_v62  ;;  %809 = vrot.lane.b32.xlu1 %v4479_v62, %s4026_s11  ;;  %v648_v0 = vpop.f32.mrb[43].mxu0 }
 0x14d   : > { %v4483_v3 = vpop.f32.mrb[44].mxu0 }
 0x14e   : > { %6607 = vst [vmem:[#allocation50_spill] sm:$0xff] %v4483_v3  ;;  %811 = vrot.lane.b32.xlu0 %v4483_v3, %s4026_s11  ;;  %v653_v12 = vpop.f32.mrb[45].mxu0 }
 0x14f   : > { %v4487_v19 = vpop.f32.mrb[46].mxu0 }
 0x150   : > { %6608 = vst [vmem:[#allocation51_spill] sm:$0xff] %v4487_v19  ;;  %813 = vrot.lane.b32.xlu1 %v4487_v19, %s4026_s11  ;;  %v656_v2 = vpop.f32.mrb[47].mxu0 }
 0x155   : > { %v4491_v36 = vpop.f32.mrb[48].mxu0 }
 0x156   : > { %815 = vrot.lane.b32.xlu0 %v4491_v36, %s4026_s11  ;;  %v661_v52 = vpop.f32.mrb[49].mxu0 }
 0x157   : > { %v4495_v56 = vpop.f32.mrb[50].mxu0 }
 0x158   : > { %817 = vrot.lane.b32.xlu1 %v4495_v56, %s4026_s11  ;;  %v664_v60 = vpop.f32.mrb[51].mxu0 }
 0x15d   : > { %v4499_v0 = vpop.f32.mrb[52].mxu0 }
 0x15e   : > { %819 = vrot.lane.b32.xlu0 %v4499_v0, %s4026_s11  ;;  %v669_v12 = vpop.f32.mrb[53].mxu0 }
 0x15f   : > { %v4503_v9 = vpop.f32.mrb[54].mxu0 }
 0x160   : > { %6609 = vst [vmem:[#allocation52_spill] sm:$0xff] %v4503_v9  ;;  %821 = vrot.lane.b32.xlu1 %v4503_v9, %s4026_s11  ;;  %v672_v2 = vpop.f32.mrb[55].mxu0 }
 0x165   : > { %v4507_v49 = vpop.f32.mrb[56].mxu0 }
 0x166   : > { %6610 = vst [vmem:[#allocation53_spill] sm:$0xff] %v4507_v49  ;;  %823 = vrot.lane.b32.xlu0 %v4507_v49, %s4026_s11  ;;  %v677_v52 = vpop.f32.mrb[57].mxu0 }
 0x167   : > { %v4511_v19 = vpop.f32.mrb[58].mxu0  ;;  %v6667_v15 = vld [vmem:[#allocation52_spill] sm:$0xff] }
 0x168   : > { %6611 = vst [vmem:[#allocation54_spill] sm:$0xff] %v4511_v19  ;;  %825 = vrot.lane.b32.xlu1 %v4511_v19, %s4026_s11  ;;  %v680_v60 = vpop.f32.mrb[59].mxu0 }
 0x16d   : > { %v4515_v17 = vpop.f32.mrb[60].mxu0 }
 0x16e   : > { %6612 = vst [vmem:[#allocation55_spill] sm:$0xff] %v4515_v17  ;;  %v685_v12 = vpop.f32.mrb[61].mxu0 }
 0x16f   : > { %v4517_v53 = vpop.f32.mrb[62].mxu0 }
 0x170   : > { %6613 = vst [vmem:[#allocation56_spill] sm:$0xff] %v4517_v53  ;;  %v688_v48 = vpop.f32.mrb[63].mxu0 }
 0x175   : > { %v691_v34 = vpop.f32.mrb[64].mxu0 }
 0x176   : > { %967 = vrot.lane.b32.xlu0 %v691_v34, %s4027_s12  ;;  %v693_v2 = vpop.f32.mrb[65].mxu0 }
 0x177   : > { %969 = vrot.lane.b32.xlu1 %v693_v2, %s4027_s12  ;;  %v695_v52 = vpop.f32.mrb[66].mxu0 }
 0x178   : > { %v697_v3 = vpop.f32.mrb[67].mxu0 }
 0x17a   : > { %903 = vrot.lane.b32.xlu0 %v691_v34, %s4026_s11 }
 0x17b   : > { %905 = vrot.lane.b32.xlu1 %v695_v52, %s4026_s11 }
 0x17d   : > { %v701_v60 = vpop.f32.mrb[68].mxu0 }
 0x17e   : > { %971 = vrot.lane.b32.xlu0 %v695_v52, %s4027_s12  ;;  %v703_v12 = vpop.f32.mrb[69].mxu0 }
 0x17f   : > { %973 = vrot.lane.b32.xlu1 %v697_v3, %s4027_s12  ;;  %v705_v48 = vpop.f32.mrb[70].mxu0 }
 0x180   : > { %v707_v6 = vpop.f32.mrb[71].mxu0 }
 0x182   : > { %975 = vrot.lane.b32.xlu0 %v701_v60, %s4027_s12 }
 0x183   : > { %977 = vrot.lane.b32.xlu1 %v703_v12, %s4027_s12 }
 0x185   : > { %v711_v46 = vpop.f32.mrb[72].mxu0 }
 0x186   : > { %907 = vrot.lane.b32.xlu0 %v701_v60, %s4026_s11  ;;  %v713_v2 = vpop.f32.mrb[73].mxu0  ;;  %v4563_v60 = vpop.permute.xlu1 %773 }
 0x187   : > { %909 = vrot.lane.b32.xlu1 %v705_v48, %s4026_s11  ;;  %v715_v34 = vpop.f32.mrb[74].mxu0 }
 0x188   : > { %v717_v47 = vpop.f32.mrb[75].mxu0 }
 0x18a   : > { %979 = vrot.lane.b32.xlu0 %v705_v48, %s4027_s12 }
 0x18b   : > { %981 = vrot.lane.b32.xlu1 %v707_v6, %s4027_s12  ;;  %v4543_v6 = vld [vmem:[%s6266_s2] sm:$0xff]  }
 0x18c   : > { %6614 = vst [vmem:[#allocation57_spill] sm:$0xff] %v4543_v6  ;;  %3528 = vmatprep.subr.bf16.mxu1 %v4543_v6  ;;  %3642 = vmatprep.subr.bf16.mxu0 %v4543_v6 }
 0x18d   : > { %v721_v52 = vpop.f32.mrb[76].mxu0  ;;  %3529 = vmatpush3.bf16.msra.mxu1 %v4543_v6  ;;  %3643 = vmatpush3.bf16.msra.mxu0 %v4543_v6 }
 0x18e   : > { %983 = vrot.lane.b32.xlu0 %v711_v46, %s4027_s12  ;;  %v723_v3 = vpop.f32.mrb[77].mxu0 }
 0x18f   : > { %985 = vrot.lane.b32.xlu1 %v713_v2, %s4027_s12  ;;  %v725_v14 = vpop.f32.mrb[78].mxu0  ;;  %v4576_v2 = vpop.permute.xlu1 %777 }
 0x190   : > { %v727_v12 = vpop.f32.mrb[79].mxu0 }
 0x192   : > { %911 = vrot.lane.b32.xlu0 %v711_v46, %s4026_s11  ;;  %v4561_v46 = vld [vmem:[%s6266_s2 + $0x8] sm:$0xff]  }
 0x193   : > { %913 = vrot.lane.b32.xlu1 %v715_v34, %s4026_s11  ;;  %6615 = vst [vmem:[#allocation58_spill] sm:$0xff] %v4561_v46  ;;  %3530 = vmatprep.subr.bf16.mxu1 %v4561_v46 }
 0x194   : > { %3644 = vmatprep.subr.bf16.mxu0 %v4561_v46  ;;  %3531 = vmatpush3.bf16.msra.mxu1 %v4561_v46 }
 0x195   : > { %3645 = vmatpush3.bf16.msra.mxu0 %v4561_v46 }
 0x196   : > { %987 = vrot.lane.b32.xlu0 %v715_v34, %s4027_s12  ;;  %v4583_v34 = vpop.permute.xlu1 %781 }
 0x197   : > { %989 = vrot.lane.b32.xlu1 %v717_v47, %s4027_s12  ;;  %v4556_v47 = vpop.permute.xlu0 %767 }
 0x19a   : > { %991 = vrot.lane.b32.xlu0 %v721_v52, %s4027_s12 }
 0x19b   : > { %993 = vrot.lane.b32.xlu1 %v723_v3, %s4027_s12  ;;  %v4574_v48 = vpop.permute.xlu0 %769  ;;  %v784_v3 = vpop.permute.xlu1 %783 }
 0x19c   : > { %v871_v31 = vsub.f32 %v4632_v54, %v784_v3 }
 0x19e   : > { %915 = vrot.lane.b32.xlu0 %v721_v52, %s4026_s11 }
 0x19f   : > { %917 = vrot.lane.b32.xlu1 %v725_v14, %s4026_s11  ;;  %v4585_v52 = vpop.permute.xlu0 %771 }
 0x1a2   : > { %995 = vrot.lane.b32.xlu0 %v725_v14, %s4027_s12  ;;  %v4572_v14 = vld [vmem:[%s6266_s2 + $0x10] sm:$0xff]  }
 0x1a3   : > { %997 = vrot.lane.b32.xlu1 %v727_v12, %s4027_s12  ;;  %6616 = vst [vmem:[#allocation59_spill] sm:$0xff] %v4572_v14  ;;  %3532 = vmatprep.subr.bf16.mxu1 %v4572_v14  ;;  %v4587_v12 = vpop.permute.xlu0 %775  ;;  %s6222_s12 = scalar_lea.hbm %s6270_s6, %s3425_s28 }
 0x1a4   : > { %3646 = vmatprep.subr.bf16.mxu0 %v4572_v14  ;;  %3533 = vmatpush3.bf16.msra.mxu1 %v4572_v14 }
 0x1a5   : > { %3647 = vmatpush3.bf16.msra.mxu0 %v4572_v14  ;;  %3566 = vmatprep.subr.bf16.mxu1 %v4543_v6 }
 0x1a6   : > { %827 = vrot.lane.b32.xlu0 %v4515_v17, %s4026_s11 }
 0x1a7   : > { %829 = vrot.lane.b32.xlu1 %v4517_v53, %s4026_s11  ;;  %v4589_v46 = vpop.permute.xlu0 %779  ;;  %v4591_v53 = vpop.permute.xlu1 %785 }
 0x1ab   : > { %v4593_v17 = vpop.permute.xlu0 %787  ;;  %v4595_v41 = vpop.permute.xlu1 %789 }
 0x1af   : > { %v4597_v19 = vpop.permute.xlu0 %791  ;;  %v4599_v14 = vpop.permute.xlu1 %793 }
 0x1b3   : > { %v4601_v6 = vpop.permute.xlu0 %795  ;;  %v4603_v62 = vpop.permute.xlu1 %797 }
 0x1b7   : > { %v800_v32 = vpop.permute.xlu0 %799  ;;  %v4605_v33 = vpop.permute.xlu1 %801 }
 0x1b8   : > { %v879_v61 = vsub.f32 %v4632_v54, %v800_v32 }
 0x1bb   : > { %v4607_v1 = vpop.permute.xlu0 %803  ;;  %v4609_v42 = vpop.permute.xlu1 %805 }
 0x1bf   : > { %v4611_v13 = vpop.permute.xlu0 %807  ;;  %v4613_v40 = vpop.permute.xlu1 %809 }
 0x1c3   : > { %v4615_v8 = vpop.permute.xlu0 %811  ;;  %v4617_v21 = vpop.permute.xlu1 %813 }
 0x1c4   : > { %6617 = vst [vmem:[#allocation60_spill] sm:$0xff] %v4615_v8  ;;  %6618 = vst [vmem:[#allocation61_spill] sm:$0xff] %v4617_v21 }
 0x1c8   : > { %v816_v49 = vpop.permute.xlu0 %815 }
 0x1c9   : > { %v887_v29 = vsub.f32 %v4632_v54, %v816_v49 }
 0x1ca   : > { %v4619_v58 = vpop.permute.xlu1 %817 }
 0x1d0   : > { %v4621_v63 = vpop.permute.xlu0 %819 }
 0x1d2   : > { %v4623_v35 = vpop.permute.xlu1 %821 }
 0x1d3   : > { %6619 = vst [vmem:[#allocation62_spill] sm:$0xff] %v4623_v35 }
 0x1d8   : > { %v4625_v43 = vpop.permute.xlu0 %823 }
 0x1d9   : > { %6620 = vst [vmem:[#allocation63_spill] sm:$0xff] %v4625_v43  ;;  %v863_v43 = vsub.f32 %v4632_v54, %v4556_v47 }
 0x1da   : > { %v4627_v9 = vpop.permute.xlu1 %825 }
 0x1db   : > { %6621 = vst [vmem:[#allocation64_spill] sm:$0xff] %v4627_v9  ;;  %v864_v9 = vsub.f32 %v4632_v54, %v4574_v48 }
 0x1e8   : > { %v968_v45 = vpop.permute.xlu0 %967 }
 0x1e9   : > { %v970_v26 = vpop.permute.xlu1 %969 }
 0x1ea   : > { %v4643_v35 = vsel %vm999_vm11, %v968_v45, %v970_v26 }
 0x1eb   : > { %6622 = vst [vmem:[#allocation65_spill] sm:$0xff] %v4643_v35  ;;  %v1016_v47 = vadd.f32 %v4643_v35, %v4395_v18  ;;  %v1024_v26 = vadd.f32 %v4643_v35, %v4427_v55  ;;  %v1032_v45 = vadd.f32 %v4643_v35, %v4459_v27  ;;  %v872_v18 = vsub.f32 %v4632_v54, %v4591_v53 }
 0x1ec   : > { %v904_v7 = vpop.permute.xlu0 %903  ;;  %v873_v55 = vsub.f32 %v4632_v54, %v4593_v17 }
 0x1ed   : > { %v4660_v32 = vsub.f32 %v863_v43, %v904_v7  ;;  %v4662_v49 = vsub.f32 %v871_v31, %v904_v7  ;;  %v4664_v48 = vsub.f32 %v879_v61, %v904_v7  ;;  %v4666_v3 = vsub.f32 %v887_v29, %v904_v7  ;;  %v906_v8 = vpop.permute.xlu1 %905 }
 0x1ee   : > { %v1040_v31 = vadd.f32 %v4643_v35, %v4491_v36  ;;  %v880_v36 = vsub.f32 %v4632_v54, %v4605_v33 }
 0x1ef   : > { %6623 = vst [vmem:[#allocation66_spill] sm:$0xff] %v4660_v32  ;;  %6624 = vst [vmem:[#allocation67_spill] sm:$0xff] %v4662_v49  ;;  %v1048_v61 = vsub.f32 %v1016_v47, %v4660_v32  ;;  %v1056_v7 = vsub.f32 %v1024_v26, %v4662_v49  ;;  %v1064_v29 = vsub.f32 %v1032_v45, %v4664_v48 }
 0x1f0   : > { %6625 = vst [vmem:[#allocation68_spill] sm:$0xff] %v4664_v48  ;;  %6626 = vst [vmem:[#allocation69_spill] sm:$0xff] %v4666_v3  ;;  %v972_v21 = vpop.permute.xlu0 %971  ;;  %v1072_v47 = vsub.f32 %v1040_v31, %v4666_v3  ;;  %v4705_v45 = vsub.f32 %v864_v9, %v906_v8  ;;  %v4707_v31 = vsub.f32 %v872_v18, %v906_v8 }
 0x1f1   : > { %v4694_v26 = vsel %vm6460_vm12, %v1048_v61, 0.0  ;;  %v4698_v53 = vsel %vm6416_vm13, %v1056_v7, 0.0  ;;  %v974_v17 = vpop.permute.xlu1 %973  ;;  %v4714_v7 = vsel %vm6343_vm14, %v1064_v29, 0.0  ;;  %v888_v18 = vsub.f32 %v4632_v54, %v4619_v58 }
 0x1f2   : > { %6627 = vst [vmem:[#allocation70_spill] sm:$0xff] %v4694_v26  ;;  %6628 = vst [vmem:[#allocation71_spill] sm:$0xff] %v4698_v53  ;;  %v1112_v33 = vadd.f32 %v4698_v53, %v4694_v26  ;;  %v4710_v61 = vsel %vm999_vm11, %v972_v21, %v974_v17  ;;  %v881_v21 = vsub.f32 %v4632_v54, %v4607_v1  ;;  %v6668_v53 = vld [vmem:[#allocation24_spill] sm:$0xff]  ;;  %v6681_v26 = vld [vmem:[#allocation53_spill] sm:$0xff] }
 0x1f3   : > { %6629 = vst [vmem:[#allocation72_spill] sm:$0xff] %v4705_v45  ;;  %6630 = vst [vmem:[#allocation73_spill] sm:$0xff] %v4707_v31  ;;  %v1017_v43 = vadd.f32 %v4710_v61, %v4399_v25  ;;  %v1025_v27 = vadd.f32 %v4710_v61, %v4431_v57  ;;  %v1033_v50 = vadd.f32 %v4710_v61, %v4463_v30  ;;  %v4733_v57 = vsel %vm6342_vm15, %v1072_v47, 0.0 }
 0x1f4   : > { %6631 = vst [vmem:[#allocation74_spill] sm:$0xff] %v4710_v61  ;;  %6632 = vst [vmem:[#allocation75_spill] sm:$0xff] %v4714_v7  ;;  %v1120_v25 = vadd.f32 %v1112_v33, %v4714_v7  ;;  %v976_v29 = vpop.permute.xlu0 %975  ;;  %v4735_v30 = vsub.f32 %v880_v36, %v906_v8  ;;  %v889_v1 = vsub.f32 %v4632_v54, %v4621_v63  ;;  %vm6405_vm15 = vcmp.ne.f32.partialorder %v4181_v20, 0.0  ;;  %v6694_v20 = vld [vmem:[#allocation39_spill] sm:$0xff] }
 0x1f5   : > { %6633 = vst [vmem:[#allocation76_spill] sm:$0xff] %v4733_v57  ;;  %v978_v17 = vpop.permute.xlu1 %977  ;;  %v1049_v22 = vsub.f32 %v1017_v43, %v4705_v45  ;;  %v1057_v9 = vsub.f32 %v1025_v27, %v4707_v31  ;;  %v1041_v47 = vadd.f32 %v4710_v61, %v4495_v56  ;;  %v4748_v36 = vsub.f32 %v888_v18, %v906_v8 }
 0x1f6   : > { %6634 = vst [vmem:[#allocation77_spill] sm:$0xff] %v4735_v30  ;;  %v1128_v58 = vadd.f32 %v1120_v25, %v4733_v57  ;;  %v4744_v33 = vsel %vm999_vm11, %v976_v29, %v978_v17  ;;  %v1065_v37 = vsub.f32 %v1033_v50, %v4735_v30  ;;  %v882_v17 = vsub.f32 %v4632_v54, %v4609_v42 }
 0x1f7   : > { %6635 = vst [vmem:[#allocation78_spill] sm:$0xff] %v4744_v33  ;;  %6636 = vst [vmem:[#allocation79_spill] sm:$0xff] %v4748_v36  ;;  %v1018_v43 = vadd.f32 %v4744_v33, %v4403_v28  ;;  %v1026_v27 = vadd.f32 %v4744_v33, %v4435_v59  ;;  %v1034_v25 = vadd.f32 %v4744_v33, %v4467_v44  ;;  %v4759_v29 = vsel %vm6383_vm0, %v1049_v22, 0.0 }
 0x1f8   : > { %v1136_v7 = vsub.f32 0.0, %v1128_v58  ;;  %v908_v63 = vpop.permute.xlu0 %907  ;;  %6637 = vst [vmem:[#allocation80_spill] sm:$0xff] %v4759_v29  ;;  %v4763_v8 = vsel %vm6380_vm1, %v1057_v9, 0.0  ;;  %v6639_v28 = vsub.f32 %v4632_v54, %v4585_v52  ;;  %v1073_v52 = vsub.f32 %v1041_v47, %v4748_v36 }
 0x1f9   : > { %6638 = vst [vmem:[#allocation81_spill] sm:$0xff] %v4763_v8  ;;  %v4770_v59 = vsub.f32 %v873_v55, %v908_v63  ;;  %v4772_v50 = vsub.f32 %v881_v21, %v908_v63  ;;  %v4774_v18 = vsub.f32 %v889_v1, %v908_v63  ;;  %v4776_v44 = vpop.permute.xlu1 %909  ;;  %v1042_v55 = vadd.f32 %v4744_v33, %v4499_v0 }
 0x1fa   : > { %v4768_v56 = vsub.f32 %v6639_v28, %v908_v63  ;;  %v883_v63 = vsub.f32 %v4632_v54, %v4611_v13  ;;  %v1144_v9 = vmul.f32 1.442695, %v1136_v7  ;;  %v1113_v42 = vadd.f32 %v4763_v8, %v4759_v29 }
 0x1fb   : > { %6641 = vst [vmem:[#allocation83_spill] sm:$0xff] %v4770_v59  ;;  %6642 = vst [vmem:[#allocation84_spill] sm:$0xff] %v4772_v50  ;;  %v1058_v1 = vsub.f32 %v1026_v27, %v4770_v59  ;;  %v1066_v58 = vsub.f32 %v1034_v25, %v4772_v50  ;;  %v1074_v0 = vsub.f32 %v1042_v55, %v4774_v18  ;;  %v4809_v7 = vsel %vm6353_vm5, %v1065_v37, 0.0  ;;  %v6647_v27 = vld [vmem:[#allocation33_spill] sm:$0xff]  ;;  %v6648_v25 = vld [vmem:[#allocation60_spill] sm:$0xff] }
 0x1fc   : > { %6640 = vst [vmem:[#allocation82_spill] sm:$0xff] %v4768_v56  ;;  %6643 = vst [vmem:[#allocation85_spill] sm:$0xff] %v4774_v18  ;;  %v1050_v21 = vsub.f32 %v1018_v43, %v4768_v56  ;;  %v980_v22 = vpop.permute.xlu0 %979  ;;  %vm6395_vm14 = vcmp.ne.f32.partialorder %v6647_v27, 0.0  ;;  %v4827_v37 = vsel %vm6358_vm7, %v1073_v52, 0.0  ;;  %v6653_v55 = vld [vmem:[#allocation42_spill] sm:$0xff]  ;;  %vm6397_vm5 = vcmp.ne.f32.partialorder %v6654_v10, 0.0 }
 0x1fd   : > { %v4805_v13 = vsel %vm6459_vm4, %v1058_v1, 0.0  ;;  %v982_v43 = vpop.permute.xlu1 %981  ;;  %6646 = vst [vmem:[#allocation88_spill] sm:$0xff] %v4809_v7  ;;  %v1121_v1 = vadd.f32 %v1113_v42, %v4809_v7  ;;  %v4823_v57 = vsel %vm6361_vm6, %v1066_v58, 0.0  ;;  %6651 = vst [vmem:[#allocation90_spill] sm:$0xff] %v4827_v37  ;;  %3797 = vpow2.f32 %v1144_v9  ;;  %v6657_v52 = vld [vmem:[#allocation62_spill] sm:$0xff] }
 0x1fe   : > { %v4801_v47 = vsel %vm6458_vm3, %v1050_v21, 0.0  ;;  %6645 = vst [vmem:[#allocation87_spill] sm:$0xff] %v4805_v13  ;;  %v4818_v28 = vsel %vm999_vm11, %v980_v22, %v982_v43  ;;  %6650 = vst [vmem:[#allocation89_spill] sm:$0xff] %v4823_v57  ;;  %v6655_v22 = vld [vmem:[#allocation61_spill] sm:$0xff]  ;;  %vm6404_vm7 = vcmp.ne.f32.partialorder %v6656_v38, 0.0  ;;  %v890_v7 = vsub.f32 %v4632_v54, %v6657_v52  ;;  %v6664_v52 = vld [vmem:[#allocation63_spill] sm:$0xff] }
 0x1ff   : > { %6644 = vst [vmem:[#allocation86_spill] sm:$0xff] %v4801_v47  ;;  %v1114_v21 = vadd.f32 %v4805_v13, %v4801_v47  ;;  %6649 = vst [vmem:[#allocation60_spill] sm:$0xff] %v4818_v28  ;;  %v1019_v51 = vadd.f32 %v4818_v28, %v6652_v23  ;;  %v1027_v11 = vadd.f32 %v4818_v28, %v6653_v55  ;;  %v4843_v23 = vsel %vm6371_vm8, %v1074_v0, 0.0  ;;  %v6705_v38 = vld [vmem:[#allocation54_spill] sm:$0xff]  ;;  %v6720_v47 = vld [vmem:[#allocation27_spill] sm:$0xff] }
 0x200   : > { %v984_v58 = vpop.permute.xlu0 %983  ;;  %v1129_v24 = vadd.f32 %v1121_v1, %v4827_v37  ;;  %6658 = vst [vmem:[#allocation37_spill] sm:$0xff] %v4843_v23  ;;  %v6659_v55 = vsub.f32 %v4632_v54, %v4563_v60  ;;  %v6661_v9 = vsub.f32 %v4632_v54, %v4595_v41  ;;  %v6663_v37 = vld [vmem:[#allocation25_spill] sm:$0xff]  ;;  %v891_v39 = vsub.f32 %v4632_v54, %v6664_v52 }
 0x201   : > { %v1122_v42 = vadd.f32 %v1114_v21, %v4823_v57  ;;  %v986_v1 = vpop.permute.xlu1 %985  ;;  %vm6403_vm6 = vcmp.ne.f32.partialorder %v6663_v37, 0.0  ;;  %v4868_v41 = vadd.f32 %v4818_v28, %v6667_v15  ;;  %vm6413_vm8 = vcmp.ne.f32.partialorder %v6668_v53, 0.0 }
 0x202   : > { %v4849_v43 = vsub.f32 %v6659_v55, %v4776_v44  ;;  %v4855_v21 = vsub.f32 %v6661_v9, %v4776_v44  ;;  %v4862_v57 = vsel %vm999_vm11, %v984_v58, %v986_v1  ;;  %v1137_v60 = vsub.f32 0.0, %v1129_v24  ;;  %v6666_v55 = vld [vmem:[#allocation47_spill] sm:$0xff] }
 0x203   : > { %v1130_v0 = vadd.f32 %v1122_v42, %v4843_v23  ;;  %6665 = vst [vmem:[#allocation62_spill] sm:$0xff] %v4862_v57  ;;  %v1035_v4 = vadd.f32 %v4818_v28, %v6666_v55  ;;  %v6669_v42 = vld [vmem:[#allocation38_spill] sm:$0xff]  ;;  %v6670_v1 = vld [vmem:[#allocation43_spill] sm:$0xff]  ;;  %v6671_v23 = vld [vmem:[#allocation48_spill] sm:$0xff]  ;;  %v6672_v15 = vsub.f32 %v4632_v54, %v4587_v12  ;;  %v4899_v12 = vsub.f32 %v890_v7, %v4776_v44 }
 0x204   : > { %6660 = vst [vmem:[#allocation42_spill] sm:$0xff] %v4849_v43  ;;  %6662 = vst [vmem:[#allocation61_spill] sm:$0xff] %v4855_v21  ;;  %v1051_v9 = vsub.f32 %v1019_v51, %v4849_v43  ;;  %v1059_v8 = vsub.f32 %v1027_v11, %v4855_v21  ;;  %v912_v13 = vpop.permute.xlu0 %911  ;;  %v1020_v58 = vadd.f32 %v4862_v57, %v6669_v42  ;;  %v6678_v28 = vld [vmem:[#allocation64_spill] sm:$0xff]  ;;  %v6685_v7 = vld [vmem:[#allocation34_spill] sm:$0xff]  ;;  %vm6510_vm13 = vcmp.ne.f32.partialorder %v6720_v47, 0.0 }
 0x205   : > { %v1138_v52 = vsub.f32 0.0, %v1130_v0  ;;  %v1028_v24 = vadd.f32 %v4862_v57, %v6670_v1  ;;  %v1036_v55 = vadd.f32 %v4862_v57, %v6671_v23  ;;  %v4882_v29 = vsub.f32 %v6672_v15, %v912_v13  ;;  %v914_v42 = vpop.permute.xlu1 %913  ;;  %6680 = vst [vmem:[#allocation48_spill] sm:$0xff] %v4899_v12 }
 0x206   : > { %v6674_v11 = vsub.f32 %v4632_v54, %v4597_v19  ;;  %v4889_v0 = vsub.f32 %v883_v63, %v912_v13  ;;  %v4891_v61 = vsub.f32 %v891_v39, %v912_v13  ;;  %v892_v1 = vsub.f32 %v4632_v54, %v6678_v28 }
 0x207   : > { %6673 = vst [vmem:[#allocation63_spill] sm:$0xff] %v4882_v29  ;;  %v4896_v23 = vsub.f32 %v882_v17, %v4776_v44  ;;  %v1146_v15 = vmul.f32 1.442695, %v1137_v60  ;;  %v1044_v19 = vadd.f32 %v4862_v57, %v6681_v26  ;;  %v1075_v17 = vsub.f32 %v4868_v41, %v4899_v12 }
 0x208   : > { %v4887_v51 = vsub.f32 %v6674_v11, %v912_v13  ;;  %6676 = vst [vmem:[#allocation52_spill] sm:$0xff] %v4889_v0  ;;  %6677 = vst [vmem:[#allocation38_spill] sm:$0xff] %v4891_v61  ;;  %v1052_v11 = vsub.f32 %v1020_v58, %v4882_v29  ;;  %v1068_v39 = vsub.f32 %v1036_v55, %v4889_v0  ;;  %v6682_v13 = vld [vmem:[#allocation10_spill] sm:$0xff]  ;;  %v988_v35 = vpop.permute.xlu0 %987  ;;  %v4912_v44 = vsel %vm6384_vm9, %v1051_v9, 0.0  ;;  %v3798_v9 = vpop.eup %3797 }
 0x209   : > { %6679 = vst [vmem:[#allocation43_spill] sm:$0xff] %v4896_v23  ;;  %vm361_vm1 = vcmp.ne.f32.partialorder %v6682_v13, 0.0  ;;  %v1067_v28 = vsub.f32 %v1035_v4, %v4896_v23  ;;  %6683 = vst [vmem:[#allocation64_spill] sm:$0xff] %v4912_v44  ;;  %v4916_v26 = vsel %vm6387_vm10, %v1059_v8, 0.0  ;;  %vm6514_vm0 = vcmp.ne.f32.partialorder %v6685_v7, 0.0  ;;  %v990_v41 = vpop.permute.xlu1 %989  ;;  %v6688_v55 = vld [vmem:[#allocation22_spill] sm:$0xff] }
 0x20a   : > { %6675 = vst [vmem:[#allocation47_spill] sm:$0xff] %v4887_v51  ;;  %v1060_v63 = vsub.f32 %v1028_v24, %v4887_v51  ;;  %6684 = vst [vmem:[#allocation53_spill] sm:$0xff] %v4916_v26  ;;  %v1148_v60 = vmul.f32 1.442695, %v1138_v52  ;;  %v1076_v58 = vsub.f32 %v1044_v19, %v4891_v61  ;;  %v4922_v24 = vsel %vm6405_vm15, %v1052_v11, 0.0 }
 0x20b   : > { %6686 = vst [vmem:[#allocation91_spill] sm:$0xff] %v4922_v24  ;;  %vm362_vm9 = vcmp.ne.f32.partialorder %v6688_v55, 0.0  ;;  %vm370_vm10 = vcmp.ne.f32.partialorder %v6689_v5, 0.0  ;;  %v6690_v52 = vsub.f32 %v4632_v54, %v4576_v2  ;;  %v4938_v11 = vsel %vm999_vm11, %v988_v35, %v990_v41  ;;  %v6696_v2 = vld [vmem:[#allocation17_spill] sm:$0xff]  ;;  %v6730_v55 = vld [vmem:[#allocation51_spill] sm:$0xff] }
 0x20c   : > { %v4926_v4 = vsel %vm6395_vm14, %v1060_v63, 0.0  ;;  %6692 = vst [vmem:[#allocation94_spill] sm:$0xff] %v4938_v11  ;;  %3799 = vpow2.f32 %v1146_v15  ;;  %v4942_v63 = vsel %vm6397_vm5, %v1068_v39, 0.0  ;;  %v1115_v27 = vadd.f32 %v4916_v26, %v4912_v44  ;;  %v992_v10 = vpop.permute.xlu0 %991 }
 0x20d   : > { %6687 = vst [vmem:[#allocation92_spill] sm:$0xff] %v4926_v4  ;;  %v1116_v8 = vadd.f32 %v4926_v4, %v4922_v24  ;;  %v4935_v19 = vsub.f32 %v6690_v52, %v914_v42  ;;  %6693 = vst [vmem:[#allocation95_spill] sm:$0xff] %v4942_v63  ;;  %v1021_v16 = vadd.f32 %v4938_v11, %v6694_v20  ;;  %v6695_v4 = vld [vmem:[#allocation44_spill] sm:$0xff]  ;;  %vm6513_vm14 = vcmp.ne.f32.partialorder %v6696_v2, 0.0  ;;  %v6732_v2 = vld [vmem:[#allocation55_spill] sm:$0xff] }
 0x20e   : > { %v1029_v24 = vadd.f32 %v4938_v11, %v6695_v4  ;;  %v6697_v35 = vsub.f32 %v4632_v54, %v4599_v14  ;;  %v6699_v39 = vsub.f32 %v4632_v54, %v4613_v40  ;;  %v4964_v20 = vsel %vm6404_vm7, %v1067_v28, 0.0  ;;  %v6702_v4 = vld [vmem:[#allocation16_spill] sm:$0xff]  ;;  %v994_v14 = vpop.permute.xlu1 %993 }
 0x20f   : > { %6691 = vst [vmem:[#allocation93_spill] sm:$0xff] %v4935_v19  ;;  %v1124_v52 = vadd.f32 %v1116_v8, %v4942_v63  ;;  %6701 = vst [vmem:[#allocation96_spill] sm:$0xff] %v4964_v20  ;;  %vm6511_vm5 = vcmp.ne.f32.partialorder %v6702_v4, 0.0  ;;  %v1160_v26 = vadd.f32 1.0, %v3798_v9  ;;  %3801 = vpow2.f32 %v1148_v60  ;;  %v6704_v63 = vld [vmem:[#allocation49_spill] sm:$0xff] }
 0x210   : > { %v4955_v15 = vsub.f32 %v6697_v35, %v914_v42  ;;  %v4960_v41 = vsub.f32 %v6699_v39, %v914_v42  ;;  %v4969_v8 = vsel %vm6403_vm6, %v1076_v58, 0.0  ;;  %v1123_v35 = vadd.f32 %v1115_v27, %v4964_v20  ;;  %v916_v37 = vpop.permute.xlu0 %915 }
 0x211   : > { %6703 = vst [vmem:[#allocation97_spill] sm:$0xff] %v4969_v8  ;;  %v1132_v40 = vadd.f32 %v1124_v52, %v4969_v8  ;;  %v4974_v39 = vsel %vm999_vm11, %v992_v10, %v994_v14  ;;  %v1037_v28 = vadd.f32 %v4938_v11, %v6704_v63  ;;  %v4980_v57 = vadd.f32 %v4938_v11, %v6705_v38  ;;  %v6707_v52 = vld [vmem:[#allocation23_spill] sm:$0xff]  ;;  %v6708_v10 = vld [vmem:[#allocation36_spill] sm:$0xff]  ;;  %v6709_v14 = vld [vmem:[#allocation26_spill] sm:$0xff] }
 0x212   : > { %6698 = vst [vmem:[#allocation39_spill] sm:$0xff] %v4955_v15  ;;  %6700 = vst [vmem:[#allocation44_spill] sm:$0xff] %v4960_v41  ;;  %v4982_v60 = vsub.f32 %v892_v1, %v914_v42  ;;  %v4986_v58 = vsel %vm6413_vm8, %v1075_v17, 0.0  ;;  %v1053_v27 = vsub.f32 %v1021_v16, %v4935_v19  ;;  %v1061_v9 = vsub.f32 %v1029_v24, %v4955_v15  ;;  %v6710_v38 = vld [vmem:[#allocation40_spill] sm:$0xff]  ;;  %v6711_v1 = vld [vmem:[#allocation45_spill] sm:$0xff]  ;;  %v918_v44 = vpop.permute.xlu1 %917 }
 0x213   : > { %6706 = vst [vmem:[#allocation49_spill] sm:$0xff] %v4986_v58  ;;  %vm363_vm6 = vcmp.ne.f32.partialorder %v6707_v52, 0.0  ;;  %vm371_vm7 = vcmp.ne.f32.partialorder %v6708_v10, 0.0  ;;  %vm6508_vm15 = vcmp.ne.f32.partialorder %v6709_v14, 0.0  ;;  %v1140_v63 = vsub.f32 0.0, %v1132_v40 }
 0x214   : > { %v1022_v42 = vadd.f32 %v4974_v39, %v6710_v38  ;;  %v1030_v8 = vadd.f32 %v4974_v39, %v6711_v1  ;;  %v1131_v17 = vadd.f32 %v1123_v35, %v4986_v58  ;;  %v6712_v16 = vsub.f32 %v4632_v54, %v4589_v46  ;;  %v6718_v38 = vld [vmem:[#allocation50_spill] sm:$0xff] }
 0x215   : > { %v6714_v53 = vsub.f32 %v4632_v54, %v4601_v6  ;;  %v6716_v40 = vsub.f32 %v4632_v54, %v6648_v25  ;;  %v1038_v1 = vadd.f32 %v4974_v39, %v6718_v38  ;;  %v6719_v35 = vld [vmem:[#allocation18_spill] sm:$0xff]  ;;  %3803 = vrcp.f32 %v1160_v26 }
 0x216   : > { %v5001_v24 = vsub.f32 %v6712_v16, %v916_v37  ;;  %vm6512_vm8 = vcmp.ne.f32.partialorder %v6719_v35, 0.0  ;;  %v1152_v46 = vmul.f32 1.442695, %v1140_v63  ;;  %v1069_v16 = vsub.f32 %v1037_v28, %v4960_v41  ;;  %v3800_v38 = vpop.eup %3799 }
 0x217   : > { %v5006_v20 = vsub.f32 %v6714_v53, %v916_v37  ;;  %v5011_v11 = vsub.f32 %v6716_v40, %v916_v37  ;;  %v1077_v6 = vsub.f32 %v4980_v57, %v4982_v60  ;;  %v5024_v40 = vsel %vm361_vm1, %v1053_v27, 0.0 }
 0x218   : > { %6713 = vst [vmem:[#allocation54_spill] sm:$0xff] %v5001_v24  ;;  %v1054_v53 = vsub.f32 %v1022_v42, %v5001_v24  ;;  %v6721_v26 = vsub.f32 %v4632_v54, %v4583_v34  ;;  %v6723_v57 = vsub.f32 %v4632_v54, %v4603_v62  ;;  %v1139_v42 = vsub.f32 0.0, %v1131_v17 }
 0x219   : > { %6715 = vst [vmem:[#allocation40_spill] sm:$0xff] %v5006_v20  ;;  %6717 = vst [vmem:[#allocation45_spill] sm:$0xff] %v5011_v11  ;;  %v1062_v58 = vsub.f32 %v1030_v8, %v5006_v20  ;;  %v1070_v25 = vsub.f32 %v1038_v1, %v5011_v11  ;;  %v996_v8 = vpop.permute.xlu0 %995  ;;  %v5039_v1 = vsel %vm6514_vm0, %v1061_v9, 0.0  ;;  %3805 = vpow2.f32 %v1152_v46 }
 0x21a   : > { %v5030_v28 = vsub.f32 %v6721_v26, %v918_v44  ;;  %v5035_v63 = vsub.f32 %v6723_v57, %v918_v44  ;;  %v5043_v27 = vsel %vm362_vm9, %v1054_v53, 0.0  ;;  %v6726_v62 = vsub.f32 %v4632_v54, %v6655_v22  ;;  %v998_v57 = vpop.permute.xlu1 %997  ;;  %v3802_v53 = vpop.eup %3801  ;;  %v6729_v22 = vld [vmem:[#allocation46_spill] sm:$0xff] }
 0x21b   : > { %v5047_v34 = vsel %vm370_vm10, %v1062_v58, 0.0  ;;  %v5057_v9 = vsel %vm999_vm11, %v996_v8, %v998_v57  ;;  %v1161_v46 = vadd.f32 1.0, %v3800_v38  ;;  %v1150_v7 = vmul.f32 1.442695, %v1139_v42  ;;  %v6728_v58 = vld [vmem:[#allocation41_spill] sm:$0xff] }
 0x21c   : > { %6722 = vst [vmem:[#allocation50_spill] sm:$0xff] %v5030_v28  ;;  %6724 = vst [vmem:[#allocation98_spill] sm:$0xff] %v5035_v63  ;;  %v5052_v26 = vsub.f32 %v6726_v62, %v918_v44  ;;  %v1118_v17 = vadd.f32 %v5047_v34, %v5043_v27  ;;  %v5061_v13 = vsel %vm6513_vm14, %v1070_v25, 0.0  ;;  %v1023_v5 = vadd.f32 %v5057_v9, %v6728_v58 }
 0x21d   : > { %6725 = vst [vmem:[#allocation99_spill] sm:$0xff] %v5047_v34  ;;  %v1031_v62 = vadd.f32 %v5057_v9, %v6729_v22  ;;  %v1039_v33 = vadd.f32 %v5057_v9, %v6730_v55  ;;  %v828_v8 = vpop.permute.xlu0 %827  ;;  %3807 = vrcp.f32 %v1161_v46  ;;  %v5072_v38 = vsel %vm6511_vm5, %v1069_v16, 0.0 }
 0x21e   : > { %6727 = vst [vmem:[#allocation100_spill] sm:$0xff] %v5052_v26  ;;  %v1126_v34 = vadd.f32 %v1118_v17, %v5061_v13  ;;  %6731 = vst [vmem:[#allocation41_spill] sm:$0xff] %v5072_v38  ;;  %v1117_v25 = vadd.f32 %v5039_v1, %v5024_v40  ;;  %v893_v42 = vsub.f32 %v4632_v54, %v828_v8  ;;  %v830_v55 = vpop.permute.xlu1 %829  ;;  %3809 = vpow2.f32 %v1150_v7 }
 0x21f   : > { %v1055_v57 = vsub.f32 %v1023_v5, %v5030_v28  ;;  %v1063_v58 = vsub.f32 %v1031_v62, %v5035_v63  ;;  %v1071_v22 = vsub.f32 %v1039_v33, %v5052_v26  ;;  %v1046_v17 = vadd.f32 %v4974_v39, %v6732_v2  ;;  %v3804_v2 = vpop.eup %3803  ;;  %v6734_v62 = vld [vmem:[#allocation56_spill] sm:$0xff] }
 0x220   : > { %v894_v46 = vsub.f32 %v4632_v54, %v830_v55  ;;  %v1125_v16 = vadd.f32 %v1117_v25, %v5072_v38  ;;  %v5084_v4 = vsub.f32 %v893_v42, %v916_v37  ;;  %v5096_v33 = vsel %vm6508_vm15, %v1077_v6, 0.0  ;;  %v6736_v42 = vld [vmem:[#allocation28_spill] sm:$0xff] }
 0x221   : > { %v5088_v8 = vsel %vm363_vm6, %v1055_v57, 0.0  ;;  %v5092_v5 = vsel %vm371_vm7, %v1063_v58, 0.0  ;;  %v1047_v54 = vadd.f32 %v5057_v9, %v6734_v62  ;;  %vm6509_vm11 = vcmp.ne.f32.partialorder %v6736_v42, 0.0  ;;  %v6843_v42 = vld [vmem:[#allocation73_spill] sm:$0xff] }
 0x222   : > { %6733 = vst [vmem:[#allocation46_spill] sm:$0xff] %v5084_v4  ;;  %v1119_v37 = vadd.f32 %v5092_v5, %v5088_v8  ;;  %v5102_v7 = vsub.f32 %v894_v46, %v918_v44  ;;  %v1133_v25 = vadd.f32 %v1125_v16, %v5096_v33  ;;  %v1162_v57 = vadd.f32 1.0, %v3802_v53 }
 0x223   : > { %v1078_v58 = vsub.f32 %v1046_v17, %v5084_v4  ;;  %v5109_v6 = vsel %vm6512_vm8, %v1071_v22, 0.0  ;;  %v3806_v38 = vpop.eup %3805 }
 0x224   : > { %6735 = vst [vmem:[#allocation51_spill] sm:$0xff] %v5102_v7  ;;  %v1127_v55 = vadd.f32 %v1119_v37, %v5109_v6  ;;  %v1079_v62 = vsub.f32 %v1047_v54, %v5102_v7  ;;  %v1141_v14 = vsub.f32 0.0, %v1133_v25  ;;  %3811 = vrcp.f32 %v1162_v57 }
 0x225   : > { %v5115_v44 = vsel %vm6510_vm13, %v1078_v58, 0.0  ;;  %v1182_v54 = vmul.f32 %v3804_v2, %v4660_v32  ;;  %v5125_v25 = vmul.f32 %v3804_v2, %v4662_v49  ;;  %v6737_v32 = vld [vmem:[#allocation57_spill] sm:$0xff] }
 0x226   : > { %v1134_v46 = vadd.f32 %v1126_v34, %v5115_v44  ;;  %v5120_v53 = vsel %vm6509_vm11, %v1079_v62, 0.0  ;;  %v1154_v17 = vmul.f32 1.442695, %v1141_v14 }
 0x227   : > { %v1135_v22 = vadd.f32 %v1127_v55, %v5120_v53  ;;  %v3808_v16 = vpop.eup %3807  ;;  %v5135_v55 = vmul.f32 %v3804_v2, %v4664_v48 }
 0x228   : > { %v1142_v37 = vsub.f32 0.0, %v1134_v46  ;;  %3813 = vpow2.f32 %v1154_v17  ;;  %v1183_v47 = vmul.f32 %v3808_v16, %v4705_v45  ;;  %v5129_v34 = vmul.f32 %v3808_v16, %v4707_v31  ;;  %v3810_v14 = vpop.eup %3809 }
 0x229   : > { %v1143_v58 = vsub.f32 0.0, %v1135_v22  ;;  %v5132_v62 = vmul.f32 %v3808_v16, %v4735_v30  ;;  %v5138_v46 = vmul.f32 %v3804_v2, %v4666_v3  ;;  %v5141_v17 = vmul.f32 %v3808_v16, %v4748_v36 }
 0x22a   : > { %v1156_v57 = vmul.f32 1.442695, %v1142_v37  ;;  %v1214_v49 = vpack.c.bf16 %v1183_v47, %v1182_v54  ;;  %v1163_v45 = vadd.f32 1.0, %v3810_v14  ;;  %v1164_v2 = vadd.f32 1.0, %v3806_v38 }
 0x22b   : > { %v1158_v22 = vmul.f32 1.442695, %v1143_v58 }
 0x22c   : > { %3815 = vpow2.f32 %v1156_v57  ;;  %3534 = vmatprep.mubr.msk.bf16.mxu1 %vm6457_vm2, %v1214_v49 }
 0x22d   : > { %3817 = vpow2.f32 %v1158_v22 }
 0x22e   : > { %3819 = vrcp.f32 %v1163_v45  ;;  %v3812_v16 = vpop.eup %3811 }
 0x22f   : > { %3821 = vrcp.f32 %v1164_v2  ;;  %v1184_v30 = vmul.f32 %v3812_v16, %v4768_v56  ;;  %v1192_v3 = vmul.f32 %v3812_v16, %v4770_v59  ;;  %v1200_v22 = vmul.f32 %v3812_v16, %v4772_v50 }
 0x232   : > { %v3814_v36 = vpop.eup %3813 }
 0x233   : > { %v1165_v47 = vadd.f32 1.0, %v3814_v36  ;;  %v1208_v36 = vmul.f32 %v3812_v16, %v4774_v18  ;;  %v6738_v18 = vld [vmem:[#allocation58_spill] sm:$0xff] }
 0x235   : > { %3823 = vrcp.f32 %v1165_v47 }
 0x236   : > { %v3816_v54 = vpop.eup %3815 }
 0x237   : > { %v3818_v58 = vpop.eup %3817  ;;  %v1166_v14 = vadd.f32 1.0, %v3816_v54 }
 0x238   : > { %v3820_v57 = vpop.eup %3819  ;;  %v1167_v31 = vadd.f32 1.0, %v3818_v58 }
 0x239   : > { %3825 = vrcp.f32 %v1166_v14  ;;  %v1185_v49 = vmul.f32 %v3820_v57, %v4849_v43  ;;  %v1193_v45 = vmul.f32 %v3820_v57, %v4855_v21  ;;  %v1201_v38 = vmul.f32 %v3820_v57, %v4896_v23  ;;  %v3822_v37 = vpop.eup %3821 }
 0x23a   : > { %3827 = vrcp.f32 %v1167_v31  ;;  %v1209_v2 = vmul.f32 %v3820_v57, %v4899_v12  ;;  %v1186_v43 = vmul.f32 %v3822_v37, %v4882_v29  ;;  %v1194_v21 = vmul.f32 %v3822_v37, %v4887_v51 }
 0x23b   : > { %v1215_v47 = vpack.c.bf16 %v1185_v49, %v1184_v30  ;;  %v1219_v54 = vpack.c.bf16 %v1193_v45, %v1192_v3  ;;  %v1223_v58 = vpack.c.bf16 %v1201_v38, %v1200_v22  ;;  %v1202_v31 = vmul.f32 %v3822_v37, %v4889_v0 }
 0x23c   : > { %v1227_v48 = vpack.c.bf16 %v1209_v2, %v1208_v36  ;;  %v1210_v16 = vmul.f32 %v3822_v37, %v4891_v61 }
 0x23d   : > { %3535 = vmatmul.mubr.msk.bf16.vlgmr.msra.gmra.mrb[0].mxu1 %vm6457_vm2, %v1215_v47  ;;  %v6739_v47 = vld [vmem:[#allocation59_spill] sm:$0xff] }
 0x23e   : > { %3567 = vmatpush3.bf16.msra.mxu1 %v6737_v32 }
 0x23f   : > { %v3824_v14 = vpop.eup %3823  ;;  %3568 = vmatprep.subr.bf16.mxu1 %v6738_v18 }
 0x240   : > { %v1187_v3 = vmul.f32 %v3824_v14, %v4935_v19  ;;  %v1195_v30 = vmul.f32 %v3824_v14, %v4955_v15  ;;  %v1203_v57 = vmul.f32 %v3824_v14, %v4960_v41  ;;  %v1211_v22 = vmul.f32 %v3824_v14, %v4982_v60 }
 0x242   : > { %v1216_v49 = vpack.c.bf16 %v1187_v3, %v1186_v43  ;;  %v1220_v45 = vpack.c.bf16 %v1195_v30, %v1194_v21  ;;  %v1224_v38 = vpack.c.bf16 %v1203_v57, %v1202_v31  ;;  %v1228_v36 = vpack.c.bf16 %v1211_v22, %v1210_v16  ;;  %3569 = vmatpush3.bf16.msra.mxu1 %v6738_v18 }
 0x243   : > { %v3826_v2 = vpop.eup %3825  ;;  %3570 = vmatprep.subr.bf16.mxu1 %v6739_v47  ;;  %v6740_v22 = vpack.c.bf16 %v5129_v34, %v5125_v25 }
 0x244   : > { %v3828_v37 = vpop.eup %3827  ;;  %3538 = vmatprep.mubr.msk.bf16.mxu1 %vm6457_vm2, %v1216_v49  ;;  %v1188_v19 = vmul.f32 %v3826_v2, %v5001_v24  ;;  %v1196_v15 = vmul.f32 %v3826_v2, %v5006_v20  ;;  %v1204_v41 = vmul.f32 %v3826_v2, %v5011_v11  ;;  %v1212_v14 = vmul.f32 %v3826_v2, %v5084_v4 }
 0x245   : > { %v1189_v43 = vmul.f32 %v3828_v37, %v5030_v28  ;;  %v1197_v21 = vmul.f32 %v3828_v37, %v5035_v63  ;;  %v1205_v18 = vmul.f32 %v3828_v37, %v5052_v26  ;;  %v1213_v31 = vmul.f32 %v3828_v37, %v5102_v7 }
 0x246   : > { %3571 = vmatpush3.bf16.msra.mxu1 %v6739_v47  ;;  %v6749_v47 = vld [vmem:[#allocation74_spill] sm:$0xff] }
 0x247   : > { %v1217_v16 = vpack.c.bf16 %v1189_v43, %v1188_v19  ;;  %v1221_v3 = vpack.c.bf16 %v1197_v21, %v1196_v15  ;;  %v1225_v30 = vpack.c.bf16 %v1205_v18, %v1204_v41  ;;  %v1229_v57 = vpack.c.bf16 %v1213_v31, %v1212_v14  ;;  %3604 = vmatprep.subr.bf16.mxu1 %v6737_v32  ;;  %v6743_v15 = vld [vmem:[#allocation78_spill] sm:$0xff] }
 0x248   : > { %v6741_v19 = vpack.c.bf16 %v5132_v62, %v5135_v55  ;;  %v6742_v32 = vpack.c.bf16 %v5141_v17, %v5138_v46  ;;  %v6744_v41 = vld [vmem:[#allocation86_spill] sm:$0xff]  ;;  %v6745_v62 = vld [vmem:[#allocation65_spill] sm:$0xff]  ;;  %v1463_v21 = vadd.f32 %v5043_v27, %v4974_v39 }
 0x249   : > { %3539 = vmatmul.mubr.msk.bf16.gmra.mrb[4].mxu1 %vm6457_vm2, %v1217_v16  ;;  %v1459_v25 = vadd.f32 %v6744_v41, %v6743_v15  ;;  %v6746_v55 = vld [vmem:[#allocation70_spill] sm:$0xff]  ;;  %v6752_v16 = vld [vmem:[#allocation91_spill] sm:$0xff] }
 0x24a   : > { %3542 = vmatprep.mubr.msk.bf16.mxu1 %vm6457_vm2, %v6740_v22  ;;  %v6751_v31 = vld [vmem:[#allocation62_spill] sm:$0xff]  ;;  %v1464_v22 = vadd.f32 %v5088_v8, %v5057_v9 }
 0x24b   : > { %v6753_v41 = vld [vmem:[#allocation94_spill] sm:$0xff] }
 0x251   : > { %3543 = vmatmul.mubr.msk.bf16.gmra.mrb[8].mxu1 %vm6457_vm2, %v1219_v54  ;;  %v1457_v54 = vadd.f32 %v6746_v55, %v6745_v62 }
 0x252   : > { %3546 = vmatprep.mubr.msk.bf16.mxu1 %vm6457_vm2, %v1220_v45  ;;  %v6747_v45 = vld [vmem:[#allocation60_spill] sm:$0xff] }
 0x259   : > { %3547 = vmatmul.mubr.msk.bf16.gmra.mrb[12].mxu1 %vm6457_vm2, %v1221_v3  ;;  %v1461_v3 = vadd.f32 %v6752_v16, %v6751_v31  ;;  %v6757_v16 = vld [vmem:[#allocation81_spill] sm:$0xff] }
 0x25a   : > { %3550 = vmatprep.mubr.msk.bf16.mxu1 %vm6457_vm2, %v6741_v19 }
 0x261   : > { %3551 = vmatmul.mubr.msk.bf16.gmra.mrb[16].mxu1 %vm6457_vm2, %v1223_v58 }
 0x262   : > { %3554 = vmatprep.mubr.msk.bf16.mxu1 %vm6457_vm2, %v1224_v38  ;;  %v6748_v38 = vld [vmem:[#allocation64_spill] sm:$0xff] }
 0x263   : > { %v1460_v46 = vadd.f32 %v6748_v38, %v6747_v45 }
 0x269   : > { %3555 = vmatmul.mubr.msk.bf16.gmra.mrb[20].mxu1 %vm6457_vm2, %v1225_v30 }
 0x26a   : > { %3558 = vmatprep.mubr.msk.bf16.mxu1 %vm6457_vm2, %v6742_v32 }
 0x271   : > { %3559 = vmatmul.mubr.msk.bf16.gmra.mrb[24].mxu1 %vm6457_vm2, %v1227_v48  ;;  %v6750_v48 = vld [vmem:[#allocation80_spill] sm:$0xff] }
 0x272   : > { %3562 = vmatprep.mubr.msk.bf16.mxu1 %vm6457_vm2, %v1228_v36  ;;  %v1458_v37 = vadd.f32 %v6750_v48, %v6749_v47 }
 0x279   : > { %3563 = vmatmul.mubr.msk.bf16.gmra.mrb[28].mxu1 %vm6457_vm2, %v1229_v57 }
 0x310   : > { %v3536_v34 = vpop.f32.mrb[0].mxu1 }
 0x311   : > { %v1491_v58 = vadd.f32 %v3536_v34, %v1459_v25  ;;  %v1330_v49 = vpop.f32.mrb[1].mxu1  ;;  %v1462_v25 = vadd.f32 %v5024_v40, %v6753_v41  ;;  %v1466_v40 = vadd.f32 %v6757_v16, %v6749_v47 }
 0x312   : > { %v1489_v17 = vadd.f32 %v1457_v54, %v1330_v49  ;;  %v3537_v2 = vpop.f32.mrb[2].mxu1  ;;  %v6754_v49 = vld [vmem:[#allocation87_spill] sm:$0xff] }
 0x313   : > { %v1492_v36 = vadd.f32 %v3537_v2, %v1460_v46  ;;  %v1333_v14 = vpop.f32.mrb[3].mxu1  ;;  %v1467_v27 = vadd.f32 %v6754_v49, %v6743_v15  ;;  %v6755_v46 = vld [vmem:[#allocation71_spill] sm:$0xff] }
 0x314   : > { %v1490_v43 = vadd.f32 %v1458_v37, %v1333_v14  ;;  %v1465_v2 = vadd.f32 %v6755_v46, %v6745_v62  ;;  %v6756_v14 = vld [vmem:[#allocation53_spill] sm:$0xff] }
 0x315   : > { %v1468_v8 = vadd.f32 %v6756_v14, %v6747_v45  ;;  %v6762_v46 = vld [vmem:[#allocation29_spill] sm:$0xff] }
 0x316   : > { %vm6763_vm2 = vcmp.ne.f32.partialorder %v6762_v46, 0.0  ;;  %v6772_v46 = vld [vmem:[#allocation30_spill] sm:$0xff] }
 0x31c   : > { %v3540_v18 = vpop.f32.mrb[4].mxu1 }
 0x31d   : > { %v1495_v30 = vadd.f32 %v3540_v18, %v1463_v21  ;;  %v1346_v57 = vpop.f32.mrb[5].mxu1 }
 0x31e   : > { %v1493_v19 = vadd.f32 %v1461_v3, %v1346_v57  ;;  %v3541_v32 = vpop.f32.mrb[6].mxu1  ;;  %v5230_v57 = vsel %vm6458_vm3, %v1491_v58, 0.0  ;;  %v6765_v58 = vld [vmem:[#allocation8_spill] sm:$0xff] }
 0x31f   : > { %v1496_v34 = vadd.f32 %v3541_v32, %v1464_v22  ;;  %v1349_v55 = vpop.f32.mrb[7].mxu1  ;;  %vm6766_vm3 = vcmp.ne.f32.partialorder %v6765_v58, 0.0  ;;  %v1472_v22 = vadd.f32 %v5092_v5, %v5057_v9 }
 0x320   : > { %v1494_v54 = vadd.f32 %v1462_v25, %v1349_v55  ;;  %v5248_v14 = vsel %vm6766_vm3, %v1492_v36, 0.0 }
 0x324   : > { %v3544_v38 = vpop.f32.mrb[8].mxu1 }
 0x325   : > { %v1499_v48 = vadd.f32 %v3544_v38, %v1467_v27  ;;  %v1362_v37 = vpop.f32.mrb[9].mxu1  ;;  %v5238_v27 = vsel %vm6460_vm12, %v1489_v17, 0.0  ;;  %v6770_v17 = vld [vmem:[#allocation6_spill] sm:$0xff] }
 0x326   : > { %v1497_v21 = vadd.f32 %v1465_v2, %v1362_v37  ;;  %v3545_v18 = vpop.f32.mrb[10].mxu1  ;;  %vm6771_vm12 = vcmp.ne.f32.partialorder %v6770_v17, 0.0 }
 0x327   : > { %v5234_v32 = vsel %vm6459_vm4, %v1499_v48, 0.0  ;;  %v1500_v25 = vadd.f32 %v3545_v18, %v1468_v8  ;;  %v1365_v55 = vpop.f32.mrb[11].mxu1  ;;  %v6767_v8 = vld [vmem:[#allocation32_spill] sm:$0xff]  ;;  %v5258_v16 = vsel %vm6771_vm12, %v1490_v43, 0.0 }
 0x328   : > { %6760 = vst [vmem:[#allocation55_spill] sm:$0xff] %v5234_v32  ;;  %v1555_v38 = vadd.f32 %v5234_v32, %v5230_v57  ;;  %v5244_v2 = vsel %vm6763_vm2, %v1497_v21, 0.0  ;;  %v1498_v37 = vadd.f32 %v1466_v40, %v1365_v55  ;;  %vm6768_vm4 = vcmp.ne.f32.partialorder %v6767_v8, 0.0  ;;  %v6775_v55 = vld [vmem:[#allocation99_spill] sm:$0xff] }
 0x329   : > { %6764 = vst [vmem:[#allocation56_spill] sm:$0xff] %v5244_v2  ;;  %v1553_v48 = vadd.f32 %v5244_v2, %v5238_v27  ;;  %v5254_v18 = vsel %vm6768_vm4, %v1500_v25, 0.0  ;;  %vm6773_vm2 = vcmp.ne.f32.partialorder %v6772_v46, 0.0  ;;  %v1471_v58 = vadd.f32 %v6775_v55, %v4974_v39  ;;  %v6776_v25 = vld [vmem:[#allocation92_spill] sm:$0xff] }
 0x32a   : > { %6769 = vst [vmem:[#allocation57_spill] sm:$0xff] %v5254_v18  ;;  %v1556_v21 = vadd.f32 %v5254_v18, %v5248_v14  ;;  %v5264_v40 = vsel %vm6773_vm2, %v1498_v37, 0.0  ;;  %v1469_v49 = vadd.f32 %v6776_v25, %v6751_v31  ;;  %v1470_v37 = vadd.f32 %v5039_v1, %v6753_v41  ;;  %v6794_v2 = vld [vmem:[#allocation96_spill] sm:$0xff] }
 0x32b   : > { %6774 = vst [vmem:[#allocation58_spill] sm:$0xff] %v5264_v40  ;;  %v1554_v36 = vadd.f32 %v5264_v40, %v5258_v16  ;;  %v5278_v40 = vsel %vm362_vm9, %v1495_v30, 0.0  ;;  %v5296_v30 = vsel %vm363_vm6, %v1496_v34, 0.0  ;;  %v1476_v46 = vadd.f32 %v6794_v2, %v6747_v45 }
 0x32c   : > { %v3548_v8 = vpop.f32.mrb[12].mxu1  ;;  %6786 = vst [vmem:[#allocation65_spill] sm:$0xff] %v5296_v30 }
 0x32d   : > { %v1503_v17 = vadd.f32 %v3548_v8, %v1471_v58  ;;  %v1378_v43 = vpop.f32.mrb[13].mxu1  ;;  %v6780_v58 = vld [vmem:[#allocation9_spill] sm:$0xff] }
 0x32e   : > { %v1501_v3 = vadd.f32 %v1469_v49, %v1378_v43  ;;  %v3549_v18 = vpop.f32.mrb[14].mxu1  ;;  %vm6781_vm12 = vcmp.ne.f32.partialorder %v6780_v58, 0.0  ;;  %v6783_v49 = vld [vmem:[#allocation33_spill] sm:$0xff] }
 0x32f   : > { %v5282_v55 = vsel %vm370_vm10, %v1503_v17, 0.0  ;;  %v1504_v32 = vadd.f32 %v3549_v18, %v1472_v22  ;;  %v1381_v25 = vpop.f32.mrb[15].mxu1  ;;  %v5286_v8 = vsel %vm6781_vm12, %v1493_v19, 0.0  ;;  %vm6784_vm3 = vcmp.ne.f32.partialorder %v6783_v49, 0.0 }
 0x330   : > { %6779 = vst [vmem:[#allocation59_spill] sm:$0xff] %v5282_v55  ;;  %6782 = vst [vmem:[#allocation78_spill] sm:$0xff] %v5286_v8  ;;  %v1559_v5 = vadd.f32 %v5282_v55, %v5278_v40  ;;  %v5292_v1 = vsel %vm6784_vm3, %v1501_v3, 0.0  ;;  %v1502_v43 = vadd.f32 %v1470_v37, %v1381_v25  ;;  %v5306_v17 = vsel %vm361_vm1, %v1494_v54, 0.0  ;;  %v6792_v25 = vld [vmem:[#allocation89_spill] sm:$0xff] }
 0x331   : > { %6785 = vst [vmem:[#allocation86_spill] sm:$0xff] %v5292_v1  ;;  %v1557_v22 = vadd.f32 %v5292_v1, %v5286_v8  ;;  %v5302_v18 = vsel %vm371_vm7, %v1504_v32, 0.0  ;;  %6789 = vst [vmem:[#allocation60_spill] sm:$0xff] %v5306_v17  ;;  %v1475_v52 = vadd.f32 %v6792_v25, %v6743_v15  ;;  %v6793_v32 = vld [vmem:[#allocation75_spill] sm:$0xff]  ;;  %v6796_v55 = vld [vmem:[#allocation13_spill] sm:$0xff] }
 0x332   : > { %6787 = vst [vmem:[#allocation70_spill] sm:$0xff] %v5302_v18  ;;  %v1560_v3 = vadd.f32 %v5302_v18, %v5296_v30  ;;  %v5312_v37 = vsel %vm6514_vm0, %v1502_v43, 0.0  ;;  %v1473_v58 = vadd.f32 %v6793_v32, %v6745_v62  ;;  %v6795_v43 = vld [vmem:[#allocation88_spill] sm:$0xff]  ;;  %vm6797_vm4 = vcmp.ne.f32.partialorder %v6796_v55, 0.0  ;;  %v6798_v8 = vld [vmem:[#allocation11_spill] sm:$0xff] }
 0x333   : > { %6791 = vst [vmem:[#allocation64_spill] sm:$0xff] %v5312_v37  ;;  %v1558_v34 = vadd.f32 %v5312_v37, %v5306_v17  ;;  %v1474_v49 = vadd.f32 %v6795_v43, %v6749_v47  ;;  %vm6799_vm2 = vcmp.ne.f32.partialorder %v6798_v8, 0.0  ;;  %v6803_v43 = vld [vmem:[#allocation12_spill] sm:$0xff]  ;;  %v6819_v8 = vld [vmem:[#allocation21_spill] sm:$0xff] }
 0x334   : > { %v3552_v10 = vpop.f32.mrb[16].mxu1  ;;  %vm6804_vm3 = vcmp.ne.f32.partialorder %v6803_v43, 0.0  ;;  %v6807_v43 = vld [vmem:[#allocation41_spill] sm:$0xff] }
 0x335   : > { %v1507_v19 = vadd.f32 %v3552_v10, %v1475_v52  ;;  %v1394_v54 = vpop.f32.mrb[17].mxu1 }
 0x336   : > { %v1505_v18 = vadd.f32 %v1473_v58, %v1394_v54  ;;  %v3553_v1 = vpop.f32.mrb[18].mxu1  ;;  %v6800_v58 = vld [vmem:[#allocation14_spill] sm:$0xff] }
 0x337   : > { %v5326_v37 = vsel %vm6797_vm4, %v1507_v19, 0.0  ;;  %v1508_v17 = vadd.f32 %v3553_v1, %v1476_v46  ;;  %v1397_v25 = vpop.f32.mrb[19].mxu1  ;;  %vm6801_vm12 = vcmp.ne.f32.partialorder %v6800_v58, 0.0 }
 0x338   : > { %v1563_v30 = vadd.f32 %v1555_v38, %v5326_v37  ;;  %v5331_v52 = vsel %vm6799_vm2, %v1505_v18, 0.0  ;;  %v1506_v10 = vadd.f32 %v1474_v49, %v1397_v25  ;;  %v1479_v38 = vadd.f32 %v5061_v13, %v4974_v39  ;;  %v6806_v49 = vld [vmem:[#allocation95_spill] sm:$0xff] }
 0x339   : > { %v1561_v2 = vadd.f32 %v1553_v48, %v5331_v52  ;;  %v5336_v32 = vsel %vm6801_vm12, %v1508_v17, 0.0  ;;  %v1477_v18 = vadd.f32 %v6806_v49, %v6751_v31  ;;  %v1480_v17 = vadd.f32 %v5109_v6, %v5057_v9 }
 0x33a   : > { %6802 = vst [vmem:[#allocation74_spill] sm:$0xff] %v5336_v32  ;;  %v1564_v54 = vadd.f32 %v1556_v21, %v5336_v32  ;;  %v5341_v19 = vsel %vm6804_vm3, %v1506_v10, 0.0  ;;  %v1478_v10 = vadd.f32 %v6807_v43, %v6753_v41  ;;  %v6809_v32 = vld [vmem:[#allocation15_spill] sm:$0xff]  ;;  %vm6820_vm2 = vcmp.ne.f32.partialorder %v6819_v8, 0.0 }
 0x33b   : > { %6805 = vst [vmem:[#allocation80_spill] sm:$0xff] %v5341_v19  ;;  %v1562_v46 = vadd.f32 %v1554_v36, %v5341_v19  ;;  %vm6810_vm4 = vcmp.ne.f32.partialorder %v6809_v32, 0.0 }
 0x33c   : > { %v3556_v1 = vpop.f32.mrb[20].mxu1 }
 0x33d   : > { %v1511_v48 = vadd.f32 %v3556_v1, %v1479_v38  ;;  %v1410_v25 = vpop.f32.mrb[21].mxu1 }
 0x33e   : > { %v1509_v58 = vadd.f32 %v1477_v18, %v1410_v25  ;;  %v3557_v21 = vpop.f32.mrb[22].mxu1  ;;  %v6818_v18 = vld [vmem:[#allocation90_spill] sm:$0xff] }
 0x33f   : > { %v5354_v36 = vsel %vm6513_vm14, %v1511_v48, 0.0  ;;  %v1512_v55 = vadd.f32 %v3557_v21, %v1480_v17  ;;  %v1413_v13 = vpop.f32.mrb[23].mxu1  ;;  %v6816_v21 = vld [vmem:[#allocation76_spill] sm:$0xff] }
 0x340   : > { %v1567_v19 = vadd.f32 %v1559_v5, %v5354_v36  ;;  %v5359_v38 = vsel %vm6810_vm4, %v1509_v58, 0.0  ;;  %v1510_v1 = vadd.f32 %v1478_v10, %v1413_v13  ;;  %v6815_v5 = vld [vmem:[#allocation37_spill] sm:$0xff]  ;;  %v1481_v10 = vadd.f32 %v6816_v21, %v6745_v62 }
 0x341   : > { %6811 = vst [vmem:[#allocation62_spill] sm:$0xff] %v5359_v38  ;;  %v1565_v6 = vadd.f32 %v1557_v22, %v5359_v38  ;;  %v5364_v49 = vsel %vm6512_vm8, %v1512_v55, 0.0  ;;  %v1483_v17 = vadd.f32 %v6815_v5, %v6743_v15  ;;  %v6817_v55 = vld [vmem:[#allocation49_spill] sm:$0xff]  ;;  %v6821_v38 = vld [vmem:[#allocation19_spill] sm:$0xff] }
 0x342   : > { %6812 = vst [vmem:[#allocation91_spill] sm:$0xff] %v5364_v49  ;;  %v1568_v43 = vadd.f32 %v1560_v3, %v5364_v49  ;;  %v5369_v48 = vsel %vm6511_vm5, %v1510_v1, 0.0  ;;  %v1484_v35 = vadd.f32 %v6817_v55, %v6747_v45  ;;  %v1482_v1 = vadd.f32 %v6818_v18, %v6749_v47 }
 0x343   : > { %6814 = vst [vmem:[#allocation94_spill] sm:$0xff] %v5369_v48  ;;  %v1566_v25 = vadd.f32 %v1558_v34, %v5369_v48  ;;  %vm6822_vm12 = vcmp.ne.f32.partialorder %v6821_v38, 0.0 }
 0x344   : > { %v3560_v58 = vpop.f32.mrb[24].mxu1 }
 0x345   : > { %v1515_v22 = vadd.f32 %v3560_v58, %v1483_v17  ;;  %v1426_v13 = vpop.f32.mrb[25].mxu1 }
 0x346   : > { %v1513_v32 = vadd.f32 %v1481_v10, %v1426_v13  ;;  %v3561_v3 = vpop.f32.mrb[26].mxu1  ;;  %v6823_v10 = vld [vmem:[#allocation24_spill] sm:$0xff] }
 0x347   : > { %v5382_v34 = vsel %vm6820_vm2, %v1515_v22, 0.0  ;;  %v1516_v48 = vadd.f32 %v3561_v3, %v1484_v35  ;;  %v1429_v5 = vpop.f32.mrb[27].mxu1  ;;  %vm6824_vm3 = vcmp.ne.f32.partialorder %v6823_v10, 0.0  ;;  %v6825_v22 = vld [vmem:[#allocation20_spill] sm:$0xff]  ;;  %v6828_v10 = vld [vmem:[#allocation97_spill] sm:$0xff] }
 0x348   : > { %v1571_v49 = vadd.f32 %v1563_v30, %v5382_v34  ;;  %v5387_v17 = vsel %vm6822_vm12, %v1513_v32, 0.0  ;;  %v1514_v58 = vadd.f32 %v1482_v1, %v1429_v5  ;;  %vm6826_vm4 = vcmp.ne.f32.partialorder %v6825_v22, 0.0 }
 0x349   : > { %v1569_v21 = vadd.f32 %v1561_v2, %v5387_v17  ;;  %v5392_v13 = vsel %vm6824_vm3, %v1516_v48, 0.0  ;;  %v1487_v32 = vadd.f32 %v5115_v44, %v4974_v39  ;;  %v1485_v48 = vadd.f32 %v6828_v10, %v6751_v31 }
 0x34a   : > { %v1579_v18 = vsub.f32 0.0, %v1571_v49  ;;  %v1572_v55 = vadd.f32 %v1564_v54, %v5392_v13  ;;  %v5397_v35 = vsel %vm6826_vm4, %v1514_v58, 0.0  ;;  %v1488_v58 = vadd.f32 %v5120_v53, %v5057_v9 }
 0x34b   : > { %6827 = vst [vmem:[#allocation87_spill] sm:$0xff] %v5397_v35  ;;  %v1577_v3 = vsub.f32 0.0, %v1569_v21  ;;  %v1570_v30 = vadd.f32 %v1562_v46, %v5397_v35  ;;  %v1486_v44 = vadd.f32 %v5096_v33, %v6753_v41  ;;  %vm6846_vm12 = vcmask 392192  }
 0x34c   : > { %v1589_v1 = vmul.f32 1.442695, %v1579_v18  ;;  %v1580_v5 = vsub.f32 0.0, %v1572_v55  ;;  %v3564_v2 = vpop.f32.mrb[28].mxu1  ;;  %v6845_v55 = vld [vmem:[#allocation79_spill] sm:$0xff]  ;;  %vm6847_vm3 = vmmov %vm6846_vm12 }
 0x34d   : > { %v1585_v38 = vmul.f32 1.442695, %v1577_v3  ;;  %v1578_v49 = vsub.f32 0.0, %v1570_v30  ;;  %v1519_v8 = vadd.f32 %v3564_v2, %v1487_v32  ;;  %v1442_v54 = vpop.f32.mrb[29].mxu1  ;;  %v6830_v32 = vld [vmem:[#allocation25_spill] sm:$0xff]  ;;  %v6842_v2 = vld [vmem:[#allocation72_spill] sm:$0xff]  ;;  %vm6851_vm4 = vmmov %vm6847_vm3 }
 0x34e   : > { %3829 = vpow2.f32 %v1589_v1  ;;  %v1591_v21 = vmul.f32 1.442695, %v1580_v5  ;;  %v1517_v22 = vadd.f32 %v1485_v48, %v1442_v54  ;;  %v3565_v46 = vpop.f32.mrb[30].mxu1  ;;  %vm6831_vm2 = vcmp.ne.f32.partialorder %v6830_v32, 0.0  ;;  %v6844_v32 = vld [vmem:[#allocation77_spill] sm:$0xff] }
 0x34f   : > { %3831 = vpow2.f32 %v1585_v38  ;;  %v1587_v18 = vmul.f32 1.442695, %v1578_v49  ;;  %v5410_v35 = vsel %vm6510_vm13, %v1519_v8, 0.0  ;;  %v1520_v10 = vadd.f32 %v3565_v46, %v1488_v58  ;;  %v1445_v3 = vpop.f32.mrb[31].mxu1 }
 0x350   : > { %3833 = vpow2.f32 %v1591_v21  ;;  %v1575_v30 = vadd.f32 %v1567_v19, %v5410_v35  ;;  %v5415_v53 = vsel %vm6831_vm2, %v1517_v22, 0.0  ;;  %v1518_v1 = vadd.f32 %v1486_v44, %v1445_v3  ;;  %vm6852_vm2 = vmmov %vm6847_vm3 }
 0x351   : > { %3835 = vpow2.f32 %v1587_v18  ;;  %v1573_v5 = vadd.f32 %v1565_v6, %v5415_v53  ;;  %v5420_v33 = vsel %vm6509_vm11, %v1520_v10, 0.0  ;;  %vm6856_vm11 = vmmov %vm6852_vm2 }
 0x352   : > { %6832 = vst [vmem:[#allocation71_spill] sm:$0xff] %v5420_v33  ;;  %v1583_v38 = vsub.f32 0.0, %v1575_v30  ;;  %v1576_v8 = vadd.f32 %v1568_v43, %v5420_v33  ;;  %v5425_v48 = vsel %vm6508_vm15, %v1518_v1, 0.0  ;;  %vm6855_vm15 = vmmov %vm6852_vm2 }
 0x353   : > { %6834 = vst [vmem:[#allocation53_spill] sm:$0xff] %v5425_v48  ;;  %v1581_v19 = vsub.f32 0.0, %v1573_v5  ;;  %v1574_v49 = vadd.f32 %v1566_v25, %v5425_v48  ;;  %vm6857_vm13 = vmmov %vm6852_vm2 }
 0x354   : > { %v1597_v22 = vmul.f32 1.442695, %v1583_v38  ;;  %v1584_v54 = vsub.f32 0.0, %v1576_v8  ;;  %vm6858_vm5 = vmmov %vm6852_vm2 }
 0x355   : > { %v1593_v58 = vmul.f32 1.442695, %v1581_v19  ;;  %v1582_v21 = vsub.f32 0.0, %v1574_v49  ;;  %vm6859_vm8 = vmmov %vm6852_vm2 }
 0x356   : > { %3837 = vpow2.f32 %v1597_v22  ;;  %v1599_v6 = vmul.f32 1.442695, %v1584_v54  ;;  %vm6860_vm14 = vmmov %vm6852_vm2 }
 0x357   : > { %3839 = vpow2.f32 %v1593_v58  ;;  %v1595_v46 = vmul.f32 1.442695, %v1582_v21  ;;  %vm6863_vm0 = vmmov %vm6852_vm2 }
 0x358   : > { %v3830_v44 = vpop.eup %3829  ;;  %3841 = vpow2.f32 %v1599_v6 }
 0x359   : > { %v3832_v18 = vpop.eup %3831  ;;  %v1603_v10 = vadd.f32 1.0, %v3830_v44  ;;  %3843 = vpow2.f32 %v1595_v46 }
 0x35a   : > { %v3834_v43 = vpop.eup %3833  ;;  %v1601_v3 = vadd.f32 1.0, %v3832_v18 }
 0x35b   : > { %v3836_v30 = vpop.eup %3835  ;;  %3845 = vrcp.f32 %v1603_v10  ;;  %v1604_v1 = vadd.f32 1.0, %v3834_v43  ;;  %v6835_v43 = vld [vmem:[#allocation66_spill] sm:$0xff] }
 0x35c   : > { %3847 = vrcp.f32 %v1601_v3  ;;  %v1602_v25 = vadd.f32 1.0, %v3836_v30  ;;  %v6836_v30 = vld [vmem:[#allocation67_spill] sm:$0xff] }
 0x35d   : > { %3849 = vrcp.f32 %v1604_v1 }
 0x35e   : > { %3851 = vrcp.f32 %v1602_v25  ;;  %v6837_v25 = vld [vmem:[#allocation68_spill] sm:$0xff] }
 0x360   : > { %v3838_v5 = vpop.eup %3837 }
 0x361   : > { %v3840_v38 = vpop.eup %3839  ;;  %v1607_v8 = vadd.f32 1.0, %v3838_v5 }
 0x362   : > { %v3842_v19 = vpop.eup %3841  ;;  %v1605_v49 = vadd.f32 1.0, %v3840_v38  ;;  %v6838_v38 = vld [vmem:[#allocation69_spill] sm:$0xff] }
 0x363   : > { %v3844_v22 = vpop.eup %3843  ;;  %3853 = vrcp.f32 %v1607_v8  ;;  %v1608_v54 = vadd.f32 1.0, %v3842_v19 }
 0x364   : > { %3855 = vrcp.f32 %v1605_v49  ;;  %v1606_v58 = vadd.f32 1.0, %v3844_v22  ;;  %v6839_v49 = vld [vmem:[#allocation42_spill] sm:$0xff] }
 0x365   : > { %v3846_v21 = vpop.eup %3845  ;;  %3857 = vrcp.f32 %v1608_v54  ;;  %v6840_v54 = vld [vmem:[#allocation61_spill] sm:$0xff] }
 0x366   : > { %v3848_v6 = vpop.eup %3847  ;;  %3859 = vrcp.f32 %v1606_v58  ;;  %v1619_v46 = vmul.f32 %v3846_v21, %v4768_v56  ;;  %v5430_v44 = vmul.f32 %v3846_v21, %v4770_v59  ;;  %v5433_v18 = vmul.f32 %v3846_v21, %v4772_v50  ;;  %v6841_v50 = vld [vmem:[#allocation85_spill] sm:$0xff] }
 0x367   : > { %v3850_v10 = vpop.eup %3849  ;;  %v1617_v3 = vmul.f32 %v3848_v6, %v6835_v43  ;;  %v1625_v1 = vmul.f32 %v3848_v6, %v6836_v30  ;;  %v5438_v5 = vmul.f32 %v3848_v6, %v6837_v25  ;;  %v5441_v8 = vmul.f32 %v3848_v6, %v6838_v38 }
 0x368   : > { %v3852_v19 = vpop.eup %3851  ;;  %v1620_v22 = vmul.f32 %v3850_v10, %v6839_v49  ;;  %v1628_v58 = vmul.f32 %v3850_v10, %v6840_v54  ;;  %v1636_v59 = vmul.f32 %v3850_v10, %v4896_v23  ;;  %v5447_v56 = vmul.f32 %v3846_v21, %v6841_v50 }
 0x369   : > { %v1618_v43 = vmul.f32 %v3852_v19, %v6842_v2  ;;  %v1626_v30 = vmul.f32 %v3852_v19, %v6843_v42  ;;  %v1634_v25 = vmul.f32 %v3852_v19, %v6844_v32  ;;  %v1642_v48 = vmul.f32 %v3852_v19, %v6845_v55 }
 0x36a   : > { %v1650_v6 = vpack.c.bf16 %v1620_v22, %v1619_v46  ;;  %v1654_v38 = vpack.c.bf16 %v1628_v58, %v5430_v44  ;;  %v1658_v49 = vpack.c.bf16 %v1636_v59, %v5433_v18  ;;  %v1644_v54 = vmul.f32 %v3850_v10, %v4899_v12  ;;  %v6849_v22 = vld [vmem:[#allocation39_spill] sm:$0xff]  ;;  %v6850_v58 = vld [vmem:[#allocation44_spill] sm:$0xff] }
 0x36b   : > { %v1649_v33 = vpack.c.bf16 %v1618_v43, %v1617_v3  ;;  %v1653_v23 = vpack.c.bf16 %v1626_v30, %v1625_v1  ;;  %v1657_v21 = vpack.c.bf16 %v1634_v25, %v5438_v5  ;;  %v1661_v50 = vpack.c.bf16 %v1642_v48, %v5441_v8  ;;  %v3957_v3 = vld [vmem:[%s6266_s2] sm:$0xff]   ;;  %v3958_v8 = vld [vmem:[%s6266_s2 + $0x8] sm:$0xff]  }
 0x36c   : > { %v1662_v2 = vpack.c.bf16 %v1644_v54, %v5447_v56 }
 0x36d   : > { %v3854_v42 = vpop.eup %3853  ;;  %3572 = vmatprep.mubr.msk.bf16.mxu1 %vm6846_vm12, %v1649_v33  ;;  %vm6853_vm12 = vmmov %vm6852_vm2 }
 0x36e   : > { %v3856_v32 = vpop.eup %3855  ;;  %3573 = vmatmul.mubr.msk.bf16.vlgmr.msra.gmra.mrb[32].mxu1 %vm6847_vm3, %v1650_v6  ;;  %v1623_v46 = vmul.f32 %v3854_v42, %v5001_v24  ;;  %v1631_v59 = vmul.f32 %v3854_v42, %v5006_v20  ;;  %v1639_v44 = vmul.f32 %v3854_v42, %v5011_v11  ;;  %v1647_v18 = vmul.f32 %v3854_v42, %v5084_v4  ;;  %vm6854_vm3 = vmmov %vm6852_vm2 }
 0x36f   : > { %v3858_v10 = vpop.eup %3857  ;;  %v1621_v43 = vmul.f32 %v3856_v32, %v4882_v29  ;;  %v1629_v48 = vmul.f32 %v3856_v32, %v4887_v51  ;;  %v1637_v56 = vmul.f32 %v3856_v32, %v4889_v0  ;;  %v1645_v33 = vmul.f32 %v3856_v32, %v4891_v61  ;;  %3605 = vmatpush3.bf16.msra.mxu1 %v3957_v3  ;;  %v6848_v32 = vld [vmem:[#allocation93_spill] sm:$0xff]  ;;  %v3959_v29 = vld [vmem:[%s6266_s2 + $0x10] sm:$0xff]  }
 0x370   : > { %v3860_v30 = vpop.eup %3859  ;;  %v1624_v1 = vmul.f32 %v3858_v10, %v5030_v28  ;;  %v1632_v25 = vmul.f32 %v3858_v10, %v5035_v63  ;;  %v1640_v42 = vmul.f32 %v3858_v10, %v5052_v26  ;;  %v1648_v5 = vmul.f32 %v3858_v10, %v5102_v7  ;;  %3606 = vmatprep.subr.bf16.mxu1 %v3958_v8 }
 0x371   : > { %v1622_v19 = vmul.f32 %v3860_v30, %v6848_v32  ;;  %v1630_v54 = vmul.f32 %v3860_v30, %v6849_v22  ;;  %v1638_v6 = vmul.f32 %v3860_v30, %v6850_v58  ;;  %v1646_v3 = vmul.f32 %v3860_v30, %v4982_v60 }
 0x372   : > { %v1652_v28 = vpack.c.bf16 %v1624_v1, %v1623_v46  ;;  %v1656_v61 = vpack.c.bf16 %v1632_v25, %v1631_v59  ;;  %v1660_v63 = vpack.c.bf16 %v1640_v42, %v1639_v44  ;;  %v1664_v0 = vpack.c.bf16 %v1648_v5, %v1647_v18  ;;  %v6865_v44 = vld [vmem:[#allocation65_spill] sm:$0xff]  ;;  %v6867_v1 = vld [vmem:[#allocation55_spill] sm:$0xff]  ;;  %v6868_v42 = vld [vmem:[#allocation56_spill] sm:$0xff] }
 0x373   : > { %v1651_v26 = vpack.c.bf16 %v1622_v19, %v1621_v43  ;;  %v1655_v51 = vpack.c.bf16 %v1630_v54, %v1629_v48  ;;  %v1659_v10 = vpack.c.bf16 %v1638_v6, %v1637_v56  ;;  %v1663_v7 = vpack.c.bf16 %v1646_v3, %v1645_v33  ;;  %3607 = vmatpush3.bf16.msra.mxu1 %v3958_v8  ;;  %v6866_v48 = vld [vmem:[#allocation60_spill] sm:$0xff]  ;;  %v6869_v54 = vld [vmem:[#allocation57_spill] sm:$0xff] }
 0x374   : > { %3608 = vmatprep.subr.bf16.mxu1 %v3959_v29  ;;  %v1882_v5 = vadd.f32 %v6868_v42, %v6745_v62  ;;  %v1885_v6 = vadd.f32 %v6869_v54, %v6747_v45  ;;  %v6887_v42 = vld [vmem:[#allocation59_spill] sm:$0xff] }
 0x375   : > { %3576 = vmatprep.mubr.msk.bf16.mxu1 %vm6851_vm4, %v1651_v26  ;;  %vm6861_vm4 = vmmov %vm6852_vm2 }
 0x376   : > { %3577 = vmatmul.mubr.msk.bf16.gmra.mrb[36].mxu1 %vm6852_vm2, %v1652_v28 }
 0x377   : > { %3580 = vmatprep.mubr.msk.bf16.mxu1 %vm6853_vm12, %v1653_v23  ;;  %3609 = vmatpush3.bf16.msra.mxu1 %v3959_v29  ;;  %vm6862_vm12 = vmmov %vm6852_vm2  ;;  %v1876_v29 = vadd.f32 %v5230_v57, %v6743_v15  ;;  %v1880_v57 = vadd.f32 %v5278_v40, %v4974_v39  ;;  %v1884_v40 = vadd.f32 %v6867_v1, %v6743_v15 }
 0x37e   : > { %3581 = vmatmul.mubr.msk.bf16.gmra.mrb[40].mxu1 %vm6854_vm3, %v1654_v38 }
 0x37f   : > { %3584 = vmatprep.mubr.msk.bf16.mxu1 %vm6855_vm15, %v1655_v51  ;;  %v1874_v51 = vadd.f32 %v5238_v27, %v6745_v62 }
 0x386   : > { %3585 = vmatmul.mubr.msk.bf16.gmra.mrb[44].mxu1 %vm6856_vm11, %v1656_v61 }
 0x387   : > { %3588 = vmatprep.mubr.msk.bf16.mxu1 %vm6857_vm13, %v1657_v21  ;;  %v6864_v21 = vld [vmem:[#allocation78_spill] sm:$0xff] }
 0x388   : > { %v1878_v27 = vadd.f32 %v6864_v21, %v6751_v31 }
 0x38e   : > { %3589 = vmatmul.mubr.msk.bf16.gmra.mrb[48].mxu1 %vm6858_vm5, %v1658_v49 }
 0x38f   : > { %3592 = vmatprep.mubr.msk.bf16.mxu1 %vm6859_vm8, %v1659_v10 }
 0x396   : > { %3593 = vmatmul.mubr.msk.bf16.gmra.mrb[52].mxu1 %vm6860_vm14, %v1660_v63  ;;  %v1877_v63 = vadd.f32 %v5248_v14, %v6747_v45  ;;  %v1881_v14 = vadd.f32 %v6865_v44, %v5057_v9 }
 0x397   : > { %3596 = vmatprep.mubr.msk.bf16.mxu1 %vm6861_vm4, %v1661_v50 }
 0x39e   : > { %3597 = vmatmul.mubr.msk.bf16.gmra.mrb[56].mxu1 %vm6852_vm2, %v1662_v2  ;;  %v1875_v2 = vadd.f32 %v5258_v16, %v6749_v47  ;;  %v1879_v16 = vadd.f32 %v6866_v48, %v6753_v41  ;;  %v6881_v48 = vld [vmem:[#allocation32_spill] sm:$0xff] }
 0x39f   : > { %3600 = vmatprep.mubr.msk.bf16.mxu1 %vm6862_vm12, %v1663_v7  ;;  %vm6882_vm8 = vcmp.ne.f32.partialorder %v6881_v48, 0.0 }
 0x3a6   : > { %3601 = vmatmul.mubr.msk.bf16.gmra.mrb[60].mxu1 %vm6863_vm0, %v1664_v0 }
 0x441   : > { %v3574_v61 = vpop.f32.mrb[32].mxu1 }
 0x442   : > { %v1908_v23 = vadd.f32 %v3574_v61, %v1876_v29  ;;  %v1747_v28 = vpop.f32.mrb[33].mxu1  ;;  %v6870_v29 = vld [vmem:[#allocation58_spill] sm:$0xff] }
 0x443   : > { %v1906_v26 = vadd.f32 %v1874_v51, %v1747_v28  ;;  %v3575_v50 = vpop.f32.mrb[34].mxu1  ;;  %v1883_v61 = vadd.f32 %v6870_v29, %v6749_v47  ;;  %v6871_v51 = vld [vmem:[#allocation7_spill] sm:$0xff] }
 0x444   : > { %v1909_v7 = vadd.f32 %v3575_v50, %v1877_v63  ;;  %v1750_v38 = vpop.f32.mrb[35].mxu1  ;;  %vm6872_vm13 = vcmp.ne.f32.partialorder %v6871_v51, 0.0  ;;  %v6873_v63 = vld [vmem:[#allocation31_spill] sm:$0xff] }
 0x445   : > { %v1907_v0 = vadd.f32 %v1875_v2, %v1750_v38  ;;  %v5526_v28 = vsel %vm6872_vm13, %v1908_v23, 0.0  ;;  %vm6874_vm14 = vcmp.ne.f32.partialorder %v6873_v63, 0.0  ;;  %v6879_v23 = vld [vmem:[#allocation8_spill] sm:$0xff] }
 0x446   : > { %vm6880_vm5 = vcmp.ne.f32.partialorder %v6879_v23, 0.0 }
 0x449   : > { %v3578_v49 = vpop.f32.mrb[36].mxu1 }
 0x44a   : > { %v1912_v46 = vadd.f32 %v3578_v49, %v1880_v57  ;;  %v1763_v59 = vpop.f32.mrb[37].mxu1  ;;  %v6875_v57 = vld [vmem:[#allocation5_spill] sm:$0xff] }
 0x44b   : > { %v1910_v18 = vadd.f32 %v1878_v27, %v1763_v59  ;;  %v3579_v43 = vpop.f32.mrb[38].mxu1  ;;  %vm6876_vm15 = vcmp.ne.f32.partialorder %v6875_v57, 0.0  ;;  %v6877_v27 = vld [vmem:[#allocation29_spill] sm:$0xff]  ;;  %v6911_v57 = vld [vmem:[#allocation11_spill] sm:$0xff] }
 0x44c   : > { %v1913_v56 = vadd.f32 %v3579_v43, %v1881_v14  ;;  %v1766_v33 = vpop.f32.mrb[39].mxu1  ;;  %v5534_v49 = vsel %vm6876_vm15, %v1906_v26, 0.0  ;;  %vm6878_vm0 = vcmp.ne.f32.partialorder %v6877_v27, 0.0  ;;  %v5544_v14 = vsel %vm6880_vm5, %v1909_v7, 0.0  ;;  %v6883_v26 = vld [vmem:[#allocation6_spill] sm:$0xff] }
 0x44d   : > { %v1911_v30 = vadd.f32 %v1879_v16, %v1766_v33  ;;  %vm6884_vm11 = vcmp.ne.f32.partialorder %v6883_v26, 0.0 }
 0x44e   : > { %v5554_v33 = vsel %vm6884_vm11, %v1907_v0, 0.0 }
 0x451   : > { %v3582_v25 = vpop.f32.mrb[40].mxu1 }
 0x452   : > { %v1916_v8 = vadd.f32 %v3582_v25, %v1884_v40  ;;  %v1779_v19 = vpop.f32.mrb[41].mxu1  ;;  %v6885_v40 = vld [vmem:[#allocation30_spill] sm:$0xff] }
 0x453   : > { %v1914_v3 = vadd.f32 %v1882_v5, %v1779_v19  ;;  %v3583_v10 = vpop.f32.mrb[42].mxu1  ;;  %vm6886_vm3 = vcmp.ne.f32.partialorder %v6885_v40, 0.0  ;;  %v1888_v5 = vadd.f32 %v6887_v42, %v4974_v39  ;;  %v6888_v19 = vld [vmem:[#allocation86_spill] sm:$0xff]  ;;  %v5574_v40 = vsel %vm362_vm9, %v1912_v46, 0.0 }
 0x454   : > { %v5530_v50 = vsel %vm6874_vm14, %v1916_v8, 0.0  ;;  %v1917_v2 = vadd.f32 %v3583_v10, %v1885_v6  ;;  %v1782_v38 = vpop.f32.mrb[43].mxu1  ;;  %v1886_v54 = vadd.f32 %v6888_v19, %v6751_v31  ;;  %v6906_v46 = vld [vmem:[#allocation74_spill] sm:$0xff]  ;;  %vm6912_vm14 = vcmp.ne.f32.partialorder %v6911_v57, 0.0 }
 0x455   : > { %v1972_v21 = vadd.f32 %v5530_v50, %v5526_v28  ;;  %v5540_v59 = vsel %vm6878_vm0, %v1914_v3, 0.0  ;;  %v1915_v44 = vadd.f32 %v1883_v61, %v1782_v38  ;;  %v6889_v3 = vld [vmem:[#allocation70_spill] sm:$0xff]  ;;  %v1893_v26 = vadd.f32 %v6906_v46, %v6747_v45 }
 0x456   : > { %v1970_v43 = vadd.f32 %v5540_v59, %v5534_v49  ;;  %v5550_v16 = vsel %vm6882_vm8, %v1917_v2, 0.0  ;;  %v1889_v10 = vadd.f32 %v6889_v3, %v5057_v9  ;;  %v6890_v2 = vld [vmem:[#allocation64_spill] sm:$0xff] }
 0x457   : > { %v1973_v1 = vadd.f32 %v5550_v16, %v5544_v14  ;;  %v5560_v25 = vsel %vm6886_vm3, %v1915_v44, 0.0  ;;  %v1887_v38 = vadd.f32 %v6890_v2, %v6753_v41  ;;  %v5592_v44 = vsel %vm363_vm6, %v1913_v56, 0.0 }
 0x458   : > { %v1971_v7 = vadd.f32 %v5560_v25, %v5554_v33 }
 0x459   : > { %v3586_v8 = vpop.f32.mrb[44].mxu1 }
 0x45a   : > { %v1920_v6 = vadd.f32 %v3586_v8, %v1888_v5  ;;  %v1795_v0 = vpop.f32.mrb[45].mxu1  ;;  %v6894_v5 = vld [vmem:[#allocation9_spill] sm:$0xff] }
 0x45b   : > { %v1918_v29 = vadd.f32 %v1886_v54, %v1795_v0  ;;  %v3587_v61 = vpop.f32.mrb[46].mxu1  ;;  %vm6895_vm4 = vcmp.ne.f32.partialorder %v6894_v5, 0.0  ;;  %v6896_v0 = vld [vmem:[#allocation33_spill] sm:$0xff]  ;;  %v5602_v5 = vsel %vm361_vm1, %v1911_v30, 0.0 }
 0x45c   : > { %v5578_v42 = vsel %vm370_vm10, %v1920_v6, 0.0  ;;  %v1921_v48 = vadd.f32 %v3587_v61, %v1889_v10  ;;  %v1798_v19 = vpop.f32.mrb[47].mxu1  ;;  %v5582_v8 = vsel %vm6895_vm4, %v1910_v18, 0.0  ;;  %vm6897_vm2 = vcmp.ne.f32.partialorder %v6896_v0, 0.0  ;;  %v6903_v0 = vld [vmem:[#allocation34_spill] sm:$0xff] }
 0x45d   : > { %6893 = vst [vmem:[#allocation81_spill] sm:$0xff] %v5578_v42  ;;  %v1976_v54 = vadd.f32 %v5578_v42, %v5574_v40  ;;  %v5588_v3 = vsel %vm6897_vm2, %v1918_v29, 0.0  ;;  %v1919_v2 = vadd.f32 %v1887_v38, %v1798_v19  ;;  %vm6904_vm12 = vcmp.ne.f32.partialorder %v6903_v0, 0.0  ;;  %v6908_v42 = vld [vmem:[#allocation13_spill] sm:$0xff] }
 0x45e   : > { %6898 = vst [vmem:[#allocation99_spill] sm:$0xff] %v5588_v3  ;;  %v1974_v6 = vadd.f32 %v5588_v3, %v5582_v8  ;;  %v5598_v61 = vsel %vm371_vm7, %v1921_v48, 0.0  ;;  %v1892_v19 = vadd.f32 %v5326_v37, %v6743_v15  ;;  %v1890_v48 = vadd.f32 %v5331_v52, %v6745_v62 }
 0x45f   : > { %6901 = vst [vmem:[#allocation92_spill] sm:$0xff] %v5598_v61  ;;  %v1977_v29 = vadd.f32 %v5598_v61, %v5592_v44  ;;  %v5608_v38 = vsel %vm6904_vm12, %v1919_v2, 0.0  ;;  %v6907_v2 = vld [vmem:[#allocation80_spill] sm:$0xff]  ;;  %vm6909_vm13 = vcmp.ne.f32.partialorder %v6908_v42, 0.0  ;;  %v6923_v42 = vld [vmem:[#allocation17_spill] sm:$0xff] }
 0x460   : > { %6905 = vst [vmem:[#allocation89_spill] sm:$0xff] %v5608_v38  ;;  %v1975_v56 = vadd.f32 %v5608_v38, %v5602_v5  ;;  %v1891_v0 = vadd.f32 %v6907_v2, %v6749_v47  ;;  %v6917_v2 = vld [vmem:[#allocation12_spill] sm:$0xff]  ;;  %vm6924_vm5 = vcmp.ne.f32.partialorder %v6923_v42, 0.0 }
 0x461   : > { %v3590_v10 = vpop.f32.mrb[48].mxu1  ;;  %vm6918_vm0 = vcmp.ne.f32.partialorder %v6917_v2, 0.0  ;;  %v6922_v2 = vld [vmem:[#allocation94_spill] sm:$0xff] }
 0x462   : > { %v1924_v18 = vadd.f32 %v3590_v10, %v1892_v19  ;;  %v1811_v30 = vpop.f32.mrb[49].mxu1  ;;  %v6914_v19 = vld [vmem:[#allocation14_spill] sm:$0xff] }
 0x463   : > { %v1922_v61 = vadd.f32 %v1890_v48, %v1811_v30  ;;  %v3591_v3 = vpop.f32.mrb[50].mxu1  ;;  %vm6915_vm15 = vcmp.ne.f32.partialorder %v6914_v19, 0.0 }
 0x464   : > { %v5622_v38 = vsel %vm6909_vm13, %v1924_v18, 0.0  ;;  %v1925_v23 = vadd.f32 %v3591_v3, %v1893_v26  ;;  %v1814_v37 = vpop.f32.mrb[51].mxu1 }
 0x465   : > { %6910 = vst [vmem:[#allocation75_spill] sm:$0xff] %v5622_v38  ;;  %v1980_v27 = vadd.f32 %v1972_v21, %v5622_v38  ;;  %v5627_v52 = vsel %vm6912_vm14, %v1922_v61, 0.0  ;;  %v1923_v10 = vadd.f32 %v1891_v0, %v1814_v37  ;;  %v1896_v21 = vadd.f32 %v5354_v36, %v4974_v39  ;;  %v6920_v0 = vld [vmem:[#allocation62_spill] sm:$0xff] }
 0x466   : > { %6913 = vst [vmem:[#allocation96_spill] sm:$0xff] %v5627_v52  ;;  %v1978_v46 = vadd.f32 %v1970_v43, %v5627_v52  ;;  %v5632_v48 = vsel %vm6915_vm15, %v1925_v23, 0.0  ;;  %v1894_v61 = vadd.f32 %v6920_v0, %v6751_v31  ;;  %v6921_v23 = vld [vmem:[#allocation91_spill] sm:$0xff] }
 0x467   : > { %6916 = vst [vmem:[#allocation88_spill] sm:$0xff] %v5632_v48  ;;  %v1981_v30 = vadd.f32 %v1973_v1, %v5632_v48  ;;  %v5637_v18 = vsel %vm6918_vm0, %v1923_v10, 0.0  ;;  %v1897_v19 = vadd.f32 %v6921_v23, %v5057_v9  ;;  %v1895_v10 = vadd.f32 %v6922_v2, %v6753_v41  ;;  %v6926_v52 = vld [vmem:[#allocation15_spill] sm:$0xff]  ;;  %v6932_v23 = vld [vmem:[#allocation16_spill] sm:$0xff] }
 0x468   : > { %6919 = vst [vmem:[#allocation95_spill] sm:$0xff] %v5637_v18  ;;  %v1979_v26 = vadd.f32 %v1971_v7, %v5637_v18  ;;  %vm6927_vm8 = vcmp.ne.f32.partialorder %v6926_v52, 0.0  ;;  %vm6933_vm3 = vcmp.ne.f32.partialorder %v6932_v23, 0.0  ;;  %v6935_v23 = vld [vmem:[#allocation87_spill] sm:$0xff] }
 0x469   : > { %v3594_v3 = vpop.f32.mrb[52].mxu1 }
 0x46a   : > { %v1928_v43 = vadd.f32 %v3594_v3, %v1896_v21  ;;  %v1827_v37 = vpop.f32.mrb[53].mxu1 }
 0x46b   : > { %v1926_v57 = vadd.f32 %v1894_v61, %v1827_v37  ;;  %v3595_v1 = vpop.f32.mrb[54].mxu1  ;;  %v6929_v61 = vld [vmem:[#allocation18_spill] sm:$0xff] }
 0x46c   : > { %v5650_v7 = vsel %vm6924_vm5, %v1928_v43, 0.0  ;;  %v1929_v18 = vadd.f32 %v3595_v1, %v1897_v19  ;;  %v1830_v36 = vpop.f32.mrb[55].mxu1  ;;  %vm6930_vm11 = vcmp.ne.f32.partialorder %v6929_v61, 0.0  ;;  %v1898_v1 = vadd.f32 %v5387_v17, %v6745_v62  ;;  %v6936_v61 = vld [vmem:[#allocation21_spill] sm:$0xff] }
 0x46d   : > { %6925 = vst [vmem:[#allocation41_spill] sm:$0xff] %v5650_v7  ;;  %v1984_v48 = vadd.f32 %v1976_v54, %v5650_v7  ;;  %v5655_v21 = vsel %vm6927_vm8, %v1926_v57, 0.0  ;;  %v1927_v3 = vadd.f32 %v1895_v10, %v1830_v36  ;;  %v1900_v54 = vadd.f32 %v5382_v34, %v6743_v15 }
 0x46e   : > { %6928 = vst [vmem:[#allocation37_spill] sm:$0xff] %v5655_v21  ;;  %v1982_v0 = vadd.f32 %v1974_v6, %v5655_v21  ;;  %v5660_v37 = vsel %vm6930_vm11, %v1929_v18, 0.0  ;;  %v1901_v18 = vadd.f32 %v5392_v13, %v6747_v45  ;;  %vm6937_vm4 = vcmp.ne.f32.partialorder %v6936_v61, 0.0 }
 0x46f   : > { %6931 = vst [vmem:[#allocation76_spill] sm:$0xff] %v5660_v37  ;;  %v1985_v2 = vadd.f32 %v1977_v29, %v5660_v37  ;;  %v5665_v43 = vsel %vm6933_vm3, %v1927_v3, 0.0  ;;  %v1899_v3 = vadd.f32 %v6935_v23, %v6749_v47  ;;  %vm6976_vm8 = vcmask 392192  }
 0x470   : > { %6934 = vst [vmem:[#allocation49_spill] sm:$0xff] %v5665_v43  ;;  %v1983_v19 = vadd.f32 %v1975_v56, %v5665_v43  ;;  %v6939_v43 = vld [vmem:[#allocation19_spill] sm:$0xff]  ;;  %vm6977_vm11 = vmmov %vm6976_vm8 }
 0x471   : > { %v3598_v57 = vpop.f32.mrb[56].mxu1  ;;  %vm6940_vm2 = vcmp.ne.f32.partialorder %v6939_v43, 0.0  ;;  %vm6986_vm3 = vmmov %vm6976_vm8 }
 0x472   : > { %v1932_v6 = vadd.f32 %v3598_v57, %v1900_v54  ;;  %v1843_v10 = vpop.f32.mrb[57].mxu1  ;;  %v6942_v57 = vld [vmem:[#allocation24_spill] sm:$0xff] }
 0x473   : > { %v1930_v36 = vadd.f32 %v1898_v1, %v1843_v10  ;;  %v3599_v29 = vpop.f32.mrb[58].mxu1  ;;  %vm6943_vm12 = vcmp.ne.f32.partialorder %v6942_v57, 0.0 }
 0x474   : > { %v5678_v56 = vsel %vm6937_vm4, %v1932_v6, 0.0  ;;  %v1933_v52 = vadd.f32 %v3599_v29, %v1901_v18  ;;  %v1846_v34 = vpop.f32.mrb[59].mxu1  ;;  %v6945_v6 = vld [vmem:[#allocation20_spill] sm:$0xff]  ;;  %vm6987_vm4 = vmmov %vm6986_vm3 }
 0x475   : > { %6938 = vst [vmem:[#allocation90_spill] sm:$0xff] %v5678_v56  ;;  %v1988_v42 = vadd.f32 %v1980_v27, %v5678_v56  ;;  %v5683_v17 = vsel %vm6940_vm2, %v1930_v36, 0.0  ;;  %v1931_v54 = vadd.f32 %v1899_v3, %v1846_v34  ;;  %vm6946_vm13 = vcmp.ne.f32.partialorder %v6945_v6, 0.0  ;;  %v6948_v6 = vld [vmem:[#allocation71_spill] sm:$0xff]  ;;  %vm6988_vm2 = vmmov %vm6986_vm3 }
 0x476   : > { %6941 = vst [vmem:[#allocation97_spill] sm:$0xff] %v5683_v17  ;;  %v1986_v13 = vadd.f32 %v1978_v46, %v5683_v17  ;;  %v5688_v1 = vsel %vm6943_vm12, %v1933_v52, 0.0  ;;  %v1904_v36 = vadd.f32 %v5410_v35, %v4974_v39  ;;  %v1902_v52 = vadd.f32 %v5415_v53, %v6751_v31  ;;  %vm6989_vm12 = vmmov %vm6988_vm2 }
 0x477   : > { %6944 = vst [vmem:[#allocation79_spill] sm:$0xff] %v5688_v1  ;;  %v1996_v23 = vsub.f32 0.0, %v1988_v42  ;;  %v1989_v10 = vadd.f32 %v1981_v30, %v5688_v1  ;;  %v5693_v18 = vsel %vm6946_vm13, %v1931_v54, 0.0  ;;  %v1905_v54 = vadd.f32 %v6948_v6, %v5057_v9  ;;  %vm6990_vm13 = vmmov %vm6988_vm2 }
 0x478   : > { %6947 = vst [vmem:[#allocation93_spill] sm:$0xff] %v5693_v18  ;;  %v1994_v29 = vsub.f32 0.0, %v1986_v13  ;;  %v1987_v27 = vadd.f32 %v1979_v26, %v5693_v18  ;;  %v6949_v18 = vld [vmem:[#allocation53_spill] sm:$0xff] }
 0x479   : > { %v2006_v3 = vmul.f32 1.442695, %v1996_v23  ;;  %v1997_v34 = vsub.f32 0.0, %v1989_v10  ;;  %v3602_v46 = vpop.f32.mrb[60].mxu1  ;;  %v1903_v35 = vadd.f32 %v6949_v18, %v6753_v41  ;;  %v6950_v10 = vld [vmem:[#allocation27_spill] sm:$0xff]  ;;  %v6956_v18 = vld [vmem:[#allocation28_spill] sm:$0xff] }
 0x47a   : > { %v2002_v57 = vmul.f32 1.442695, %v1994_v29  ;;  %v1995_v42 = vsub.f32 0.0, %v1987_v27  ;;  %v1936_v43 = vadd.f32 %v3602_v46, %v1904_v36  ;;  %v1859_v30 = vpop.f32.mrb[61].mxu1  ;;  %vm6951_vm14 = vcmp.ne.f32.partialorder %v6950_v10, 0.0  ;;  %v6953_v36 = vld [vmem:[#allocation25_spill] sm:$0xff] }
 0x47b   : > { %3861 = vpow2.f32 %v2006_v3  ;;  %v2008_v13 = vmul.f32 1.442695, %v1997_v34  ;;  %v1934_v61 = vadd.f32 %v1902_v52, %v1859_v30  ;;  %v3603_v26 = vpop.f32.mrb[62].mxu1  ;;  %vm6954_vm15 = vcmp.ne.f32.partialorder %v6953_v36, 0.0  ;;  %v6959_v52 = vld [vmem:[#allocation26_spill] sm:$0xff]  ;;  %v6970_v10 = vld [vmem:[#allocation61_spill] sm:$0xff] }
 0x47c   : > { %3863 = vpow2.f32 %v2002_v57  ;;  %v2004_v23 = vmul.f32 1.442695, %v1995_v42  ;;  %v5706_v1 = vsel %vm6951_vm14, %v1936_v43, 0.0  ;;  %v1937_v53 = vadd.f32 %v3603_v26, %v1905_v54  ;;  %v1862_v29 = vpop.f32.mrb[63].mxu1  ;;  %v6969_v36 = vld [vmem:[#allocation42_spill] sm:$0xff]  ;;  %vm6991_vm14 = vmmov %vm6988_vm2 }
 0x47d   : > { %6952 = vst [vmem:[#allocation39_spill] sm:$0xff] %v5706_v1  ;;  %3865 = vpow2.f32 %v2008_v13  ;;  %v1992_v27 = vadd.f32 %v1984_v48, %v5706_v1  ;;  %v5711_v6 = vsel %vm6954_vm15, %v1934_v61, 0.0  ;;  %v1935_v3 = vadd.f32 %v1903_v35, %v1862_v29  ;;  %v6974_v1 = vld [vmem:[#allocation73_spill] sm:$0xff]  ;;  %vm6992_vm15 = vmmov %vm6988_vm2 }
 0x47e   : > { %6955 = vst [vmem:[#allocation44_spill] sm:$0xff] %v5711_v6  ;;  %3867 = vpow2.f32 %v2004_v23  ;;  %v1990_v34 = vadd.f32 %v1982_v0, %v5711_v6  ;;  %vm6957_vm0 = vcmp.ne.f32.partialorder %v6956_v18, 0.0  ;;  %vm6960_vm5 = vcmp.ne.f32.partialorder %v6959_v52, 0.0  ;;  %v6966_v52 = vld [vmem:[#allocation67_spill] sm:$0xff]  ;;  %v6967_v18 = vld [vmem:[#allocation68_spill] sm:$0xff] }
 0x47f   : > { %v5716_v57 = vsel %vm6957_vm0, %v1937_v53, 0.0  ;;  %v2000_v46 = vsub.f32 0.0, %v1992_v27  ;;  %v5721_v42 = vsel %vm6960_vm5, %v1935_v3, 0.0  ;;  %v6973_v6 = vld [vmem:[#allocation72_spill] sm:$0xff]  ;;  %vm6993_vm0 = vmmov %vm6988_vm2 }
 0x480   : > { %6958 = vst [vmem:[#allocation78_spill] sm:$0xff] %v5716_v57  ;;  %v1993_v43 = vadd.f32 %v1985_v2, %v5716_v57  ;;  %6961 = vst [vmem:[#allocation65_spill] sm:$0xff] %v5721_v42  ;;  %v1998_v48 = vsub.f32 0.0, %v1990_v34  ;;  %v1991_v30 = vadd.f32 %v1983_v19, %v5721_v42  ;;  %v6971_v42 = vld [vmem:[#allocation43_spill] sm:$0xff]  ;;  %v6972_v57 = vld [vmem:[#allocation85_spill] sm:$0xff] }
 0x481   : > { %v2014_v61 = vmul.f32 1.442695, %v2000_v46  ;;  %vm6994_vm5 = vmmov %vm6993_vm0 }
 0x482   : > { %v2001_v54 = vsub.f32 0.0, %v1993_v43  ;;  %v2010_v13 = vmul.f32 1.442695, %v1998_v48  ;;  %v1999_v26 = vsub.f32 0.0, %v1991_v30 }
 0x483   : > { %3869 = vpow2.f32 %v2014_v61 }
 0x484   : > { %v2016_v0 = vmul.f32 1.442695, %v2001_v54  ;;  %3871 = vpow2.f32 %v2010_v13  ;;  %v2012_v35 = vmul.f32 1.442695, %v1999_v26 }
 0x485   : > { %v3862_v23 = vpop.eup %3861 }
 0x486   : > { %3873 = vpow2.f32 %v2016_v0  ;;  %v3864_v53 = vpop.eup %3863  ;;  %v2020_v29 = vadd.f32 1.0, %v3862_v23  ;;  %v6962_v23 = vld [vmem:[#allocation82_spill] sm:$0xff] }
 0x487   : > { %3875 = vpow2.f32 %v2012_v35  ;;  %v3866_v2 = vpop.eup %3865  ;;  %v2018_v27 = vadd.f32 1.0, %v3864_v53 }
 0x488   : > { %v3868_v3 = vpop.eup %3867  ;;  %3877 = vrcp.f32 %v2020_v29  ;;  %v2021_v34 = vadd.f32 1.0, %v3866_v2  ;;  %v6963_v29 = vld [vmem:[#allocation83_spill] sm:$0xff] }
 0x489   : > { %3879 = vrcp.f32 %v2018_v27  ;;  %v2019_v19 = vadd.f32 1.0, %v3868_v3  ;;  %v6964_v27 = vld [vmem:[#allocation84_spill] sm:$0xff] }
 0x48a   : > { %3881 = vrcp.f32 %v2021_v34 }
 0x48b   : > { %3883 = vrcp.f32 %v2019_v19  ;;  %v6965_v19 = vld [vmem:[#allocation66_spill] sm:$0xff] }
 0x48d   : > { %v3870_v46 = vpop.eup %3869 }
 0x48e   : > { %v3872_v43 = vpop.eup %3871  ;;  %v2024_v48 = vadd.f32 1.0, %v3870_v46 }
 0x48f   : > { %v2022_v61 = vadd.f32 1.0, %v3872_v43 }
 0x490   : > { %v3874_v30 = vpop.eup %3873  ;;  %3885 = vrcp.f32 %v2024_v48 }
 0x491   : > { %v3876_v54 = vpop.eup %3875  ;;  %v2025_v13 = vadd.f32 1.0, %v3874_v30  ;;  %3887 = vrcp.f32 %v2022_v61  ;;  %v6968_v30 = vld [vmem:[#allocation69_spill] sm:$0xff] }
 0x492   : > { %v2023_v26 = vadd.f32 1.0, %v3876_v54  ;;  %v3878_v0 = vpop.eup %3877 }
 0x493   : > { %3889 = vrcp.f32 %v2025_v13  ;;  %v3880_v35 = vpop.eup %3879  ;;  %v2036_v53 = vmul.f32 %v3878_v0, %v6962_v23  ;;  %v2044_v2 = vmul.f32 %v3878_v0, %v6963_v29  ;;  %v2052_v3 = vmul.f32 %v3878_v0, %v6964_v27 }
 0x494   : > { %3891 = vrcp.f32 %v2023_v26  ;;  %v3882_v34 = vpop.eup %3881  ;;  %v2034_v46 = vmul.f32 %v3880_v35, %v6965_v19  ;;  %v2042_v43 = vmul.f32 %v3880_v35, %v6966_v52  ;;  %v2050_v48 = vmul.f32 %v3880_v35, %v6967_v18  ;;  %v6975_v19 = vld [vmem:[#allocation77_spill] sm:$0xff] }
 0x495   : > { %v2058_v61 = vmul.f32 %v3880_v35, %v6968_v30  ;;  %v3884_v54 = vpop.eup %3883  ;;  %v2037_v13 = vmul.f32 %v3882_v34, %v6969_v36  ;;  %v2045_v26 = vmul.f32 %v3882_v34, %v6970_v10  ;;  %v2053_v23 = vmul.f32 %v3882_v34, %v6971_v42 }
 0x496   : > { %v2060_v29 = vmul.f32 %v3878_v0, %v6972_v57  ;;  %v2035_v27 = vmul.f32 %v3884_v54, %v6973_v6  ;;  %v2043_v17 = vmul.f32 %v3884_v54, %v6974_v1  ;;  %v2051_v56 = vmul.f32 %v3884_v54, %v6975_v19 }
 0x497   : > { %v2059_v52 = vmul.f32 %v3884_v54, %v6845_v55  ;;  %v2067_v18 = vpack.c.bf16 %v2037_v13, %v2036_v53  ;;  %v2071_v37 = vpack.c.bf16 %v2045_v26, %v2044_v2  ;;  %v2075_v35 = vpack.c.bf16 %v2053_v23, %v2052_v3  ;;  %v6985_v26 = vld [vmem:[#allocation51_spill] sm:$0xff] }
 0x498   : > { %v2061_v30 = vmul.f32 %v3882_v34, %v4899_v12  ;;  %v2066_v36 = vpack.c.bf16 %v2035_v27, %v2034_v46  ;;  %v2070_v21 = vpack.c.bf16 %v2043_v17, %v2042_v43  ;;  %v2074_v10 = vpack.c.bf16 %v2051_v56, %v2050_v48  ;;  %v6978_v27 = vld [vmem:[#allocation63_spill] sm:$0xff]  ;;  %v6981_v34 = vld [vmem:[#allocation38_spill] sm:$0xff] }
 0x499   : > { %v2078_v7 = vpack.c.bf16 %v2059_v52, %v2058_v61  ;;  %v6979_v56 = vld [vmem:[#allocation47_spill] sm:$0xff]  ;;  %v6982_v43 = vld [vmem:[#allocation50_spill] sm:$0xff]  ;;  %v6984_v61 = vld [vmem:[#allocation100_spill] sm:$0xff] }
 0x49a   : > { %v2079_v42 = vpack.c.bf16 %v2061_v30, %v2060_v29  ;;  %v3886_v38 = vpop.eup %3885  ;;  %3610 = vmatprep.mubr.msk.bf16.mxu1 %vm6976_vm8, %v2066_v36  ;;  %v6980_v29 = vld [vmem:[#allocation52_spill] sm:$0xff]  ;;  %v6983_v48 = vld [vmem:[#allocation98_spill] sm:$0xff]  ;;  %vm6995_vm8 = vmmov %vm6993_vm0 }
 0x49b   : > { %v3888_v0 = vpop.eup %3887  ;;  %3611 = vmatmul.mubr.msk.bf16.vlgmr.msra.gmra.mrb[64].mxu1 %vm6977_vm11, %v2067_v18  ;;  %v2040_v19 = vmul.f32 %v3886_v38, %v5001_v24  ;;  %v2048_v54 = vmul.f32 %v3886_v38, %v5006_v20  ;;  %v2056_v53 = vmul.f32 %v3886_v38, %v5011_v11  ;;  %v2064_v23 = vmul.f32 %v3886_v38, %v5084_v4  ;;  %vm6996_vm11 = vmmov %vm6993_vm0 }
 0x49c   : > { %v2038_v17 = vmul.f32 %v3888_v0, %v6978_v27  ;;  %v2046_v52 = vmul.f32 %v3888_v0, %v6979_v56  ;;  %v2054_v3 = vmul.f32 %v3888_v0, %v6980_v29  ;;  %v2062_v36 = vmul.f32 %v3888_v0, %v6981_v34 }
 0x49d   : > { %v3890_v2 = vpop.eup %3889 }
 0x49e   : > { %v3892_v46 = vpop.eup %3891  ;;  %v2041_v18 = vmul.f32 %v3890_v2, %v6982_v43  ;;  %v2049_v30 = vmul.f32 %v3890_v2, %v6983_v48  ;;  %v2057_v13 = vmul.f32 %v3890_v2, %v6984_v61  ;;  %v2065_v11 = vmul.f32 %v3890_v2, %v6985_v26 }
 0x49f   : > { %v2039_v38 = vmul.f32 %v3892_v46, %v6848_v32  ;;  %v2047_v4 = vmul.f32 %v3892_v46, %v6849_v22  ;;  %v2055_v27 = vmul.f32 %v3892_v46, %v6850_v58  ;;  %v2063_v56 = vmul.f32 %v3892_v46, %v4982_v60 }
 0x4a0   : > { %v2069_v29 = vpack.c.bf16 %v2041_v18, %v2040_v19  ;;  %v2073_v20 = vpack.c.bf16 %v2049_v30, %v2048_v54  ;;  %v2077_v0 = vpack.c.bf16 %v2057_v13, %v2056_v53  ;;  %v2081_v34 = vpack.c.bf16 %v2065_v11, %v2064_v23  ;;  %v7004_v13 = vld [vmem:[#allocation29_spill] sm:$0xff] }
 0x4a1   : > { %v2068_v24 = vpack.c.bf16 %v2039_v38, %v2038_v17  ;;  %v2072_v43 = vpack.c.bf16 %v2047_v4, %v2046_v52  ;;  %v2076_v12 = vpack.c.bf16 %v2055_v27, %v2054_v3  ;;  %v2080_v48 = vpack.c.bf16 %v2063_v56, %v2062_v36 }
 0x4a2   : > { %v2293_v11 = vadd.f32 %v5526_v28, %v6743_v15  ;;  %v2291_v4 = vadd.f32 %v5534_v49, %v6745_v62  ;;  %v2297_v28 = vadd.f32 %v5574_v40, %v4974_v39  ;;  %v2295_v49 = vadd.f32 %v5582_v8, %v6751_v31 }
 0x4a3   : > { %3614 = vmatprep.mubr.msk.bf16.mxu1 %vm6986_vm3, %v2068_v24  ;;  %vm6997_vm3 = vmmov %vm6993_vm0  ;;  %v2301_v40 = vadd.f32 %v5530_v50, %v6743_v15  ;;  %v2299_v8 = vadd.f32 %v5540_v59, %v6745_v62 }
 0x4a4   : > { %3615 = vmatmul.mubr.msk.bf16.gmra.mrb[68].mxu1 %vm6987_vm4, %v2069_v29  ;;  %vm6998_vm4 = vmmov %vm6993_vm0 }
 0x4a5   : > { %3618 = vmatprep.mubr.msk.bf16.mxu1 %vm6988_vm2, %v2070_v21  ;;  %vm6999_vm2 = vmmov %vm6993_vm0 }
 0x4ac   : > { %3619 = vmatmul.mubr.msk.bf16.gmra.mrb[72].mxu1 %vm6989_vm12, %v2071_v37  ;;  %vm7000_vm12 = vcmp.ne.f32.partialorder %v6871_v51, 0.0 }
 0x4ad   : > { %3622 = vmatprep.mubr.msk.bf16.mxu1 %vm6990_vm13, %v2072_v43  ;;  %vm7001_vm13 = vcmp.ne.f32.partialorder %v6873_v63, 0.0 }
 0x4b4   : > { %3623 = vmatmul.mubr.msk.bf16.gmra.mrb[76].mxu1 %vm6991_vm14, %v2073_v20 }
 0x4b5   : > { %3626 = vmatprep.mubr.msk.bf16.mxu1 %vm6992_vm15, %v2074_v10  ;;  %v2292_v10 = vadd.f32 %v5554_v33, %v6749_v47  ;;  %v2296_v33 = vadd.f32 %v5602_v5, %v6753_v41  ;;  %v2300_v5 = vadd.f32 %v5560_v25, %v6749_v47  ;;  %vm7005_vm15 = vcmp.ne.f32.partialorder %v7004_v13, 0.0 }
 0x4bc   : > { %3627 = vmatmul.mubr.msk.bf16.gmra.mrb[80].mxu1 %vm6993_vm0, %v2075_v35 }
 0x4bd   : > { %3630 = vmatprep.mubr.msk.bf16.mxu1 %vm6994_vm5, %v2076_v12  ;;  %v2294_v12 = vadd.f32 %v5544_v14, %v6747_v45  ;;  %v2298_v14 = vadd.f32 %v5592_v44, %v5057_v9  ;;  %v2302_v44 = vadd.f32 %v5550_v16, %v6747_v45 }
 0x4c4   : > { %3631 = vmatmul.mubr.msk.bf16.gmra.mrb[84].mxu1 %vm6995_vm8, %v2077_v0  ;;  %v7006_v0 = vld [vmem:[#allocation8_spill] sm:$0xff] }
 0x4c5   : > { %3634 = vmatprep.mubr.msk.bf16.mxu1 %vm6996_vm11, %v2078_v7  ;;  %vm7007_vm0 = vcmp.ne.f32.partialorder %v7006_v0, 0.0 }
 0x4cc   : > { %3635 = vmatmul.mubr.msk.bf16.gmra.mrb[88].mxu1 %vm6997_vm3, %v2079_v42 }
 0x4cd   : > { %3638 = vmatprep.mubr.msk.bf16.mxu1 %vm6998_vm4, %v2080_v48  ;;  %v7002_v48 = vld [vmem:[#allocation5_spill] sm:$0xff] }
 0x4ce   : > { %vm7003_vm14 = vcmp.ne.f32.partialorder %v7002_v48, 0.0 }
 0x4d4   : > { %3639 = vmatmul.mubr.msk.bf16.gmra.mrb[92].mxu1 %vm6999_vm2, %v2081_v34 }
 0x56e   : > { %v3612_v20 = vpop.f32.mrb[64].mxu1 }
 0x56f   : > { %v2325_v24 = vadd.f32 %v3612_v20, %v2293_v11  ;;  %v2164_v21 = vpop.f32.mrb[65].mxu1 }
 0x570   : > { %v2323_v37 = vadd.f32 %v2291_v4, %v2164_v21  ;;  %v3613_v7 = vpop.f32.mrb[66].mxu1  ;;  %v7008_v4 = vld [vmem:[#allocation32_spill] sm:$0xff]  ;;  %v7010_v21 = vld [vmem:[#allocation6_spill] sm:$0xff] }
 0x571   : > { %v2326_v42 = vadd.f32 %v3613_v7, %v2294_v12  ;;  %v2167_v19 = vpop.f32.mrb[67].mxu1  ;;  %v5798_v43 = vsel %vm7000_vm12, %v2325_v24, 0.0  ;;  %vm7009_vm5 = vcmp.ne.f32.partialorder %v7008_v4, 0.0  ;;  %vm7011_vm8 = vcmp.ne.f32.partialorder %v7010_v21, 0.0  ;;  %v7012_v7 = vld [vmem:[#allocation30_spill] sm:$0xff] }
 0x572   : > { %v2324_v35 = vadd.f32 %v2292_v10, %v2167_v19  ;;  %v5806_v30 = vsel %vm7003_vm14, %v2323_v37, 0.0  ;;  %vm7013_vm11 = vcmp.ne.f32.partialorder %v7012_v7, 0.0  ;;  %v7014_v19 = vld [vmem:[#allocation81_spill] sm:$0xff] }
 0x573   : > { %v5816_v11 = vsel %vm7007_vm0, %v2326_v42, 0.0 }
 0x574   : > { %v5826_v12 = vsel %vm7011_vm8, %v2324_v35, 0.0 }
 0x577   : > { %v3616_v54 = vpop.f32.mrb[68].mxu1 }
 0x578   : > { %v2329_v53 = vadd.f32 %v3616_v54, %v2297_v28  ;;  %v2180_v23 = vpop.f32.mrb[69].mxu1  ;;  %v2305_v28 = vadd.f32 %v7014_v19, %v4974_v39  ;;  %v7023_v19 = vld [vmem:[#allocation33_spill] sm:$0xff] }
 0x579   : > { %v2327_v2 = vadd.f32 %v2295_v49, %v2180_v23  ;;  %v3617_v27 = vpop.f32.mrb[70].mxu1  ;;  %v7015_v49 = vld [vmem:[#allocation99_spill] sm:$0xff]  ;;  %vm7024_vm4 = vcmp.ne.f32.partialorder %v7023_v19, 0.0 }
 0x57a   : > { %v2330_v17 = vadd.f32 %v3617_v27, %v2298_v14  ;;  %v2183_v56 = vpop.f32.mrb[71].mxu1  ;;  %v2303_v23 = vadd.f32 %v7015_v49, %v6751_v31  ;;  %v7016_v27 = vld [vmem:[#allocation92_spill] sm:$0xff] }
 0x57b   : > { %v2328_v52 = vadd.f32 %v2296_v33, %v2183_v56  ;;  %v2306_v33 = vadd.f32 %v7016_v27, %v5057_v9 }
 0x57c   : > { %v5864_v49 = vsel %vm363_vm6, %v2330_v17, 0.0 }
 0x57d   : > { %v5874_v27 = vsel %vm361_vm1, %v2328_v52, 0.0 }
 0x57f   : > { %v3620_v29 = vpop.f32.mrb[72].mxu1 }
 0x580   : > { %v2333_v3 = vadd.f32 %v3620_v29, %v2301_v40  ;;  %v2196_v34 = vpop.f32.mrb[73].mxu1  ;;  %v7017_v29 = vld [vmem:[#allocation89_spill] sm:$0xff] }
 0x581   : > { %v2331_v36 = vadd.f32 %v2299_v8, %v2196_v34  ;;  %v3621_v46 = vpop.f32.mrb[74].mxu1  ;;  %v2304_v8 = vadd.f32 %v7017_v29, %v6753_v41  ;;  %v5846_v34 = vsel %vm362_vm9, %v2329_v53, 0.0  ;;  %v7033_v29 = vld [vmem:[#allocation75_spill] sm:$0xff]  ;;  %v7035_v53 = vld [vmem:[#allocation88_spill] sm:$0xff] }
 0x582   : > { %v5802_v50 = vsel %vm7001_vm13, %v2333_v3, 0.0  ;;  %v2334_v18 = vadd.f32 %v3621_v46, %v2302_v44  ;;  %v2199_v59 = vpop.f32.mrb[75].mxu1  ;;  %v2310_v19 = vadd.f32 %v7035_v53, %v6747_v45  ;;  %v7037_v3 = vld [vmem:[#allocation13_spill] sm:$0xff] }
 0x583   : > { %v2389_v16 = vadd.f32 %v5802_v50, %v5798_v43  ;;  %v5812_v25 = vsel %vm7005_vm15, %v2331_v36, 0.0  ;;  %v2332_v38 = vadd.f32 %v2300_v5, %v2199_v59  ;;  %vm7038_vm12 = vcmp.ne.f32.partialorder %v7037_v3, 0.0 }
 0x584   : > { %v2387_v20 = vadd.f32 %v5812_v25, %v5806_v30  ;;  %v5822_v24 = vsel %vm7009_vm5, %v2334_v18, 0.0  ;;  %v7021_v18 = vld [vmem:[#allocation9_spill] sm:$0xff] }
 0x585   : > { %v2390_v37 = vadd.f32 %v5822_v24, %v5816_v11  ;;  %v5832_v10 = vsel %vm7013_vm11, %v2332_v38, 0.0  ;;  %vm7022_vm3 = vcmp.ne.f32.partialorder %v7021_v18, 0.0 }
 0x586   : > { %v2388_v42 = vadd.f32 %v5832_v10, %v5826_v12  ;;  %v5854_v59 = vsel %vm7022_vm3, %v2327_v2, 0.0 }
 0x587   : > { %v3624_v54 = vpop.f32.mrb[76].mxu1 }
 0x588   : > { %v2337_v14 = vadd.f32 %v3624_v54, %v2305_v28  ;;  %v2212_v35 = vpop.f32.mrb[77].mxu1 }
 0x589   : > { %v2335_v56 = vadd.f32 %v2303_v23, %v2212_v35  ;;  %v3625_v40 = vpop.f32.mrb[78].mxu1 }
 0x58a   : > { %v5850_v36 = vsel %vm370_vm10, %v2337_v14, 0.0  ;;  %v2338_v46 = vadd.f32 %v3625_v40, %v2306_v33  ;;  %v2215_v5 = vpop.f32.mrb[79].mxu1 }
 0x58b   : > { %7020 = vst [vmem:[#allocation60_spill] sm:$0xff] %v5850_v36  ;;  %v2393_v38 = vadd.f32 %v5850_v36, %v5846_v34  ;;  %v5860_v28 = vsel %vm7024_vm4, %v2335_v56, 0.0  ;;  %v2336_v54 = vadd.f32 %v2304_v8, %v2215_v5  ;;  %v7030_v56 = vld [vmem:[#allocation34_spill] sm:$0xff]  ;;  %v2309_v8 = vadd.f32 %v7033_v29, %v6743_v15  ;;  %v7040_v36 = vld [vmem:[#allocation11_spill] sm:$0xff] }
 0x58c   : > { %7025 = vst [vmem:[#allocation55_spill] sm:$0xff] %v5860_v28  ;;  %v2391_v23 = vadd.f32 %v5860_v28, %v5854_v59  ;;  %v5870_v35 = vsel %vm371_vm7, %v2338_v46, 0.0  ;;  %vm7031_vm2 = vcmp.ne.f32.partialorder %v7030_v56, 0.0  ;;  %v7034_v46 = vld [vmem:[#allocation96_spill] sm:$0xff]  ;;  %vm7041_vm13 = vcmp.ne.f32.partialorder %v7040_v36, 0.0 }
 0x58d   : > { %7028 = vst [vmem:[#allocation56_spill] sm:$0xff] %v5870_v35  ;;  %v2394_v33 = vadd.f32 %v5870_v35, %v5864_v49  ;;  %v5880_v40 = vsel %vm7031_vm2, %v2336_v54, 0.0  ;;  %v2307_v14 = vadd.f32 %v7034_v46, %v6745_v62  ;;  %v7036_v54 = vld [vmem:[#allocation95_spill] sm:$0xff] }
 0x58e   : > { %7032 = vst [vmem:[#allocation57_spill] sm:$0xff] %v5880_v40  ;;  %v2392_v17 = vadd.f32 %v5880_v40, %v5874_v27  ;;  %v2308_v56 = vadd.f32 %v7036_v54, %v6749_v47  ;;  %v7046_v54 = vld [vmem:[#allocation12_spill] sm:$0xff] }
 0x58f   : > { %v3628_v5 = vpop.f32.mrb[80].mxu1  ;;  %vm7047_vm15 = vcmp.ne.f32.partialorder %v7046_v54, 0.0  ;;  %v7052_v54 = vld [vmem:[#allocation49_spill] sm:$0xff] }
 0x590   : > { %v2341_v2 = vadd.f32 %v3628_v5, %v2309_v8  ;;  %v2228_v52 = vpop.f32.mrb[81].mxu1 }
 0x591   : > { %v2339_v18 = vadd.f32 %v2307_v14, %v2228_v52  ;;  %v3629_v44 = vpop.f32.mrb[82].mxu1  ;;  %v7043_v14 = vld [vmem:[#allocation14_spill] sm:$0xff] }
 0x592   : > { %v5894_v40 = vsel %vm7038_vm12, %v2341_v2, 0.0  ;;  %v2342_v35 = vadd.f32 %v3629_v44, %v2310_v19  ;;  %v2231_v29 = vpop.f32.mrb[83].mxu1  ;;  %vm7044_vm14 = vcmp.ne.f32.partialorder %v7043_v14, 0.0 }
 0x593   : > { %7039 = vst [vmem:[#allocation58_spill] sm:$0xff] %v5894_v40  ;;  %v2397_v28 = vadd.f32 %v2389_v16, %v5894_v40  ;;  %v5899_v8 = vsel %vm7041_vm13, %v2339_v18, 0.0  ;;  %v2340_v5 = vadd.f32 %v2308_v56, %v2231_v29  ;;  %v7049_v16 = vld [vmem:[#allocation41_spill] sm:$0xff]  ;;  %v7056_v40 = vld [vmem:[#allocation15_spill] sm:$0xff] }
 0x594   : > { %7042 = vst [vmem:[#allocation7_spill] sm:$0xff] %v5899_v8  ;;  %v2395_v53 = vadd.f32 %v2387_v20, %v5899_v8  ;;  %v5904_v46 = vsel %vm7044_vm14, %v2342_v35, 0.0  ;;  %v2313_v19 = vadd.f32 %v7049_v16, %v4974_v39  ;;  %v7050_v56 = vld [vmem:[#allocation37_spill] sm:$0xff]  ;;  %v7051_v35 = vld [vmem:[#allocation76_spill] sm:$0xff]  ;;  %vm7057_vm5 = vcmp.ne.f32.partialorder %v7056_v40, 0.0 }
 0x595   : > { %7045 = vst [vmem:[#allocation31_spill] sm:$0xff] %v5904_v46  ;;  %v2398_v52 = vadd.f32 %v2390_v37, %v5904_v46  ;;  %v5909_v2 = vsel %vm7047_vm15, %v2340_v5, 0.0  ;;  %v2311_v29 = vadd.f32 %v7050_v56, %v6751_v31  ;;  %v2314_v14 = vadd.f32 %v7051_v35, %v5057_v9  ;;  %v7053_v46 = vld [vmem:[#allocation17_spill] sm:$0xff]  ;;  %v7062_v35 = vld [vmem:[#allocation16_spill] sm:$0xff] }
 0x596   : > { %7048 = vst [vmem:[#allocation59_spill] sm:$0xff] %v5909_v2  ;;  %v2396_v44 = vadd.f32 %v2388_v42, %v5909_v2  ;;  %v2312_v5 = vadd.f32 %v7052_v54, %v6753_v41  ;;  %vm7054_vm0 = vcmp.ne.f32.partialorder %v7053_v46, 0.0  ;;  %vm7063_vm11 = vcmp.ne.f32.partialorder %v7062_v35, 0.0  ;;  %v7068_v35 = vld [vmem:[#allocation93_spill] sm:$0xff] }
 0x597   : > { %v3632_v18 = vpop.f32.mrb[84].mxu1 }
 0x598   : > { %v2345_v20 = vadd.f32 %v3632_v18, %v2313_v19  ;;  %v2244_v36 = vpop.f32.mrb[85].mxu1 }
 0x599   : > { %v2343_v3 = vadd.f32 %v2311_v29, %v2244_v36  ;;  %v3633_v37 = vpop.f32.mrb[86].mxu1  ;;  %v7059_v36 = vld [vmem:[#allocation18_spill] sm:$0xff] }
 0x59a   : > { %v5922_v42 = vsel %vm7054_vm0, %v2345_v20, 0.0  ;;  %v2346_v2 = vadd.f32 %v3633_v37, %v2314_v14  ;;  %v2247_v16 = vpop.f32.mrb[87].mxu1  ;;  %vm7060_vm8 = vcmp.ne.f32.partialorder %v7059_v36, 0.0 }
 0x59b   : > { %7055 = vst [vmem:[#allocation86_spill] sm:$0xff] %v5922_v42  ;;  %v2401_v8 = vadd.f32 %v2393_v38, %v5922_v42  ;;  %v5927_v19 = vsel %vm7057_vm5, %v2343_v3, 0.0  ;;  %v2344_v18 = vadd.f32 %v2312_v5, %v2247_v16  ;;  %v7065_v38 = vld [vmem:[#allocation90_spill] sm:$0xff]  ;;  %v7066_v5 = vld [vmem:[#allocation97_spill] sm:$0xff]  ;;  %v7072_v42 = vld [vmem:[#allocation19_spill] sm:$0xff]  ;;  %vm7109_vm5 = vcmask 392192  }
 0x59c   : > { %7058 = vst [vmem:[#allocation70_spill] sm:$0xff] %v5927_v19  ;;  %v2399_v56 = vadd.f32 %v2391_v23, %v5927_v19  ;;  %v5932_v29 = vsel %vm7060_vm8, %v2346_v2, 0.0  ;;  %v2317_v37 = vadd.f32 %v7065_v38, %v6743_v15  ;;  %v2315_v16 = vadd.f32 %v7066_v5, %v6745_v62  ;;  %v7067_v2 = vld [vmem:[#allocation79_spill] sm:$0xff]  ;;  %vm7110_vm8 = vmmov %vm7109_vm5 }
 0x59d   : > { %7061 = vst [vmem:[#allocation64_spill] sm:$0xff] %v5932_v29  ;;  %v2402_v54 = vadd.f32 %v2394_v33, %v5932_v29  ;;  %v5937_v20 = vsel %vm7063_vm11, %v2344_v18, 0.0  ;;  %v2318_v36 = vadd.f32 %v7067_v2, %v6747_v45  ;;  %v2316_v18 = vadd.f32 %v7068_v35, %v6749_v47  ;;  %v7069_v29 = vld [vmem:[#allocation21_spill] sm:$0xff]  ;;  %vm7121_vm11 = vmmov %vm7109_vm5 }
 0x59e   : > { %7064 = vst [vmem:[#allocation74_spill] sm:$0xff] %v5937_v20  ;;  %v2400_v14 = vadd.f32 %v2392_v17, %v5937_v20  ;;  %vm7070_vm3 = vcmp.ne.f32.partialorder %v7069_v29, 0.0  ;;  %vm7073_vm4 = vcmp.ne.f32.partialorder %v7072_v42, 0.0 }
 0x59f   : > { %v3636_v3 = vpop.f32.mrb[88].mxu1 }
 0x5a0   : > { %v2349_v23 = vadd.f32 %v3636_v3, %v2317_v37  ;;  %v2260_v40 = vpop.f32.mrb[89].mxu1 }
 0x5a1   : > { %v2347_v46 = vadd.f32 %v2315_v16, %v2260_v40  ;;  %v3637_v33 = vpop.f32.mrb[90].mxu1  ;;  %v7075_v40 = vld [vmem:[#allocation24_spill] sm:$0xff] }
 0x5a2   : > { %v5950_v17 = vsel %vm7070_vm3, %v2349_v23, 0.0  ;;  %v2350_v20 = vadd.f32 %v3637_v33, %v2318_v36  ;;  %v2263_v38 = vpop.f32.mrb[91].mxu1  ;;  %vm7076_vm2 = vcmp.ne.f32.partialorder %v7075_v40, 0.0  ;;  %v7078_v23 = vld [vmem:[#allocation20_spill] sm:$0xff]  ;;  %vm7122_vm3 = vmmov %vm7109_vm5 }
 0x5a3   : > { %7071 = vst [vmem:[#allocation80_spill] sm:$0xff] %v5950_v17  ;;  %v2405_v19 = vadd.f32 %v2397_v28, %v5950_v17  ;;  %v5955_v37 = vsel %vm7073_vm4, %v2347_v46, 0.0  ;;  %v2348_v3 = vadd.f32 %v2316_v18, %v2263_v38  ;;  %vm7079_vm12 = vcmp.ne.f32.partialorder %v7078_v23, 0.0  ;;  %v7081_v46 = vld [vmem:[#allocation39_spill] sm:$0xff]  ;;  %v7082_v40 = vld [vmem:[#allocation44_spill] sm:$0xff]  ;;  %v7083_v23 = vld [vmem:[#allocation78_spill] sm:$0xff] }
 0x5a4   : > { %7074 = vst [vmem:[#allocation62_spill] sm:$0xff] %v5955_v37  ;;  %v2403_v5 = vadd.f32 %v2395_v53, %v5955_v37  ;;  %v5960_v16 = vsel %vm7076_vm2, %v2350_v20, 0.0  ;;  %v2321_v42 = vadd.f32 %v7081_v46, %v4974_v39  ;;  %v2319_v20 = vadd.f32 %v7082_v40, %v6751_v31  ;;  %vm7123_vm4 = vmmov %vm7122_vm3 }
 0x5a5   : > { %7077 = vst [vmem:[#allocation91_spill] sm:$0xff] %v5960_v16  ;;  %v2413_v35 = vsub.f32 0.0, %v2405_v19  ;;  %v2406_v2 = vadd.f32 %v2398_v52, %v5960_v16  ;;  %v5965_v36 = vsel %vm7079_vm12, %v2348_v3, 0.0  ;;  %v2322_v3 = vadd.f32 %v7083_v23, %v5057_v9  ;;  %vm7124_vm2 = vmmov %vm7122_vm3 }
 0x5a6   : > { %7080 = vst [vmem:[#allocation94_spill] sm:$0xff] %v5965_v36  ;;  %v2411_v33 = vsub.f32 0.0, %v2403_v5  ;;  %v2404_v28 = vadd.f32 %v2396_v44, %v5965_v36  ;;  %v7084_v36 = vld [vmem:[#allocation65_spill] sm:$0xff]  ;;  %vm7125_vm12 = vmmov %vm7124_vm2 }
 0x5a7   : > { %v2423_v18 = vmul.f32 1.442695, %v2413_v35  ;;  %v2414_v38 = vsub.f32 0.0, %v2406_v2  ;;  %v3640_v53 = vpop.f32.mrb[92].mxu1  ;;  %v2320_v46 = vadd.f32 %v7084_v36, %v6753_v41  ;;  %v7085_v2 = vld [vmem:[#allocation27_spill] sm:$0xff]  ;;  %v7091_v36 = vld [vmem:[#allocation28_spill] sm:$0xff] }
 0x5a8   : > { %v2419_v29 = vmul.f32 1.442695, %v2411_v33  ;;  %v2412_v19 = vsub.f32 0.0, %v2404_v28  ;;  %v2353_v37 = vadd.f32 %v3640_v53, %v2321_v42  ;;  %v2276_v52 = vpop.f32.mrb[93].mxu1  ;;  %vm7086_vm13 = vcmp.ne.f32.partialorder %v7085_v2, 0.0  ;;  %v7088_v28 = vld [vmem:[#allocation25_spill] sm:$0xff] }
 0x5a9   : > { %3893 = vpow2.f32 %v2423_v18  ;;  %v2425_v5 = vmul.f32 1.442695, %v2414_v38  ;;  %v2351_v16 = vadd.f32 %v2319_v20, %v2276_v52  ;;  %v3641_v44 = vpop.f32.mrb[94].mxu1  ;;  %vm7089_vm14 = vcmp.ne.f32.partialorder %v7088_v28, 0.0  ;;  %v7094_v20 = vld [vmem:[#allocation26_spill] sm:$0xff]  ;;  %v7105_v2 = vld [vmem:[#allocation61_spill] sm:$0xff] }
 0x5aa   : > { %3895 = vpow2.f32 %v2419_v29  ;;  %v2421_v35 = vmul.f32 1.442695, %v2412_v19  ;;  %v5978_v17 = vsel %vm7086_vm13, %v2353_v37, 0.0  ;;  %v2354_v40 = vadd.f32 %v3641_v44, %v2322_v3  ;;  %v2279_v33 = vpop.f32.mrb[95].mxu1  ;;  %v7104_v28 = vld [vmem:[#allocation42_spill] sm:$0xff]  ;;  %vm7126_vm13 = vmmov %vm7124_vm2 }
 0x5ab   : > { %7087 = vst [vmem:[#allocation87_spill] sm:$0xff] %v5978_v17  ;;  %3897 = vpow2.f32 %v2425_v5  ;;  %v2409_v42 = vadd.f32 %v2401_v8, %v5978_v17  ;;  %v5983_v23 = vsel %vm7089_vm14, %v2351_v16, 0.0  ;;  %v2352_v18 = vadd.f32 %v2320_v46, %v2279_v33  ;;  %vm7127_vm14 = vmmov %vm7124_vm2 }
 0x5ac   : > { %7090 = vst [vmem:[#allocation71_spill] sm:$0xff] %v5983_v23  ;;  %3899 = vpow2.f32 %v2421_v35  ;;  %v2407_v38 = vadd.f32 %v2399_v56, %v5983_v23  ;;  %vm7092_vm15 = vcmp.ne.f32.partialorder %v7091_v36, 0.0  ;;  %vm7095_vm0 = vcmp.ne.f32.partialorder %v7094_v20, 0.0  ;;  %v7101_v20 = vld [vmem:[#allocation67_spill] sm:$0xff]  ;;  %v7102_v36 = vld [vmem:[#allocation68_spill] sm:$0xff] }
 0x5ad   : > { %v5988_v29 = vsel %vm7092_vm15, %v2354_v40, 0.0  ;;  %v2417_v53 = vsub.f32 0.0, %v2409_v42  ;;  %v5993_v19 = vsel %vm7095_vm0, %v2352_v18, 0.0  ;;  %vm7128_vm15 = vmmov %vm7124_vm2 }
 0x5ae   : > { %7093 = vst [vmem:[#allocation53_spill] sm:$0xff] %v5988_v29  ;;  %v2410_v37 = vadd.f32 %v2402_v54, %v5988_v29  ;;  %7096 = vst [vmem:[#allocation85_spill] sm:$0xff] %v5993_v19  ;;  %v2415_v8 = vsub.f32 0.0, %v2407_v38  ;;  %v2408_v52 = vadd.f32 %v2400_v14, %v5993_v19  ;;  %v7106_v19 = vld [vmem:[#allocation43_spill] sm:$0xff] }
 0x5af   : > { %v2431_v16 = vmul.f32 1.442695, %v2417_v53  ;;  %vm7129_vm0 = vmmov %vm7124_vm2 }
 0x5b0   : > { %v2418_v3 = vsub.f32 0.0, %v2410_v37  ;;  %v2427_v5 = vmul.f32 1.442695, %v2415_v8  ;;  %v2416_v44 = vsub.f32 0.0, %v2408_v52 }
 0x5b1   : > { %3901 = vpow2.f32 %v2431_v16 }
 0x5b2   : > { %v2433_v56 = vmul.f32 1.442695, %v2418_v3  ;;  %3903 = vpow2.f32 %v2427_v5  ;;  %v2429_v46 = vmul.f32 1.442695, %v2416_v44 }
 0x5b3   : > { %v3894_v35 = vpop.eup %3893 }
 0x5b4   : > { %3905 = vpow2.f32 %v2433_v56  ;;  %v3896_v40 = vpop.eup %3895  ;;  %v2437_v33 = vadd.f32 1.0, %v3894_v35  ;;  %v7097_v35 = vld [vmem:[#allocation82_spill] sm:$0xff] }
 0x5b5   : > { %3907 = vpow2.f32 %v2429_v46  ;;  %v3898_v54 = vpop.eup %3897  ;;  %v2435_v42 = vadd.f32 1.0, %v3896_v40 }
 0x5b6   : > { %v3900_v18 = vpop.eup %3899  ;;  %3909 = vrcp.f32 %v2437_v33  ;;  %v2438_v38 = vadd.f32 1.0, %v3898_v54  ;;  %v7098_v33 = vld [vmem:[#allocation83_spill] sm:$0xff] }
 0x5b7   : > { %3911 = vrcp.f32 %v2435_v42  ;;  %v2436_v14 = vadd.f32 1.0, %v3900_v18  ;;  %v7099_v42 = vld [vmem:[#allocation84_spill] sm:$0xff] }
 0x5b8   : > { %3913 = vrcp.f32 %v2438_v38 }
 0x5b9   : > { %3915 = vrcp.f32 %v2436_v14  ;;  %v7100_v14 = vld [vmem:[#allocation66_spill] sm:$0xff] }
 0x5bb   : > { %v3902_v53 = vpop.eup %3901 }
 0x5bc   : > { %v3904_v37 = vpop.eup %3903  ;;  %v2441_v8 = vadd.f32 1.0, %v3902_v53 }
 0x5bd   : > { %v2439_v16 = vadd.f32 1.0, %v3904_v37 }
 0x5be   : > { %v3906_v52 = vpop.eup %3905  ;;  %3917 = vrcp.f32 %v2441_v8 }
 0x5bf   : > { %v3908_v3 = vpop.eup %3907  ;;  %v2442_v5 = vadd.f32 1.0, %v3906_v52  ;;  %3919 = vrcp.f32 %v2439_v16  ;;  %v7103_v52 = vld [vmem:[#allocation69_spill] sm:$0xff] }
 0x5c0   : > { %v2440_v44 = vadd.f32 1.0, %v3908_v3  ;;  %v3910_v56 = vpop.eup %3909 }
 0x5c1   : > { %3921 = vrcp.f32 %v2442_v5  ;;  %v3912_v46 = vpop.eup %3911  ;;  %v2453_v40 = vmul.f32 %v3910_v56, %v7097_v35  ;;  %v2461_v54 = vmul.f32 %v3910_v56, %v7098_v33  ;;  %v2469_v18 = vmul.f32 %v3910_v56, %v7099_v42 }
 0x5c2   : > { %3923 = vrcp.f32 %v2440_v44  ;;  %v3914_v38 = vpop.eup %3913  ;;  %v2451_v53 = vmul.f32 %v3912_v46, %v7100_v14  ;;  %v2459_v37 = vmul.f32 %v3912_v46, %v7101_v20  ;;  %v2467_v8 = vmul.f32 %v3912_v46, %v7102_v36  ;;  %v7107_v14 = vld [vmem:[#allocation77_spill] sm:$0xff] }
 0x5c3   : > { %v2475_v16 = vmul.f32 %v3912_v46, %v7103_v52  ;;  %v3916_v3 = vpop.eup %3915  ;;  %v2454_v5 = vmul.f32 %v3914_v38, %v7104_v28  ;;  %v2462_v44 = vmul.f32 %v3914_v38, %v7105_v2  ;;  %v2470_v35 = vmul.f32 %v3914_v38, %v7106_v19  ;;  %v7108_v52 = vld [vmem:[#allocation48_spill] sm:$0xff] }
 0x5c4   : > { %v2477_v33 = vmul.f32 %v3910_v56, %v6972_v57  ;;  %v2452_v42 = vmul.f32 %v3916_v3, %v6973_v6  ;;  %v2460_v29 = vmul.f32 %v3916_v3, %v6974_v1  ;;  %v2468_v23 = vmul.f32 %v3916_v3, %v7107_v14  ;;  %v7111_v1 = vld [vmem:[#allocation54_spill] sm:$0xff]  ;;  %v7112_v56 = vld [vmem:[#allocation40_spill] sm:$0xff] }
 0x5c5   : > { %v2476_v20 = vmul.f32 %v3916_v3, %v6845_v55  ;;  %v2484_v36 = vpack.c.bf16 %v2454_v5, %v2453_v40  ;;  %v2488_v17 = vpack.c.bf16 %v2462_v44, %v2461_v54  ;;  %v2492_v46 = vpack.c.bf16 %v2470_v35, %v2469_v18  ;;  %v7113_v40 = vld [vmem:[#allocation45_spill] sm:$0xff]  ;;  %v7114_v18 = vld [vmem:[#allocation46_spill] sm:$0xff] }
 0x5c6   : > { %v2478_v7 = vmul.f32 %v3914_v38, %v7108_v52  ;;  %v2483_v28 = vpack.c.bf16 %v2452_v42, %v2451_v53  ;;  %v2487_v21 = vpack.c.bf16 %v2460_v29, %v2459_v37  ;;  %v2491_v2 = vpack.c.bf16 %v2468_v23, %v2467_v8  ;;  %v7115_v53 = vld [vmem:[#allocation63_spill] sm:$0xff]  ;;  %v7119_v35 = vld [vmem:[#allocation50_spill] sm:$0xff] }
 0x5c7   : > { %v2495_v4 = vpack.c.bf16 %v2476_v20, %v2475_v16  ;;  %v7116_v23 = vld [vmem:[#allocation47_spill] sm:$0xff]  ;;  %v7118_v16 = vld [vmem:[#allocation38_spill] sm:$0xff] }
 0x5c8   : > { %v2496_v19 = vpack.c.bf16 %v2478_v7, %v2477_v33  ;;  %v3918_v0 = vpop.eup %3917  ;;  %3648 = vmatprep.mubr.msk.bf16.mxu0 %vm7109_vm5, %v2483_v28  ;;  %v7117_v7 = vld [vmem:[#allocation52_spill] sm:$0xff]  ;;  %v7120_v42 = vld [vmem:[#allocation98_spill] sm:$0xff]  ;;  %vm7130_vm5 = vmmov %vm7129_vm0 }
 0x5c9   : > { %v3920_v6 = vpop.eup %3919  ;;  %3649 = vmatmul.mubr.msk.bf16.vlgmr.msra.gmra.mrb[80].mxu0 %vm7110_vm8, %v2484_v36  ;;  %v2457_v57 = vmul.f32 %v3918_v0, %v7111_v1  ;;  %v2465_v55 = vmul.f32 %v3918_v0, %v7112_v56  ;;  %v2473_v54 = vmul.f32 %v3918_v0, %v7113_v40  ;;  %v2481_v3 = vmul.f32 %v3918_v0, %v7114_v18  ;;  %vm7131_vm8 = vmmov %vm7129_vm0 }
 0x5ca   : > { %v2455_v29 = vmul.f32 %v3920_v6, %v7115_v53  ;;  %v2463_v37 = vmul.f32 %v3920_v6, %v7116_v23  ;;  %v2471_v8 = vmul.f32 %v3920_v6, %v7117_v7  ;;  %v2479_v5 = vmul.f32 %v3920_v6, %v7118_v16 }
 0x5cb   : > { %v3922_v38 = vpop.eup %3921 }
 0x5cc   : > { %v3924_v44 = vpop.eup %3923  ;;  %v2458_v33 = vmul.f32 %v3922_v38, %v7119_v35  ;;  %v2466_v14 = vmul.f32 %v3922_v38, %v7120_v42  ;;  %v2474_v20 = vmul.f32 %v3922_v38, %v6984_v61  ;;  %v2482_v36 = vmul.f32 %v3922_v38, %v6985_v26  ;;  %v3789_v61 = vld [vmem:[%s6269_s5] sm:$0xff]   ;;  %v3790_v26 = vld [vmem:[%s6269_s5 + $0x8] sm:$0xff]  }
 0x5cd   : > { %v2456_v0 = vmul.f32 %v3924_v44, %v6848_v32  ;;  %v2464_v52 = vmul.f32 %v3924_v44, %v6849_v22  ;;  %v2472_v28 = vmul.f32 %v3924_v44, %v6850_v58  ;;  %v2480_v1 = vmul.f32 %v3924_v44, %v4982_v60  ;;  %v3786_v60 = vld [vmem:[%s6268_s4] sm:$0xff]   ;;  %v3787_v32 = vld [vmem:[%s6268_s4 + $0x8] sm:$0xff]   ;;  %v3788_v22 = vld [vmem:[%s6268_s4 + $0x10] sm:$0xff]   ;;  %3694 = vmatprep.subr.bf16.mxu0 %v3789_v61 }
 0x5ce   : > { %v2486_v56 = vpack.c.bf16 %v2458_v33, %v2457_v57  ;;  %v2490_v40 = vpack.c.bf16 %v2466_v14, %v2465_v55  ;;  %v2494_v6 = vpack.c.bf16 %v2474_v20, %v2473_v54  ;;  %v2498_v18 = vpack.c.bf16 %v2482_v36, %v2481_v3  ;;  %3680 = vmatprep.subr.bf16.mxu1 %v3786_v60 }
 0x5cf   : > { %v2485_v53 = vpack.c.bf16 %v2456_v0, %v2455_v29  ;;  %v2489_v23 = vpack.c.bf16 %v2464_v52, %v2463_v37  ;;  %v2493_v7 = vpack.c.bf16 %v2472_v28, %v2471_v8  ;;  %v2497_v16 = vpack.c.bf16 %v2480_v1, %v2479_v5  ;;  %3681 = vmatpush3.bf16.msra.mxu1 %v3786_v60 }
 0x5d0   : > { %3682 = vmatprep.subr.bf16.mxu1 %v3787_v32  ;;  %v7135_v58 = vmov 0.0   ;;  %3695 = vmatpush3.bf16.msra.mxu0 %v3789_v61  ;;  %v2708_v55 = vadd.f32 %v5806_v30, %v6745_v62  ;;  %v2711_v38 = vadd.f32 %v5816_v11, %v6747_v45  ;;  %v2709_v8 = vadd.f32 %v5826_v12, %v6749_v47  ;;  %v7142_v61 = vld [vmem:[#allocation32_spill] sm:$0xff] }
 0x5d1   : > { %3652 = vmatprep.mubr.msk.bf16.mxu0 %vm7121_vm11, %v2485_v53  ;;  %vm7132_vm11 = vmmov %vm7129_vm0  ;;  %3696 = vmatprep.subr.bf16.mxu0 %v3790_v26  ;;  %v2712_v30 = vadd.f32 %v5854_v59, %v6751_v31  ;;  %v2715_v11 = vadd.f32 %v5864_v49, %v5057_v9  ;;  %v2713_v12 = vadd.f32 %v5874_v27, %v6753_v41 }
 0x5d2   : > { %3653 = vmatmul.mubr.msk.bf16.gmra.mrb[84].mxu0 %vm7122_vm3, %v2486_v56  ;;  %vm7133_vm3 = vmmov %vm7129_vm0  ;;  %v2716_v59 = vadd.f32 %v5812_v25, %v6745_v62  ;;  %v2719_v49 = vadd.f32 %v5822_v24, %v6747_v45  ;;  %v2717_v27 = vadd.f32 %v5832_v10, %v6749_v47 }
 0x5d3   : > { %3656 = vmatprep.mubr.msk.bf16.mxu0 %vm7123_vm4, %v2487_v21  ;;  %vm7134_vm4 = vmmov %vm7129_vm0  ;;  %3683 = vmatpush3.bf16.msra.mxu1 %v3787_v32  ;;  %v3792_v21 = vld [vmem:[%s6269_s5 + $0x18] sm:$0xff]  }
 0x5d4   : > { %3684 = vmatprep.subr.bf16.mxu1 %v3788_v22  ;;  %3697 = vmatpush3.bf16.msra.mxu0 %v3790_v26  ;;  %v7140_v32 = vld [vmem:[#allocation8_spill] sm:$0xff]  ;;  %v7144_v26 = vld [vmem:[#allocation6_spill] sm:$0xff] }
 0x5d7   : > { %3685 = vmatpush3.bf16.msra.mxu1 %v3788_v22 }
 0x5d8   : > { %3718 = vmatprep.subr.bf16.mxu1 %v7135_v58 }
 0x5da   : > { %3657 = vmatmul.mubr.msk.bf16.gmra.mrb[88].mxu0 %vm7124_vm2, %v2488_v17  ;;  %v3793_v17 = vld [vmem:[%s6269_s5 + $0x20] sm:$0xff]   ;;  %vm7136_vm2 = vcmp.ne.f32.partialorder %v6871_v51, 0.0 }
 0x5db   : > { %3660 = vmatprep.mubr.msk.bf16.mxu0 %vm7125_vm12, %v2489_v23  ;;  %vm7137_vm12 = vcmp.ne.f32.partialorder %v6873_v63, 0.0 }
 0x5e2   : > { %3661 = vmatmul.mubr.msk.bf16.gmra.mrb[92].mxu0 %vm7126_vm13, %v2490_v40  ;;  %vm7138_vm13 = vcmp.ne.f32.partialorder %v7002_v48, 0.0 }
 0x5e3   : > { %3664 = vmatprep.mubr.msk.bf16.mxu0 %vm7127_vm14, %v2491_v2  ;;  %v3795_v2 = vld [vmem:[%s6269_s5 + $0x30] sm:$0xff]   ;;  %vm7139_vm14 = vcmp.ne.f32.partialorder %v7004_v13, 0.0 }
 0x5ea   : > { %3665 = vmatmul.mubr.msk.bf16.gmra.mrb[96].mxu0 %vm7128_vm15, %v2492_v46  ;;  %v3794_v46 = vld [vmem:[%s6269_s5 + $0x28] sm:$0xff]   ;;  %vm7141_vm15 = vcmp.ne.f32.partialorder %v7140_v32, 0.0 }
 0x5eb   : > { %3668 = vmatprep.mubr.msk.bf16.mxu0 %vm7129_vm0, %v2493_v7  ;;  %vm7143_vm0 = vcmp.ne.f32.partialorder %v7142_v61, 0.0 }
 0x5f2   : > { %3669 = vmatmul.mubr.msk.bf16.gmra.mrb[100].mxu0 %vm7130_vm5, %v2494_v6  ;;  %vm7145_vm5 = vcmp.ne.f32.partialorder %v7144_v26, 0.0 }
 0x5f3   : > { %3672 = vmatprep.mubr.msk.bf16.mxu0 %vm7131_vm8, %v2495_v4  ;;  %v3791_v4 = vld [vmem:[%s6269_s5 + $0x10] sm:$0xff]  }
 0x5f4   : > { %3698 = vmatprep.subr.bf16.mxu0 %v3791_v4 }
 0x5f5   : > { %3699 = vmatpush3.bf16.msra.mxu0 %v3791_v4 }
 0x5f6   : > { %3700 = vmatprep.subr.bf16.mxu0 %v3792_v21 }
 0x5f9   : > { %3701 = vmatpush3.bf16.msra.mxu0 %v3792_v21  ;;  %v7146_v21 = vld [vmem:[#allocation30_spill] sm:$0xff] }
 0x5fa   : > { %3673 = vmatmul.mubr.msk.bf16.gmra.mrb[104].mxu0 %vm7132_vm11, %v2496_v19  ;;  %3702 = vmatprep.subr.bf16.mxu0 %v3793_v17  ;;  %v2710_v19 = vadd.f32 %v5798_v43, %v6743_v15  ;;  %v2714_v43 = vadd.f32 %v5846_v34, %v4974_v39  ;;  %v2718_v34 = vadd.f32 %v5802_v50, %v6743_v15  ;;  %vm7147_vm8 = vcmp.ne.f32.partialorder %v7146_v21, 0.0  ;;  %v7167_v21 = vld [vmem:[#allocation13_spill] sm:$0xff] }
 0x5fb   : > { %3676 = vmatprep.mubr.msk.bf16.mxu0 %vm7133_vm3, %v2497_v16 }
 0x5fd   : > { %3703 = vmatpush3.bf16.msra.mxu0 %v3793_v17 }
 0x5fe   : > { %3704 = vmatprep.subr.bf16.mxu0 %v3794_v46 }
 0x601   : > { %3705 = vmatpush3.bf16.msra.mxu0 %v3794_v46  ;;  %v7148_v46 = vld [vmem:[#allocation60_spill] sm:$0xff] }
 0x602   : > { %3677 = vmatmul.mubr.msk.bf16.gmra.mrb[108].mxu0 %vm7134_vm4, %v2498_v18  ;;  %3706 = vmatprep.subr.bf16.mxu0 %v3795_v2  ;;  %v2722_v13 = vadd.f32 %v7148_v46, %v4974_v39 }
 0x605   : > { %3707 = vmatpush3.bf16.msra.mxu0 %v3795_v2 }
 0x69c   : > { %v3650_v57 = vpop.f32.mrb[80].mxu0 }
 0x69d   : > { %v2742_v54 = vadd.f32 %v3650_v57, %v2710_v19  ;;  %v2581_v3 = vpop.f32.mrb[81].mxu0  ;;  %v7149_v19 = vld [vmem:[#allocation55_spill] sm:$0xff] }
 0x69e   : > { %v2740_v29 = vadd.f32 %v2708_v55, %v2581_v3  ;;  %v3651_v37 = vpop.f32.mrb[82].mxu0  ;;  %v2720_v57 = vadd.f32 %v7149_v19, %v6751_v31  ;;  %v7150_v3 = vld [vmem:[#allocation56_spill] sm:$0xff]  ;;  %v7169_v19 = vld [vmem:[#allocation11_spill] sm:$0xff] }
 0x69f   : > { %v2743_v5 = vadd.f32 %v3651_v37, %v2711_v38  ;;  %v2584_v44 = vpop.f32.mrb[83].mxu0  ;;  %v2774_v53 = vsel %vm7136_vm2, %v2742_v54, 0.0  ;;  %v2723_v38 = vadd.f32 %v7150_v3, %v5057_v9  ;;  %v7171_v3 = vld [vmem:[#allocation14_spill] sm:$0xff] }
 0x6a0   : > { %v2741_v35 = vadd.f32 %v2709_v8, %v2584_v44  ;;  %v2772_v25 = vsel %vm7138_vm13, %v2740_v29, 0.0  ;;  %v7151_v8 = vld [vmem:[#allocation57_spill] sm:$0xff]  ;;  %v7175_v44 = vld [vmem:[#allocation86_spill] sm:$0xff] }
 0x6a1   : > { %v2775_v22 = vsel %vm7141_vm15, %v2743_v5, 0.0  ;;  %v2721_v5 = vadd.f32 %v7151_v8, %v6753_v41 }
 0x6a2   : > { %v2773_v63 = vsel %vm7145_vm5, %v2741_v35, 0.0 }
 0x6a5   : > { %v3654_v33 = vpop.f32.mrb[84].mxu0 }
 0x6a6   : > { %v2746_v42 = vadd.f32 %v3654_v33, %v2714_v43  ;;  %v2597_v14 = vpop.f32.mrb[85].mxu0 }
 0x6a7   : > { %v2744_v20 = vadd.f32 %v2712_v30, %v2597_v14  ;;  %v3655_v36 = vpop.f32.mrb[86].mxu0 }
 0x6a8   : > { %v2747_v0 = vadd.f32 %v3655_v36, %v2715_v11  ;;  %v2600_v52 = vpop.f32.mrb[87].mxu0  ;;  %v2778_v35 = vsel %vm362_vm9, %v2746_v42, 0.0  ;;  %v7154_v11 = vld [vmem:[#allocation9_spill] sm:$0xff] }
 0x6a9   : > { %v2745_v28 = vadd.f32 %v2713_v12, %v2600_v52  ;;  %vm7155_vm11 = vcmp.ne.f32.partialorder %v7154_v11, 0.0  ;;  %v7156_v52 = vld [vmem:[#allocation33_spill] sm:$0xff]  ;;  %v7177_v11 = vld [vmem:[#allocation64_spill] sm:$0xff] }
 0x6aa   : > { %v2776_v36 = vsel %vm7155_vm11, %v2744_v20, 0.0  ;;  %vm7157_vm3 = vcmp.ne.f32.partialorder %v7156_v52, 0.0 }
 0x6ad   : > { %v3658_v1 = vpop.f32.mrb[88].mxu0 }
 0x6ae   : > { %v2750_v56 = vadd.f32 %v3658_v1, %v2718_v34  ;;  %v2613_v40 = vpop.f32.mrb[89].mxu0 }
 0x6af   : > { %v2748_v6 = vadd.f32 %v2716_v59, %v2613_v40  ;;  %v3659_v18 = vpop.f32.mrb[90].mxu0 }
 0x6b0   : > { %v2782_v50 = vsel %vm7137_vm12, %v2750_v56, 0.0  ;;  %v2751_v23 = vadd.f32 %v3659_v18, %v2719_v49  ;;  %v2616_v7 = vpop.f32.mrb[91].mxu0  ;;  %v2779_v56 = vsel %vm363_vm6, %v2747_v0, 0.0  ;;  %v2777_v18 = vsel %vm361_vm1, %v2745_v28, 0.0  ;;  %v7166_v28 = vld [vmem:[#allocation59_spill] sm:$0xff] }
 0x6b1   : > { %v2806_v16 = vadd.f32 %v2782_v50, %v2774_v53  ;;  %v2780_v24 = vsel %vm7139_vm14, %v2748_v6, 0.0  ;;  %v2749_v60 = vadd.f32 %v2717_v27, %v2616_v7  ;;  %v7161_v53 = vld [vmem:[#allocation34_spill] sm:$0xff]  ;;  %vm7168_vm1 = vcmp.ne.f32.partialorder %v7167_v21, 0.0 }
 0x6b2   : > { %v2804_v10 = vadd.f32 %v2780_v24, %v2772_v25  ;;  %v2783_v51 = vsel %vm7143_vm0, %v2751_v23, 0.0  ;;  %vm7162_vm9 = vcmp.ne.f32.partialorder %v7161_v53, 0.0  ;;  %v7163_v23 = vld [vmem:[#allocation58_spill] sm:$0xff]  ;;  %v7164_v24 = vld [vmem:[#allocation7_spill] sm:$0xff]  ;;  %vm7170_vm6 = vcmp.ne.f32.partialorder %v7169_v19, 0.0 }
 0x6b3   : > { %v2807_v4 = vadd.f32 %v2783_v51, %v2775_v22  ;;  %v2781_v48 = vsel %vm7147_vm8, %v2749_v60, 0.0  ;;  %v2726_v7 = vadd.f32 %v7163_v23, %v6743_v15  ;;  %v2724_v60 = vadd.f32 %v7164_v24, %v6745_v62  ;;  %v7165_v22 = vld [vmem:[#allocation31_spill] sm:$0xff] }
 0x6b4   : > { %v2805_v17 = vadd.f32 %v2781_v48, %v2773_v63  ;;  %v2727_v61 = vadd.f32 %v7165_v22, %v6747_v45  ;;  %v2725_v63 = vadd.f32 %v7166_v28, %v6749_v47  ;;  %v7189_v28 = vld [vmem:[#allocation91_spill] sm:$0xff] }
 0x6b5   : > { %v3662_v2 = vpop.f32.mrb[92].mxu0 }
 0x6b6   : > { %v2754_v55 = vadd.f32 %v3662_v2, %v2722_v13  ;;  %v2629_v54 = vpop.f32.mrb[93].mxu0 }
 0x6b7   : > { %v2752_v29 = vadd.f32 %v2720_v57, %v2629_v54  ;;  %v3663_v37 = vpop.f32.mrb[94].mxu0 }
 0x6b8   : > { %v2786_v33 = vsel %vm370_vm10, %v2754_v55, 0.0  ;;  %v2755_v30 = vadd.f32 %v3663_v37, %v2723_v38  ;;  %v2632_v14 = vpop.f32.mrb[95].mxu0  ;;  %v7173_v37 = vld [vmem:[#allocation12_spill] sm:$0xff] }
 0x6b9   : > { %v2810_v12 = vadd.f32 %v2786_v33, %v2778_v35  ;;  %v2784_v34 = vsel %vm7157_vm3, %v2752_v29, 0.0  ;;  %v2753_v1 = vadd.f32 %v2721_v5, %v2632_v14  ;;  %vm7174_vm10 = vcmp.ne.f32.partialorder %v7173_v37, 0.0  ;;  %v7176_v33 = vld [vmem:[#allocation70_spill] sm:$0xff] }
 0x6ba   : > { %v2808_v40 = vadd.f32 %v2784_v34, %v2776_v36  ;;  %v2787_v42 = vsel %vm371_vm7, %v2755_v30, 0.0  ;;  %vm7172_vm7 = vcmp.ne.f32.partialorder %v7171_v3, 0.0  ;;  %v2730_v35 = vadd.f32 %v7175_v44, %v4974_v39  ;;  %v7197_v44 = vld [vmem:[#allocation20_spill] sm:$0xff] }
 0x6bb   : > { %v2811_v27 = vadd.f32 %v2787_v42, %v2779_v56  ;;  %v2785_v50 = vsel %vm7162_vm9, %v2753_v1, 0.0  ;;  %v7179_v1 = vld [vmem:[#allocation17_spill] sm:$0xff]  ;;  %v7181_v42 = vld [vmem:[#allocation15_spill] sm:$0xff]  ;;  %vm7198_vm5 = vcmp.ne.f32.partialorder %v7197_v44, 0.0 }
 0x6bc   : > { %v2809_v20 = vadd.f32 %v2785_v50, %v2777_v18  ;;  %vm7180_vm4 = vcmp.ne.f32.partialorder %v7179_v1, 0.0  ;;  %vm7182_vm2 = vcmp.ne.f32.partialorder %v7181_v42, 0.0  ;;  %v7183_v50 = vld [vmem:[#allocation18_spill] sm:$0xff]  ;;  %v7203_v42 = vld [vmem:[#allocation27_spill] sm:$0xff] }
 0x6bd   : > { %v3666_v25 = vpop.f32.mrb[96].mxu0  ;;  %vm7184_vm12 = vcmp.ne.f32.partialorder %v7183_v50, 0.0  ;;  %vm7204_vm8 = vcmp.ne.f32.partialorder %v7203_v42, 0.0 }
 0x6be   : > { %v2758_v0 = vadd.f32 %v3666_v25, %v2726_v7  ;;  %v2645_v32 = vpop.f32.mrb[97].mxu0  ;;  %v7185_v25 = vld [vmem:[#allocation16_spill] sm:$0xff] }
 0x6bf   : > { %v2756_v51 = vadd.f32 %v2724_v60, %v2645_v32  ;;  %v3667_v26 = vpop.f32.mrb[98].mxu0  ;;  %vm7186_vm13 = vcmp.ne.f32.partialorder %v7185_v25, 0.0 }
 0x6c0   : > { %v2790_v48 = vsel %vm7168_vm1, %v2758_v0, 0.0  ;;  %v2759_v46 = vadd.f32 %v3667_v26, %v2727_v61  ;;  %v2648_v13 = vpop.f32.mrb[99].mxu0  ;;  %v7187_v0 = vld [vmem:[#allocation80_spill] sm:$0xff]  ;;  %v7188_v61 = vld [vmem:[#allocation62_spill] sm:$0xff]  ;;  %vm7211_vm1 = vcmask 392192  }
 0x6c1   : > { %v2814_v2 = vadd.f32 %v2806_v16, %v2790_v48  ;;  %v2788_v57 = vsel %vm7170_vm6, %v2756_v51, 0.0  ;;  %v2757_v55 = vadd.f32 %v2725_v63, %v2648_v13  ;;  %v2728_v16 = vadd.f32 %v7176_v33, %v6751_v31  ;;  %v7199_v33 = vld [vmem:[#allocation87_spill] sm:$0xff]  ;;  %vm7212_vm6 = vmmov %vm7211_vm1 }
 0x6c2   : > { %v2812_v54 = vadd.f32 %v2804_v10, %v2788_v57  ;;  %v2791_v38 = vsel %vm7172_vm7, %v2759_v46, 0.0  ;;  %v2731_v10 = vadd.f32 %v7177_v11, %v5057_v9  ;;  %v2734_v32 = vadd.f32 %v7187_v0, %v6743_v15  ;;  %v7191_v46 = vld [vmem:[#allocation21_spill] sm:$0xff]  ;;  %v7193_v57 = vld [vmem:[#allocation19_spill] sm:$0xff]  ;;  %v7207_v0 = vld [vmem:[#allocation28_spill] sm:$0xff] }
 0x6c3   : > { %v2815_v29 = vadd.f32 %v2807_v4, %v2791_v38  ;;  %v2789_v8 = vsel %vm7174_vm10, %v2757_v55, 0.0  ;;  %v7178_v4 = vld [vmem:[#allocation74_spill] sm:$0xff]  ;;  %vm7192_vm14 = vcmp.ne.f32.partialorder %v7191_v46, 0.0  ;;  %vm7194_vm15 = vcmp.ne.f32.partialorder %v7193_v57, 0.0  ;;  %v7195_v38 = vld [vmem:[#allocation24_spill] sm:$0xff]  ;;  %v7200_v11 = vld [vmem:[#allocation71_spill] sm:$0xff] }
 0x6c4   : > { %v2813_v5 = vadd.f32 %v2805_v17, %v2789_v8  ;;  %v2729_v34 = vadd.f32 %v7178_v4, %v6753_v41  ;;  %vm7196_vm0 = vcmp.ne.f32.partialorder %v7195_v38, 0.0  ;;  %vm7208_vm3 = vcmp.ne.f32.partialorder %v7207_v0, 0.0  ;;  %vm7213_vm7 = vmmov %vm7211_vm1 }
 0x6c5   : > { %v3670_v43 = vpop.f32.mrb[100].mxu0  ;;  %vm7214_vm10 = vmmov %vm7211_vm1 }
 0x6c6   : > { %v2762_v30 = vadd.f32 %v3670_v43, %v2730_v35  ;;  %v2661_v14 = vpop.f32.mrb[101].mxu0 }
 0x6c7   : > { %v2760_v36 = vadd.f32 %v2728_v16, %v2661_v14  ;;  %v3671_v52 = vpop.f32.mrb[102].mxu0  ;;  %v2738_v16 = vadd.f32 %v7199_v33, %v4974_v39 }
 0x6c8   : > { %v2794_v17 = vsel %vm7180_vm4, %v2762_v30, 0.0  ;;  %v2763_v59 = vadd.f32 %v3671_v52, %v2731_v10  ;;  %v2664_v56 = vpop.f32.mrb[103].mxu0  ;;  %v2736_v10 = vadd.f32 %v7200_v11, %v6751_v31 }
 0x6c9   : > { %v2818_v49 = vadd.f32 %v2810_v12, %v2794_v17  ;;  %v2792_v6 = vsel %vm7182_vm2, %v2760_v36, 0.0  ;;  %v2761_v18 = vadd.f32 %v2729_v34, %v2664_v56  ;;  %v2732_v12 = vadd.f32 %v7188_v61, %v6745_v62  ;;  %v7209_v61 = vld [vmem:[#allocation26_spill] sm:$0xff] }
 0x6ca   : > { %v2816_v53 = vadd.f32 %v2808_v40, %v2792_v6  ;;  %v2795_v23 = vsel %vm7184_vm12, %v2763_v59, 0.0  ;;  %v2735_v40 = vadd.f32 %v7189_v28, %v6747_v45  ;;  %v7202_v59 = vld [vmem:[#allocation85_spill] sm:$0xff]  ;;  %vm7210_vm9 = vcmp.ne.f32.partialorder %v7209_v61, 0.0 }
 0x6cb   : > { %v2819_v7 = vadd.f32 %v2811_v27, %v2795_v23  ;;  %v2793_v24 = vsel %vm7186_vm13, %v2761_v18, 0.0  ;;  %v7190_v27 = vld [vmem:[#allocation94_spill] sm:$0xff]  ;;  %v2737_v39 = vadd.f32 %v7202_v59, %v6753_v41  ;;  %v7205_v23 = vld [vmem:[#allocation25_spill] sm:$0xff] }
 0x6cc   : > { %v2817_v60 = vadd.f32 %v2809_v20, %v2793_v24  ;;  %v2733_v48 = vadd.f32 %v7190_v27, %v6749_v47  ;;  %vm7206_vm11 = vcmp.ne.f32.partialorder %v7205_v23, 0.0 }
 0x6cd   : > { %v3674_v22 = vpop.f32.mrb[104].mxu0 }
 0x6ce   : > { %v2766_v51 = vadd.f32 %v3674_v22, %v2734_v32  ;;  %v2677_v26 = vpop.f32.mrb[105].mxu0 }
 0x6cf   : > { %v2764_v63 = vadd.f32 %v2732_v12, %v2677_v26  ;;  %v3675_v21 = vpop.f32.mrb[106].mxu0 }
 0x6d0   : > { %v2798_v20 = vsel %vm7192_vm14, %v2766_v51, 0.0  ;;  %v2767_v13 = vadd.f32 %v3675_v21, %v2735_v40  ;;  %v2680_v19 = vpop.f32.mrb[107].mxu0 }
 0x6d1   : > { %v2822_v15 = vadd.f32 %v2814_v2, %v2798_v20  ;;  %v2796_v55 = vsel %vm7194_vm15, %v2764_v63, 0.0  ;;  %v2765_v62 = vadd.f32 %v2733_v48, %v2680_v19 }
 0x6d2   : > { %v2820_v3 = vadd.f32 %v2812_v54, %v2796_v55  ;;  %v2799_v37 = vsel %vm7196_vm0, %v2767_v13, 0.0 }
 0x6d3   : > { %v2830_v45 = vsub.f32 0.0, %v2822_v15  ;;  %v2823_v8 = vadd.f32 %v2815_v29, %v2799_v37  ;;  %v2797_v35 = vsel %vm7198_vm5, %v2765_v62, 0.0  ;;  %v7201_v29 = vld [vmem:[#allocation53_spill] sm:$0xff] }
 0x6d4   : > { %v2828_v47 = vsub.f32 0.0, %v2820_v3  ;;  %v2821_v43 = vadd.f32 %v2813_v5, %v2797_v35  ;;  %v2739_v34 = vadd.f32 %v7201_v29, %v5057_v9 }
 0x6d5   : > { %v2840_v30 = vmul.f32 1.442695, %v2830_v45  ;;  %v2831_v2 = vsub.f32 0.0, %v2823_v8  ;;  %v3678_v14 = vpop.f32.mrb[108].mxu0 }
 0x6d6   : > { %v2836_v54 = vmul.f32 1.442695, %v2828_v47  ;;  %v2829_v36 = vsub.f32 0.0, %v2821_v43  ;;  %v2770_v52 = vadd.f32 %v3678_v14, %v2738_v16  ;;  %v2693_v4 = vpop.f32.mrb[109].mxu0 }
 0x6d7   : > { %3925 = vpow2.f32 %v2840_v30  ;;  %v2842_v1 = vmul.f32 1.442695, %v2831_v2  ;;  %v2768_v17 = vadd.f32 %v2736_v10, %v2693_v4  ;;  %v3679_v5 = vpop.f32.mrb[110].mxu0 }
 0x6d8   : > { %3927 = vpow2.f32 %v2836_v54  ;;  %v2838_v56 = vmul.f32 1.442695, %v2829_v36  ;;  %v2802_v6 = vsel %vm7204_vm8, %v2770_v52, 0.0  ;;  %v2771_v31 = vadd.f32 %v3679_v5, %v2739_v34  ;;  %v2696_v18 = vpop.f32.mrb[111].mxu0  ;;  %v3796_v54 = vld [vmem:[%s6269_s5 + $0x38] sm:$0xff]  }
 0x6d9   : > { %3929 = vpow2.f32 %v2842_v1  ;;  %v2826_v50 = vadd.f32 %v2818_v49, %v2802_v6  ;;  %v2800_v25 = vsel %vm7206_vm11, %v2768_v17, 0.0  ;;  %v2769_v9 = vadd.f32 %v2737_v39, %v2696_v18  ;;  %3708 = vmatprep.subr.bf16.mxu0 %v3796_v54 }
 0x6da   : > { %3931 = vpow2.f32 %v2838_v56  ;;  %v2824_v24 = vadd.f32 %v2816_v53, %v2800_v25  ;;  %v2803_v32 = vsel %vm7208_vm3, %v2771_v31, 0.0  ;;  %3709 = vmatpush3.bf16.msra.mxu0 %v3796_v54  ;;  %vm4028_vm8 = vmmov 0  }
 0x6db   : > { %v2834_v22 = vsub.f32 0.0, %v2826_v50  ;;  %v2827_v41 = vadd.f32 %v2819_v7, %v2803_v32  ;;  %v2801_v12 = vsel %vm7210_vm9, %v2769_v9, 0.0 }
 0x6dc   : > { %v2832_v51 = vsub.f32 0.0, %v2824_v24  ;;  %v2825_v26 = vadd.f32 %v2817_v60, %v2801_v12 }
 0x6dd   : > { %v2848_v28 = vmul.f32 1.442695, %v2834_v22  ;;  %v2835_v40 = vsub.f32 0.0, %v2827_v41 }
 0x6de   : > { %v2844_v63 = vmul.f32 1.442695, %v2832_v51  ;;  %v2833_v49 = vsub.f32 0.0, %v2825_v26 }
 0x6df   : > { %3933 = vpow2.f32 %v2848_v28  ;;  %v2850_v21 = vmul.f32 1.442695, %v2835_v40 }
 0x6e0   : > { %3935 = vpow2.f32 %v2844_v63  ;;  %v2846_v27 = vmul.f32 1.442695, %v2833_v49 }
 0x6e1   : > { %v3926_v48 = vpop.eup %3925  ;;  %3937 = vpow2.f32 %v2850_v21 }
 0x6e2   : > { %v3928_v53 = vpop.eup %3927  ;;  %v2854_v46 = vadd.f32 1.0, %v3926_v48  ;;  %3939 = vpow2.f32 %v2846_v27 }
 0x6e3   : > { %v3930_v20 = vpop.eup %3929  ;;  %v2852_v7 = vadd.f32 1.0, %v3928_v53 }
 0x6e4   : > { %v3932_v13 = vpop.eup %3931  ;;  %3941 = vrcp.f32 %v2854_v46  ;;  %v2855_v19 = vadd.f32 1.0, %v3930_v20 }
 0x6e5   : > { %3943 = vrcp.f32 %v2852_v7  ;;  %v2853_v60 = vadd.f32 1.0, %v3932_v13 }
 0x6e6   : > { %3945 = vrcp.f32 %v2855_v19 }
 0x6e7   : > { %3947 = vrcp.f32 %v2853_v60 }
 0x6e9   : > { %v3934_v15 = vpop.eup %3933 }
 0x6ea   : > { %v3936_v57 = vpop.eup %3935  ;;  %v2858_v55 = vadd.f32 1.0, %v3934_v15 }
 0x6eb   : > { %v3938_v62 = vpop.eup %3937  ;;  %v2856_v3 = vadd.f32 1.0, %v3936_v57 }
 0x6ec   : > { %v3940_v38 = vpop.eup %3939  ;;  %3949 = vrcp.f32 %v2858_v55  ;;  %v2859_v37 = vadd.f32 1.0, %v3938_v62 }
 0x6ed   : > { %3951 = vrcp.f32 %v2856_v3  ;;  %v2857_v45 = vadd.f32 1.0, %v3940_v38 }
 0x6ee   : > { %v3942_v8 = vpop.eup %3941  ;;  %3953 = vrcp.f32 %v2859_v37 }
 0x6ef   : > { %v3944_v44 = vpop.eup %3943  ;;  %3955 = vrcp.f32 %v2857_v45 }
 0x6f0   : > { %v3946_v35 = vpop.eup %3945 }
 0x6f1   : > { %v3948_v47 = vpop.eup %3947  ;;  %v2869_v43 = vpack.c.bf16 %v3946_v35, %v3942_v8 }
 0x6f2   : > { %v2868_v33 = vpack.c.bf16 %v3948_v47, %v3944_v44 }
 0x6f4   : > { %3686 = vmatprep.mubr.msk.bf16.mxu1 %vm7211_vm1, %v2868_v33 }
 0x6f5   : > { %3687 = vmatmul.mubr.msk.bf16.vlgmr.msra.gmra.mrb[96].mxu1 %vm7212_vm6, %v2869_v43 }
 0x6f6   : > { %v3950_v16 = vpop.eup %3949 }
 0x6f7   : > { %v3952_v30 = vpop.eup %3951 }
 0x6f8   : > { %v3954_v2 = vpop.eup %3953 }
 0x6f9   : > { %v3956_v14 = vpop.eup %3955  ;;  %v2871_v11 = vpack.c.bf16 %v3954_v2, %v3950_v16  ;;  %v3154_v16 = vld [vmem:[%s6267_s3] sm:$0xff] }
 0x6fa   : > { %v2870_v10 = vpack.c.bf16 %v3956_v14, %v3952_v30  ;;  %v3155_v30 = vpack.c.bf16 %v3154_v16, %v3154_v16 }
 0x6fc   : > { %3690 = vmatprep.mubr.msk.bf16.mxu1 %vm7213_vm7, %v2870_v10 }
 0x6fd   : > { %3691 = vmatmul.mubr.msk.bf16.gmra.mrb[100].mxu1 %vm7214_vm10, %v2871_v11 }
 0x6fe   : > { %3726 = vmatprep.mubr.msk.bf16.mxu1 %vm4028_vm8, %v7135_v58 }
 0x7c8   : > { %v3688_v36 = vpop.f32.mrb[96].mxu1 }
 0x7c9   : > { %v2983_v52 = vmul.f32 0.2, %v3688_v36  ;;  %v2942_v4 = vpop.f32.mrb[97].mxu1  ;;  %vm2975_vm4 = vcmp.ge.f32.partialorder %v3688_v36, 0.0 }
 0x7ca   : > { %v2981_v29 = vmul.f32 0.2, %v2942_v4  ;;  %v3689_v34 = vpop.f32.mrb[98].mxu1  ;;  %vm2973_vm2 = vcmp.ge.f32.partialorder %v2942_v4, 0.0 }
 0x7cb   : > { %vm2976_vm12 = vcmp.ge.f32.partialorder %v3689_v34, 0.0  ;;  %v2984_v1 = vmul.f32 0.2, %v3689_v34  ;;  %v2945_v17 = vpop.f32.mrb[99].mxu1  ;;  %v2991_v59 = vsel %vm2975_vm4, %v3688_v36, %v2983_v52 }
 0x7cc   : > { %vm2974_vm13 = vcmp.ge.f32.partialorder %v2945_v17, 0.0  ;;  %v2982_v5 = vmul.f32 0.2, %v2945_v17  ;;  %v2989_v56 = vsel %vm2973_vm2, %v2942_v4, %v2981_v29  ;;  %vm3200_vm2 = vcmask 517121  }
 0x7cd   : > { %v2992_v39 = vsel %vm2976_vm12, %v3689_v34, %v2984_v1 }
 0x7ce   : > { %v2998_v42 = vpack.c.bf16 %v2992_v39, %v2991_v59  ;;  %v2990_v6 = vsel %vm2974_vm13, %v2945_v17, %v2982_v5 }
 0x7cf   : > { %v2997_v31 = vpack.c.bf16 %v2990_v6, %v2989_v56 }
 0x7d0   : > { %v3692_v18 = vpop.f32.mrb[100].mxu1 }
 0x7d1   : > { %v2987_v50 = vmul.f32 0.2, %v3692_v18  ;;  %v2958_v23 = vpop.f32.mrb[101].mxu1  ;;  %3710 = vmatprep.mubr.bf16.mxu0 %v2997_v31  ;;  %vm2979_vm14 = vcmp.ge.f32.partialorder %v3692_v18, 0.0 }
 0x7d2   : > { %v2985_v25 = vmul.f32 0.2, %v2958_v23  ;;  %v3693_v9 = vpop.f32.mrb[102].mxu1  ;;  %3711 = vmatmul.mubr.bf16.vlgmr.msra.gmra.mrb[112].mxu0 %v2998_v42  ;;  %vm2977_vm15 = vcmp.ge.f32.partialorder %v2958_v23, 0.0 }
 0x7d3   : > { %vm2980_vm0 = vcmp.ge.f32.partialorder %v3693_v9, 0.0  ;;  %v2988_v24 = vmul.f32 0.2, %v3693_v9  ;;  %v2961_v0 = vpop.f32.mrb[103].mxu1  ;;  %v2995_v22 = vsel %vm2979_vm14, %v3692_v18, %v2987_v50 }
 0x7d4   : > { %vm2978_vm5 = vcmp.ge.f32.partialorder %v2961_v0, 0.0  ;;  %v2986_v32 = vmul.f32 0.2, %v2961_v0  ;;  %v2993_v61 = vsel %vm2977_vm15, %v2958_v23, %v2985_v25 }
 0x7d5   : > { %v2996_v41 = vsel %vm2980_vm0, %v3693_v9, %v2988_v24 }
 0x7d6   : > { %v2994_v12 = vsel %vm2978_vm5, %v2961_v0, %v2986_v32  ;;  %v3000_v51 = vpack.c.bf16 %v2996_v41, %v2995_v22 }
 0x7d7   : > { %v2999_v26 = vpack.c.bf16 %v2994_v12, %v2993_v61 }
 0x7d9   : > { %3714 = vmatprep.mubr.bf16.mxu0 %v2999_v26 }
 0x7da   : > { %3715 = vmatmul.mubr.bf16.gmra.mrb[116].mxu0 %v3000_v51 }
 0x8a5   : > { %v3712_v28 = vpop.f32.mrb[112].mxu0 }
 0x8a6   : > { %v3140_v40 = vmul.f32 0.2, %v3712_v28  ;;  %v3099_v63 = vpop.f32.mrb[113].mxu0  ;;  %vm3132_vm11 = vcmp.ge.f32.partialorder %v3712_v28, 0.0 }
 0x8a7   : > { %v3138_v49 = vmul.f32 0.2, %v3099_v63  ;;  %v3713_v21 = vpop.f32.mrb[114].mxu0  ;;  %vm3130_vm3 = vcmp.ge.f32.partialorder %v3099_v63, 0.0 }
 0x8a8   : > { %vm3133_vm9 = vcmp.ge.f32.partialorder %v3713_v21, 0.0  ;;  %v3141_v27 = vmul.f32 0.2, %v3713_v21  ;;  %v3102_v48 = vpop.f32.mrb[115].mxu0  ;;  %v3148_v46 = vsel %vm3132_vm11, %v3712_v28, %v3140_v40 }
 0x8a9   : > { %vm3131_vm1 = vcmp.ge.f32.partialorder %v3102_v48, 0.0  ;;  %v3139_v53 = vmul.f32 0.2, %v3102_v48  ;;  %v3146_v7 = vsel %vm3130_vm3, %v3099_v63, %v3138_v49 }
 0x8aa   : > { %v3149_v20 = vsel %vm3133_vm9, %v3713_v21, %v3141_v27 }
 0x8ab   : > { %v3157_v13 = vpack.c.bf16 %v3149_v20, %v3148_v46  ;;  %v3147_v19 = vsel %vm3131_vm1, %v3102_v48, %v3139_v53 }
 0x8ac   : > { %v3156_v60 = vpack.c.bf16 %v3147_v19, %v3146_v7 }
 0x8ad   : > { %v3716_v15 = vpop.f32.mrb[116].mxu0 }
 0x8ae   : > { %v3144_v57 = vmul.f32 0.2, %v3716_v15  ;;  %v3115_v55 = vpop.f32.mrb[117].mxu0  ;;  %3719 = vmatpush3.bf16.xpose.msra.mxu1 %v3156_v60  ;;  %vm3136_vm6 = vcmp.ge.f32.partialorder %v3716_v15, 0.0 }
 0x8af   : > { %v3142_v62 = vmul.f32 0.2, %v3115_v55  ;;  %v3717_v3 = vpop.f32.mrb[118].mxu0  ;;  %3720 = vmatprep.subr.bf16.mxu1 %v7135_v58  ;;  %vm3134_vm7 = vcmp.ge.f32.partialorder %v3115_v55, 0.0 }
 0x8b0   : > { %vm3137_vm10 = vcmp.ge.f32.partialorder %v3717_v3, 0.0  ;;  %v3145_v38 = vmul.f32 0.2, %v3717_v3  ;;  %v3118_v37 = vpop.f32.mrb[119].mxu0  ;;  %v3152_v8 = vsel %vm3136_vm6, %v3716_v15, %v3144_v57 }
 0x8b1   : > { %vm3135_vm4 = vcmp.ge.f32.partialorder %v3118_v37, 0.0  ;;  %v3143_v45 = vmul.f32 0.2, %v3118_v37  ;;  %v3150_v35 = vsel %vm3134_vm7, %v3115_v55, %v3142_v62 }
 0x8b2   : > { %v3153_v44 = vsel %vm3137_vm10, %v3717_v3, %v3145_v38 }
 0x8b3   : > { %v3159_v47 = vpack.c.bf16 %v3153_v44, %v3152_v8  ;;  %v3151_v43 = vsel %vm3135_vm4, %v3118_v37, %v3143_v45 }
 0x8b4   : > { %v3158_v33 = vpack.c.bf16 %v3151_v43, %v3150_v35 }
 0x8b6   : > { %3721 = vmatpush3.bf16.xpose.msra.mxu1 %v3157_v13 }
 0x8b7   : > { %3722 = vmatprep.subr.bf16.mxu1 %v7135_v58 }
 0x8be   : > { %3723 = vmatpush3.bf16.xpose.msra.mxu1 %v3158_v33 }
 0x8bf   : > { %3724 = vmatprep.subr.bf16.mxu1 %v7135_v58 }
 0x8c6   : > { %3725 = vmatpush3.bf16.xpose.msra.mxu1 %v3159_v47 }
 0x8cd   : > { %3727 = vmatmul.mubr.bf16.vlgmr.msra.gmra.mrb[104].mxu1 %v3155_v30 }
 0x9a0   : > { %v3194_v58 = vpop.f32.mrb[104].mxu1 }
 0x9a1   : > { %3201 = vst.msk [vmem:[%s244_s29 - $0x1] sm:$0x2] %vm3200_vm2, %v3194_v58  ;;  %v3728_v2 = vpop.f32.mrb[105].mxu1 }
 0x9a2   : > { %v3197_v14 = vpop.f32.mrb[106].mxu1 }
 0x9a3   : > { %3973 = shalt.err (!%p3970_p3)
}
 0x9a4   : > { %s3974_s17 = scalar_lea.hbm %s6222_s12, 16  ;;  %s3978_s20 = scalar_lea.hbm %s6270_s6, 32 }
 0x9a5   : > { %p3975_p4 = scmp.ne.s32.totalorder %s6222_s12, %s3974_s17  ;;  %p3979_p9 = scmp.lt.u32.totalorder %s6222_s12, %s6270_s6 }
 0x9a6   : > { %p3980_p10 = scmp.lt.u32.totalorder %s3978_s20, %s3974_s17  ;;  %p3982_p12 = scmp.lt.u32.totalorder %s3974_s17, %s6222_s12 }
 0x9a7   : > { %p3976_p7 = pnand %p3975_p4, %p4103_p5 }
 0x9a8   : > { %p3981_p11 = por %p3980_p10, %p3979_p9 }
 0x9a9   : > { %p3977_p8 = pneg %p3976_p7 }
 0x9aa   : > { %p3983_p13 = por %p3982_p12, %p3981_p11 }
 0x9ac   : > { %p3984_p0 = pnand %p3983_p13, %p3977_p8 }
 0x9ae   : > { %3987 = shalt.err (!%p3984_p0)
}
 0x9af   : > { %3730 = dma.vmem_to_hbm [thread:$0]  (%p4103_p5), %s6224_s9, 16, %s6222_s12, %s3203_s13   ;;  %v3729_v11 = vpop.f32.mrb[107].mxu1 }
 0x9b0 PF: > { %p3736_p1 = scmp.ge.s32.totalorder %s4022_s24, 2  ;;  %s3227_s29 = sand.u32 1, %s4010_s21  }
 0x9b1   : > { %s3228_s10 = scalar_lea.sflag [#allocation3], %s3227_s29 }
 0x9b2   : > { %p3733_p2 = pnand %p3736_p1, %p4107_p6 }
 0x9b4   : > { %4005 = dma.done.wait (!%p3733_p2), %s3228_s10, 16  }
 0x9b5   : > { %4007 = vsyncadd (!%p3733_p2), %s3228_s10, 4294967280  ;;  %p16_p3 = scmp.ge.s32.totalorder %s4090_s27, 4   ;;  %s7215_s21 = smov %s4014_s22 }
 0x9b6   : > { %s7216_s22 = smov %s4018_s23  ;;  %s7217_s23 = smov %s4101_s30 }
 0x9b7   : > { %s7218_s24 = smov %s4090_s27  ;;  %18 = sbr.rel (!%p16_p3) target bundleno = 3 (0x3), region = 79 }
 0x9be   :  { %3232 = vsyncpa [#allocation3], 1 }
 0x9bf   :  { %3234 = vsyncpa [#allocation3 + $0x1], 1 }

</bundles_post_ra>
